<compile_context>
chip_gen: v7x
topology: tpu7x:2x2x1
jax: 0.10.0
libtpu: 0.0.40
codegen_flags: <defaults>
</compile_context>

<pallas_src>
import functools

import jax
import jax.numpy as jnp
from jax.experimental import pallas as pl
from jax.experimental.pallas import tpu as pltpu


# ----------------------------------------------------------------------------- model config

PATCH = 16
IMG = 32
CHANNELS = 3
CPP = CHANNELS * PATCH * PATCH
HIDDEN = 64
HEADS = 4
HEAD_DIM = HIDDEN // HEADS
MLP = 4 * HIDDEN
NUM_LAYERS = 4
NUM_PARALLEL = 2
LATENT = 32
TOPK = 8
NUM_CLASSES = 10
NUM_PATCHES = (IMG // PATCH) ** 2
SEQ = NUM_PATCHES + 1            # + CLS token
LN_EPS = 1e-12                   # HF ViT layernorm eps
ATTN_SCALE = 1.0 / float(HEAD_DIM) ** 0.5


# ----------------------------------------------------------------------------- kernel helpers

def _layernorm(x, g, b, eps):
    mu = jnp.mean(x, axis=-1, keepdims=True)
    var = jnp.mean((x - mu) ** 2, axis=-1, keepdims=True)
    return (x - mu) * jax.lax.rsqrt(var + eps) * g + b


def _full_spec(a):
    """Full-array block (weights/biases) for a 1-D grid."""
    if a.ndim == 2:
        return pl.BlockSpec(a.shape, lambda b: (0, 0))
    return pl.BlockSpec(a.shape, lambda b: (0, 0, 0))


# ----------------------------------------------------------------------------- the fused kernel

def _fused_csae_kernel(patches_ref, embb_ref, wpat_ref,
                       ln1g_ref, ln1b_ref, wqkv_ref, bqkv_ref, wo_ref, bo_ref,
                       ln2g_ref, ln2b_ref, w1_ref, b1_ref, w2_ref, b2_ref,
                       we_ref, be_ref,
                       lnfg_ref, lnfb_ref, wp_ref, bp_ref, wc_ref, bc_ref,
                       lat_ref, logit_ref, *, eps):
    """Whole CSAE forward for one batch item (grid axis = batch)."""
    # ---- ViT embeddings: patch projection; row 0 of `patches` is a zero row whose
    # combined bias (CLS token + pos[0]) lives in embb, rows 1.. get b_patch + pos[1:].
    x = jnp.dot(patches_ref[0], wpat_ref[...],
                preferred_element_type=jnp.float32) + embb_ref[...]          # (T, D) fp32

    for li in range(NUM_LAYERS):
        # ---- attention block (pre-LN), one fused QKV matmul per layer ----
        h = _layernorm(x, ln1g_ref[li], ln1b_ref[li], eps).astype(jnp.bfloat16)
        qkv = jnp.dot(h, wqkv_ref[li], preferred_element_type=jnp.float32) + bqkv_ref[li]
        heads = []
        for hd in range(HEADS):
            lo = hd * HEAD_DIM
            q = qkv[:, lo:lo + HEAD_DIM].astype(jnp.bfloat16)                # scale folded into Wq/bq
            k = qkv[:, HIDDEN + lo:HIDDEN + lo + HEAD_DIM].astype(jnp.bfloat16)
            v = qkv[:, 2 * HIDDEN + lo:2 * HIDDEN + lo + HEAD_DIM].astype(jnp.bfloat16)
            # QK^T without explicit transpose: contract the last dims (bf16 x bf16, fp32 acc).
            s = jax.lax.dot_general(q, k, (((1,), (1,)), ((), ())),
                                    preferred_element_type=jnp.float32)     # (T, T)
            s = s - jnp.max(s, axis=-1, keepdims=True)
            p = jnp.exp(s)
            p = p / jnp.sum(p, axis=-1, keepdims=True)                       # exact divide
            heads.append(jnp.dot(p.astype(jnp.bfloat16), v,
                                 preferred_element_type=jnp.float32))        # (T, Dh)
        ctx = jnp.concatenate(heads, axis=-1).astype(jnp.bfloat16)           # (T, D)
        x = x + jnp.dot(ctx, wo_ref[li], preferred_element_type=jnp.float32) + bo_ref[li]

        # ---- MLP block (pre-LN) ----
        h2 = _layernorm(x, ln2g_ref[li], ln2b_ref[li], eps).astype(jnp.bfloat16)
        m = jnp.dot(h2, w1_ref[li], preferred_element_type=jnp.float32) + b1_ref[li]
        # TODO(synk): HF ViT defaults to exact (erf) GELU; tanh approximation used for a
        # guaranteed Mosaic lowering (small numerical drift only).
        m = jax.nn.gelu(m, approximate=True)
        x = x + jnp.dot(m.astype(jnp.bfloat16), w2_ref[li],
                        preferred_element_type=jnp.float32) + b2_ref[li]

        # ---- SAE latent for the wrapped layers: encode(relu) + rank-threshold top-k ----
        if li < NUM_PARALLEL:
            z = jnp.dot(x.astype(jnp.bfloat16), we_ref[...],
                        preferred_element_type=jnp.float32) + be_ref[...]    # (T, L)
            z = jnp.maximum(z, 0.0)
            # keep z_i iff fewer than TOPK elements of its row are strictly larger
            # (ties at the k-th value survive, matching the topk-threshold path).
            gt = (z[:, :, None] < z[:, None, :]).astype(jnp.float32)         # (T, L, L)
            rank = jnp.sum(gt, axis=-1)                                      # (T, L)
            lat_ref[0, li] = jnp.where(rank < TOPK, z, 0.0)
            # TODO(synk): SaeWrapper's use of the reconstruction / prev_weight / task_id is
            # unspecified, so the decode matmul is omitted and x passes through unchanged.

    # ---- final layernorm (CLS row only) + pooler (dense+tanh) + classifier ----
    cls_tok = _layernorm(x[0:1, :], lnfg_ref[...], lnfb_ref[...], eps)
    pooled = jnp.tanh(jnp.dot(cls_tok.astype(jnp.bfloat16), wp_ref[...],
                              preferred_element_type=jnp.float32) + bp_ref[...])
    logit_ref[0] = jnp.dot(pooled.astype(jnp.bfloat16), wc_ref[...],
                           preferred_element_type=jnp.float32) + bc_ref[...]


# ----------------------------------------------------------------------------- pallas wrapper

def csae_fused(patches_bf16, fp):
    """patches_bf16: [B, SEQ, CPP] (row 0 zero = CLS slot). Returns (latents, logits)."""
    B = patches_bf16.shape[0]
    kernel = functools.partial(_fused_csae_kernel, eps=LN_EPS)
    w_order = ["emb_bias", "w_patch",
               "ln1_g", "ln1_b", "w_qkv", "b_qkv", "w_o", "b_o",
               "ln2_g", "ln2_b", "w1", "b1", "w2", "b2",
               "sae_we", "sae_be",
               "ln_f_g", "ln_f_b", "w_pool", "b_pool", "w_cls", "b_cls"]
    w_args = [fp[k] for k in w_order]
    return pl.pallas_call(
        kernel,
        out_shape=(jax.ShapeDtypeStruct((B, NUM_PARALLEL, SEQ, LATENT), jnp.float32),
                   jax.ShapeDtypeStruct((B, 1, NUM_CLASSES), jnp.float32)),
        grid=(B,),
        in_specs=[pl.BlockSpec((1, SEQ, CPP), lambda b: (b, 0, 0))]
                 + [_full_spec(a) for a in w_args],
        out_specs=(pl.BlockSpec((1, NUM_PARALLEL, SEQ, LATENT), lambda b: (b, 0, 0, 0)),
                   pl.BlockSpec((1, 1, NUM_CLASSES), lambda b: (b, 0, 0))),
        compiler_params=pltpu.CompilerParams(dimension_semantics=("parallel",)),
    )(patches_bf16, *w_args)


# ----------------------------------------------------------------------------- params

def init_params(key):
    def lin(key, fan_in, fan_out):
        kw, kb = jax.random.split(key)
        w = jax.random.normal(kw, (fan_in, fan_out), jnp.float32) * 0.02
        b = jax.random.normal(kb, (fan_out,), jnp.float32) * 0.02
        return w, b

    keys = jax.random.split(key, 16 + NUM_LAYERS)
    p = {}
    p["w_patch"], p["b_patch"] = lin(keys[0], CPP, HIDDEN)
    p["cls"] = jax.random.normal(keys[1], (1, 1, HIDDEN), jnp.float32) * 0.02
    p["pos"] = jax.random.normal(keys[2], (1, SEQ, HIDDEN), jnp.float32) * 0.02

    layers = []
    for li in range(NUM_LAYERS):
        lk = jax.random.split(keys[3 + li], 8)
        lp = {}
        lp["ln1_g"] = jnp.ones((HIDDEN,), jnp.float32)
        lp["ln1_b"] = jnp.zeros((HIDDEN,), jnp.float32)
        lp["wq"], lp["bq"] = lin(lk[0], HIDDEN, HIDDEN)
        lp["wk"], lp["bk"] = lin(lk[1], HIDDEN, HIDDEN)
        lp["wv"], lp["bv"] = lin(lk[2], HIDDEN, HIDDEN)
        lp["wo"], lp["bo"] = lin(lk[3], HIDDEN, HIDDEN)
        lp["ln2_g"] = jnp.ones((HIDDEN,), jnp.float32)
        lp["ln2_b"] = jnp.zeros((HIDDEN,), jnp.float32)
        lp["w1"], lp["b1"] = lin(lk[4], HIDDEN, MLP)
        lp["w2"], lp["b2"] = lin(lk[5], MLP, HIDDEN)
        layers.append(lp)
    p["layers"] = layers

    k = 3 + NUM_LAYERS
    p["sae_we"], p["sae_be"] = lin(keys[k + 0], HIDDEN, LATENT)
    p["sae_wd"], p["sae_bd"] = lin(keys[k + 1], LATENT, HIDDEN)  # decode unused (recon discarded)
    p["ln_f_g"] = jnp.ones((HIDDEN,), jnp.float32)
    p["ln_f_b"] = jnp.zeros((HIDDEN,), jnp.float32)
    p["w_pool"], p["b_pool"] = lin(keys[k + 2], HIDDEN, HIDDEN)
    p["w_cls"], p["b_cls"] = lin(keys[k + 3], HIDDEN, NUM_CLASSES)
    return p


def prepare_fused_params(p):
    """One-time prep: bf16 weights, hoisted bias reshapes, per-layer stacking,
    attention scale folded into Wq/bq, CLS+pos folded into one embedding bias."""
    f = {
        "w_patch": p["w_patch"].astype(jnp.bfloat16),
        "sae_we": p["sae_we"].astype(jnp.bfloat16),
        "sae_be": p["sae_be"].reshape(1, -1),
        "ln_f_g": p["ln_f_g"].reshape(1, -1),
        "ln_f_b": p["ln_f_b"].reshape(1, -1),
        "w_pool": p["w_pool"].astype(jnp.bfloat16),
        "b_pool": p["b_pool"].reshape(1, -1),
        "w_cls": p["w_cls"].astype(jnp.bfloat16),
        "b_cls": p["b_cls"].reshape(1, -1),
    }
    pos = p["pos"][0]                                                    # (SEQ, D)
    f["emb_bias"] = jnp.concatenate(
        [p["cls"].reshape(1, HIDDEN) + pos[0:1],                         # CLS token + pos[0]
         p["b_patch"].reshape(1, HIDDEN) + pos[1:]], axis=0)             # patch bias + pos[1:]

    def stack(fn):
        return jnp.stack([fn(lp) for lp in p["layers"]], axis=0)

    f["ln1_g"] = stack(lambda lp: lp["ln1_g"].reshape(1, -1))
    f["ln1_b"] = stack(lambda lp: lp["ln1_b"].reshape(1, -1))
    f["w_qkv"] = stack(lambda lp: jnp.concatenate(
        [lp["wq"] * ATTN_SCALE, lp["wk"], lp["wv"]], axis=1)).astype(jnp.bfloat16)   # (L, D, 3D)
    f["b_qkv"] = stack(lambda lp: jnp.concatenate(
        [lp["bq"] * ATTN_SCALE, lp["bk"], lp["bv"]]).reshape(1, -1))                 # (L, 1, 3D)
    f["w_o"] = stack(lambda lp: lp["wo"]).astype(jnp.bfloat16)                       # (L, D, D)
    f["b_o"] = stack(lambda lp: lp["bo"].reshape(1, -1))
    f["ln2_g"] = stack(lambda lp: lp["ln2_g"].reshape(1, -1))
    f["ln2_b"] = stack(lambda lp: lp["ln2_b"].reshape(1, -1))
    f["w1"] = stack(lambda lp: lp["w1"]).astype(jnp.bfloat16)                        # (L, D, MLP)
    f["b1"] = stack(lambda lp: lp["b1"].reshape(1, -1))
    f["w2"] = stack(lambda lp: lp["w2"]).astype(jnp.bfloat16)                        # (L, MLP, D)
    f["b2"] = stack(lambda lp: lp["b2"].reshape(1, -1))
    return f


# ----------------------------------------------------------------------------- forward

def extract_patches(images):
    """NCHW -> [B, num_patches, C*patch*patch] (matches torch Conv2d k=16, s=16 flattening)."""
    B, C, H, W = images.shape
    ph, pw = H // PATCH, W // PATCH
    x = images.reshape(B, C, ph, PATCH, pw, PATCH)
    x = x.transpose(0, 2, 4, 1, 3, 5)
    return x.reshape(B, ph * pw, C * PATCH * PATCH)


def csae_forward(images, fp, prev_weight=None, task_id=0):
    B = images.shape[0]
    patches = extract_patches(images)                                    # [B, P, CPP] fp32
    # prepend a zero row for the CLS slot; its content comes from emb_bias inside the kernel
    patches = jnp.pad(patches, ((0, 0), (1, 0), (0, 0))).astype(jnp.bfloat16)  # [B, SEQ, CPP]

    latents, logits = csae_fused(patches, fp)                            # single pallas_call
    latent_list = [latents[:, i] for i in range(NUM_PARALLEL)]
    # TODO(synk): SaeWrapper's source is not provided; how recon / prev_weight / task_id
    # modify x and the weight is unspecified, so x passes through unchanged and the
    # weight is threaded untouched.
    return logits.reshape(B, NUM_CLASSES), latent_list, prev_weight


# ----------------------------------------------------------------------------- main

if __name__ == "__main__":
    key = jax.random.PRNGKey(0)
    k_param, k_img = jax.random.split(key)
    params = init_params(k_param)
    fused_params = prepare_fused_params(params)
    images = jax.random.normal(k_img, (2, CHANNELS, IMG, IMG), jnp.float32)  # NCHW

    logits, latent_list, current_weight = csae_forward(images, fused_params)
    jax.block_until_ready(logits)
    for z in latent_list:
        jax.block_until_ready(z)

    assert logits.shape == (2, NUM_CLASSES)
    assert len(latent_list) == NUM_PARALLEL
    assert latent_list[0].shape == (2, SEQ, LATENT)
    assert current_weight is None
    print("KERNEL_OK")
</pallas_src>

<mosaic_0001>
module attributes {stable_mosaic.version = 11 : i64} {
  func.func @_fused_csae_kernel(%arg0: i32, %arg1: memref<1x5x768xbf16, #tpu.memory_space<vmem>>, %arg2: memref<5x64xf32, #tpu.memory_space<vmem>>, %arg3: memref<768x64xbf16, #tpu.memory_space<vmem>>, %arg4: memref<4x1x64xf32, #tpu.memory_space<vmem>>, %arg5: memref<4x1x64xf32, #tpu.memory_space<vmem>>, %arg6: memref<4x64x192xbf16, #tpu.memory_space<vmem>>, %arg7: memref<4x1x192xf32, #tpu.memory_space<vmem>>, %arg8: memref<4x64x64xbf16, #tpu.memory_space<vmem>>, %arg9: memref<4x1x64xf32, #tpu.memory_space<vmem>>, %arg10: memref<4x1x64xf32, #tpu.memory_space<vmem>>, %arg11: memref<4x1x64xf32, #tpu.memory_space<vmem>>, %arg12: memref<4x64x256xbf16, #tpu.memory_space<vmem>>, %arg13: memref<4x1x256xf32, #tpu.memory_space<vmem>>, %arg14: memref<4x256x64xbf16, #tpu.memory_space<vmem>>, %arg15: memref<4x1x64xf32, #tpu.memory_space<vmem>>, %arg16: memref<64x32xbf16, #tpu.memory_space<vmem>>, %arg17: memref<1x32xf32, #tpu.memory_space<vmem>>, %arg18: memref<1x64xf32, #tpu.memory_space<vmem>>, %arg19: memref<1x64xf32, #tpu.memory_space<vmem>>, %arg20: memref<64x64xbf16, #tpu.memory_space<vmem>>, %arg21: memref<1x64xf32, #tpu.memory_space<vmem>>, %arg22: memref<64x10xbf16, #tpu.memory_space<vmem>>, %arg23: memref<1x10xf32, #tpu.memory_space<vmem>>, %arg24: memref<1x2x5x32xf32, #tpu.memory_space<vmem>>, %arg25: memref<1x1x10xf32, #tpu.memory_space<vmem>>) attributes {dimension_semantics = [#tpu.dimension_semantics<parallel>], iteration_bounds = array<i64: 2>, scalar_prefetch = 0 : i64, scratch_operands = 0 : i64, tpu.core_type = #tpu.core_type<tc>, window_params = [{transform_indices = @transform_0, window_bounds = array<i64: 1, 5, 768>}, {pipeline_mode = #tpu.pipeline_mode<synchronous>, transform_indices = @transform_1, window_bounds = array<i64: 5, 64>}, {pipeline_mode = #tpu.pipeline_mode<synchronous>, transform_indices = @transform_2, window_bounds = array<i64: 768, 64>}, {pipeline_mode = #tpu.pipeline_mode<synchronous>, transform_indices = @transform_3, window_bounds = array<i64: 4, 1, 64>}, {pipeline_mode = #tpu.pipeline_mode<synchronous>, transform_indices = @transform_4, window_bounds = array<i64: 4, 1, 64>}, {pipeline_mode = #tpu.pipeline_mode<synchronous>, transform_indices = @transform_5, window_bounds = array<i64: 4, 64, 192>}, {pipeline_mode = #tpu.pipeline_mode<synchronous>, transform_indices = @transform_6, window_bounds = array<i64: 4, 1, 192>}, {pipeline_mode = #tpu.pipeline_mode<synchronous>, transform_indices = @transform_7, window_bounds = array<i64: 4, 64, 64>}, {pipeline_mode = #tpu.pipeline_mode<synchronous>, transform_indices = @transform_8, window_bounds = array<i64: 4, 1, 64>}, {pipeline_mode = #tpu.pipeline_mode<synchronous>, transform_indices = @transform_9, window_bounds = array<i64: 4, 1, 64>}, {pipeline_mode = #tpu.pipeline_mode<synchronous>, transform_indices = @transform_10, window_bounds = array<i64: 4, 1, 64>}, {pipeline_mode = #tpu.pipeline_mode<synchronous>, transform_indices = @transform_11, window_bounds = array<i64: 4, 64, 256>}, {pipeline_mode = #tpu.pipeline_mode<synchronous>, transform_indices = @transform_12, window_bounds = array<i64: 4, 1, 256>}, {pipeline_mode = #tpu.pipeline_mode<synchronous>, transform_indices = @transform_13, window_bounds = array<i64: 4, 256, 64>}, {pipeline_mode = #tpu.pipeline_mode<synchronous>, transform_indices = @transform_14, window_bounds = array<i64: 4, 1, 64>}, {pipeline_mode = #tpu.pipeline_mode<synchronous>, transform_indices = @transform_15, window_bounds = array<i64: 64, 32>}, {pipeline_mode = #tpu.pipeline_mode<synchronous>, transform_indices = @transform_16, window_bounds = array<i64: 1, 32>}, {pipeline_mode = #tpu.pipeline_mode<synchronous>, transform_indices = @transform_17, window_bounds = array<i64: 1, 64>}, {pipeline_mode = #tpu.pipeline_mode<synchronous>, transform_indices = @transform_18, window_bounds = array<i64: 1, 64>}, {pipeline_mode = #tpu.pipeline_mode<synchronous>, transform_indices = @transform_19, window_bounds = array<i64: 64, 64>}, {pipeline_mode = #tpu.pipeline_mode<synchronous>, transform_indices = @transform_20, window_bounds = array<i64: 1, 64>}, {pipeline_mode = #tpu.pipeline_mode<synchronous>, transform_indices = @transform_21, window_bounds = array<i64: 64, 10>}, {pipeline_mode = #tpu.pipeline_mode<synchronous>, transform_indices = @transform_22, window_bounds = array<i64: 1, 10>}, {transform_indices = @transform_23, window_bounds = array<i64: 1, 2, 5, 32>}, {transform_indices = @transform_24, window_bounds = array<i64: 1, 1, 10>}]} {
    %c0 = arith.constant 0 : index
    %c0_0 = arith.constant 0 : index
    %c0_1 = arith.constant 0 : index
    %0 = vector.load %arg1[%c0, %c0_0, %c0_1] : memref<1x5x768xbf16, #tpu.memory_space<vmem>>, vector<1x5x768xbf16>
    %1 = vector.shape_cast %0 : vector<1x5x768xbf16> to vector<5x768xbf16>
    %c0_2 = arith.constant 0 : index
    %c0_3 = arith.constant 0 : index
    %2 = vector.load %arg3[%c0_2, %c0_3] : memref<768x64xbf16, #tpu.memory_space<vmem>>, vector<768x64xbf16>
    %cst = arith.constant dense<0.000000e+00> : vector<5x64xf32>
    %3 = tpu.matmul %1, %2, %cst {dimension_numbers = #tpu.dot_dimension_numbers<[1], [0], [0], [1], [0, 0, 1, 1], [], []>} : vector<5x768xbf16>, vector<768x64xbf16>, vector<5x64xf32> -> vector<5x64xf32>
    %c0_4 = arith.constant 0 : index
    %c0_5 = arith.constant 0 : index
    %4 = vector.load %arg2[%c0_4, %c0_5] : memref<5x64xf32, #tpu.memory_space<vmem>>, vector<5x64xf32>
    %5 = arith.addf %3, %4 : vector<5x64xf32>
    %c0_6 = arith.constant 0 : index
    %c0_7 = arith.constant 0 : index
    %c0_8 = arith.constant 0 : index
    %6 = vector.load %arg4[%c0_6, %c0_7, %c0_8] : memref<4x1x64xf32, #tpu.memory_space<vmem>>, vector<1x1x64xf32>
    %7 = vector.shape_cast %6 : vector<1x1x64xf32> to vector<1x64xf32>
    %c0_9 = arith.constant 0 : index
    %c0_10 = arith.constant 0 : index
    %c0_11 = arith.constant 0 : index
    %8 = vector.load %arg5[%c0_9, %c0_10, %c0_11] : memref<4x1x64xf32, #tpu.memory_space<vmem>>, vector<1x1x64xf32>
    %9 = vector.shape_cast %8 : vector<1x1x64xf32> to vector<1x64xf32>
    %cst_12 = arith.constant dense<0.000000e+00> : vector<5xf32>
    %10 = vector.multi_reduction <add>, %5, %cst_12 [1] : vector<5x64xf32> to vector<5xf32>
    %11 = vector.shape_cast %10 : vector<5xf32> to vector<5x1xf32>
    %cst_13 = arith.constant 6.400000e+01 : f32
    %12 = vector.broadcast %cst_13 : f32 to vector<5x1xf32>
    %13 = arith.divf %11, %12 : vector<5x1xf32>
    %14 = vector.broadcast %13 : vector<5x1xf32> to vector<5x64xf32>
    %15 = arith.subf %5, %14 : vector<5x64xf32>
    %16 = arith.mulf %15, %15 : vector<5x64xf32>
    %cst_14 = arith.constant dense<0.000000e+00> : vector<5xf32>
    %17 = vector.multi_reduction <add>, %16, %cst_14 [1] : vector<5x64xf32> to vector<5xf32>
    %18 = vector.shape_cast %17 : vector<5xf32> to vector<5x1xf32>
    %cst_15 = arith.constant 6.400000e+01 : f32
    %19 = vector.broadcast %cst_15 : f32 to vector<5x1xf32>
    %20 = arith.divf %18, %19 : vector<5x1xf32>
    %21 = vector.broadcast %13 : vector<5x1xf32> to vector<5x64xf32>
    %22 = arith.subf %5, %21 : vector<5x64xf32>
    %cst_16 = arith.constant 9.99999996E-13 : f32
    %23 = vector.broadcast %cst_16 : f32 to vector<5x1xf32>
    %24 = arith.addf %20, %23 : vector<5x1xf32>
    %25 = math.rsqrt %24 : vector<5x1xf32>
    %26 = vector.broadcast %25 : vector<5x1xf32> to vector<5x64xf32>
    %27 = arith.mulf %22, %26 : vector<5x64xf32>
    %28 = vector.broadcast %7 : vector<1x64xf32> to vector<5x64xf32>
    %29 = arith.mulf %27, %28 : vector<5x64xf32>
    %30 = vector.broadcast %9 : vector<1x64xf32> to vector<5x64xf32>
    %31 = arith.addf %29, %30 : vector<5x64xf32>
    %32 = arith.truncf %31 : vector<5x64xf32> to vector<5x64xbf16>
    %c0_17 = arith.constant 0 : index
    %c0_18 = arith.constant 0 : index
    %c0_19 = arith.constant 0 : index
    %33 = vector.load %arg6[%c0_17, %c0_18, %c0_19] : memref<4x64x192xbf16, #tpu.memory_space<vmem>>, vector<1x64x192xbf16>
    %34 = vector.shape_cast %33 : vector<1x64x192xbf16> to vector<64x192xbf16>
    %cst_20 = arith.constant dense<0.000000e+00> : vector<5x192xf32>
    %35 = tpu.matmul %32, %34, %cst_20 {dimension_numbers = #tpu.dot_dimension_numbers<[1], [0], [0], [1], [0, 0, 1, 1], [], []>} : vector<5x64xbf16>, vector<64x192xbf16>, vector<5x192xf32> -> vector<5x192xf32>
    %c0_21 = arith.constant 0 : index
    %c0_22 = arith.constant 0 : index
    %c0_23 = arith.constant 0 : index
    %36 = vector.load %arg7[%c0_21, %c0_22, %c0_23] : memref<4x1x192xf32, #tpu.memory_space<vmem>>, vector<1x1x192xf32>
    %37 = vector.shape_cast %36 : vector<1x1x192xf32> to vector<1x192xf32>
    %38 = vector.broadcast %37 : vector<1x192xf32> to vector<5x192xf32>
    %39 = arith.addf %35, %38 : vector<5x192xf32>
    %40 = vector.extract_strided_slice %39 {offsets = [0, 0], sizes = [5, 16], strides = [1, 1]} : vector<5x192xf32> to vector<5x16xf32>
    %41 = arith.truncf %40 : vector<5x16xf32> to vector<5x16xbf16>
    %42 = vector.extract_strided_slice %39 {offsets = [0, 64], sizes = [5, 16], strides = [1, 1]} : vector<5x192xf32> to vector<5x16xf32>
    %43 = arith.truncf %42 : vector<5x16xf32> to vector<5x16xbf16>
    %44 = vector.extract_strided_slice %39 {offsets = [0, 128], sizes = [5, 16], strides = [1, 1]} : vector<5x192xf32> to vector<5x16xf32>
    %45 = arith.truncf %44 : vector<5x16xf32> to vector<5x16xbf16>
    %cst_24 = arith.constant dense<0.000000e+00> : vector<5x5xf32>
    %46 = tpu.matmul %41, %43, %cst_24 {dimension_numbers = #tpu.dot_dimension_numbers<[1], [1], [0], [0], [0, 0, 1, 0], [], []>} : vector<5x16xbf16>, vector<5x16xbf16>, vector<5x5xf32> -> vector<5x5xf32>
    %cst_25 = arith.constant dense<0xFF800000> : vector<5xf32>
    %47 = vector.multi_reduction <maximumf>, %46, %cst_25 [1] : vector<5x5xf32> to vector<5xf32>
    %48 = vector.shape_cast %47 : vector<5xf32> to vector<5x1xf32>
    %49 = vector.broadcast %48 : vector<5x1xf32> to vector<5x5xf32>
    %50 = arith.subf %46, %49 : vector<5x5xf32>
    %51 = math.exp %50 : vector<5x5xf32>
    %cst_26 = arith.constant dense<0.000000e+00> : vector<5xf32>
    %52 = vector.multi_reduction <add>, %51, %cst_26 [1] : vector<5x5xf32> to vector<5xf32>
    %53 = vector.shape_cast %52 : vector<5xf32> to vector<5x1xf32>
    %54 = vector.broadcast %53 : vector<5x1xf32> to vector<5x5xf32>
    %55 = arith.divf %51, %54 : vector<5x5xf32>
    %56 = arith.truncf %55 : vector<5x5xf32> to vector<5x5xbf16>
    %cst_27 = arith.constant dense<0.000000e+00> : vector<5x16xf32>
    %57 = tpu.matmul %56, %45, %cst_27 {dimension_numbers = #tpu.dot_dimension_numbers<[1], [0], [0], [1], [0, 0, 1, 1], [], []>} : vector<5x5xbf16>, vector<5x16xbf16>, vector<5x16xf32> -> vector<5x16xf32>
    %58 = vector.extract_strided_slice %39 {offsets = [0, 16], sizes = [5, 16], strides = [1, 1]} : vector<5x192xf32> to vector<5x16xf32>
    %59 = arith.truncf %58 : vector<5x16xf32> to vector<5x16xbf16>
    %60 = vector.extract_strided_slice %39 {offsets = [0, 80], sizes = [5, 16], strides = [1, 1]} : vector<5x192xf32> to vector<5x16xf32>
    %61 = arith.truncf %60 : vector<5x16xf32> to vector<5x16xbf16>
    %62 = vector.extract_strided_slice %39 {offsets = [0, 144], sizes = [5, 16], strides = [1, 1]} : vector<5x192xf32> to vector<5x16xf32>
    %63 = arith.truncf %62 : vector<5x16xf32> to vector<5x16xbf16>
    %cst_28 = arith.constant dense<0.000000e+00> : vector<5x5xf32>
    %64 = tpu.matmul %59, %61, %cst_28 {dimension_numbers = #tpu.dot_dimension_numbers<[1], [1], [0], [0], [0, 0, 1, 0], [], []>} : vector<5x16xbf16>, vector<5x16xbf16>, vector<5x5xf32> -> vector<5x5xf32>
    %cst_29 = arith.constant dense<0xFF800000> : vector<5xf32>
    %65 = vector.multi_reduction <maximumf>, %64, %cst_29 [1] : vector<5x5xf32> to vector<5xf32>
    %66 = vector.shape_cast %65 : vector<5xf32> to vector<5x1xf32>
    %67 = vector.broadcast %66 : vector<5x1xf32> to vector<5x5xf32>
    %68 = arith.subf %64, %67 : vector<5x5xf32>
    %69 = math.exp %68 : vector<5x5xf32>
    %cst_30 = arith.constant dense<0.000000e+00> : vector<5xf32>
    %70 = vector.multi_reduction <add>, %69, %cst_30 [1] : vector<5x5xf32> to vector<5xf32>
    %71 = vector.shape_cast %70 : vector<5xf32> to vector<5x1xf32>
    %72 = vector.broadcast %71 : vector<5x1xf32> to vector<5x5xf32>
    %73 = arith.divf %69, %72 : vector<5x5xf32>
    %74 = arith.truncf %73 : vector<5x5xf32> to vector<5x5xbf16>
    %cst_31 = arith.constant dense<0.000000e+00> : vector<5x16xf32>
    %75 = tpu.matmul %74, %63, %cst_31 {dimension_numbers = #tpu.dot_dimension_numbers<[1], [0], [0], [1], [0, 0, 1, 1], [], []>} : vector<5x5xbf16>, vector<5x16xbf16>, vector<5x16xf32> -> vector<5x16xf32>
    %76 = vector.extract_strided_slice %39 {offsets = [0, 32], sizes = [5, 16], strides = [1, 1]} : vector<5x192xf32> to vector<5x16xf32>
    %77 = arith.truncf %76 : vector<5x16xf32> to vector<5x16xbf16>
    %78 = vector.extract_strided_slice %39 {offsets = [0, 96], sizes = [5, 16], strides = [1, 1]} : vector<5x192xf32> to vector<5x16xf32>
    %79 = arith.truncf %78 : vector<5x16xf32> to vector<5x16xbf16>
    %80 = vector.extract_strided_slice %39 {offsets = [0, 160], sizes = [5, 16], strides = [1, 1]} : vector<5x192xf32> to vector<5x16xf32>
    %81 = arith.truncf %80 : vector<5x16xf32> to vector<5x16xbf16>
    %cst_32 = arith.constant dense<0.000000e+00> : vector<5x5xf32>
    %82 = tpu.matmul %77, %79, %cst_32 {dimension_numbers = #tpu.dot_dimension_numbers<[1], [1], [0], [0], [0, 0, 1, 0], [], []>} : vector<5x16xbf16>, vector<5x16xbf16>, vector<5x5xf32> -> vector<5x5xf32>
    %cst_33 = arith.constant dense<0xFF800000> : vector<5xf32>
    %83 = vector.multi_reduction <maximumf>, %82, %cst_33 [1] : vector<5x5xf32> to vector<5xf32>
    %84 = vector.shape_cast %83 : vector<5xf32> to vector<5x1xf32>
    %85 = vector.broadcast %84 : vector<5x1xf32> to vector<5x5xf32>
    %86 = arith.subf %82, %85 : vector<5x5xf32>
    %87 = math.exp %86 : vector<5x5xf32>
    %cst_34 = arith.constant dense<0.000000e+00> : vector<5xf32>
    %88 = vector.multi_reduction <add>, %87, %cst_34 [1] : vector<5x5xf32> to vector<5xf32>
    %89 = vector.shape_cast %88 : vector<5xf32> to vector<5x1xf32>
    %90 = vector.broadcast %89 : vector<5x1xf32> to vector<5x5xf32>
    %91 = arith.divf %87, %90 : vector<5x5xf32>
    %92 = arith.truncf %91 : vector<5x5xf32> to vector<5x5xbf16>
    %cst_35 = arith.constant dense<0.000000e+00> : vector<5x16xf32>
    %93 = tpu.matmul %92, %81, %cst_35 {dimension_numbers = #tpu.dot_dimension_numbers<[1], [0], [0], [1], [0, 0, 1, 1], [], []>} : vector<5x5xbf16>, vector<5x16xbf16>, vector<5x16xf32> -> vector<5x16xf32>
    %94 = vector.extract_strided_slice %39 {offsets = [0, 48], sizes = [5, 16], strides = [1, 1]} : vector<5x192xf32> to vector<5x16xf32>
    %95 = arith.truncf %94 : vector<5x16xf32> to vector<5x16xbf16>
    %96 = vector.extract_strided_slice %39 {offsets = [0, 112], sizes = [5, 16], strides = [1, 1]} : vector<5x192xf32> to vector<5x16xf32>
    %97 = arith.truncf %96 : vector<5x16xf32> to vector<5x16xbf16>
    %98 = vector.extract_strided_slice %39 {offsets = [0, 176], sizes = [5, 16], strides = [1, 1]} : vector<5x192xf32> to vector<5x16xf32>
    %99 = arith.truncf %98 : vector<5x16xf32> to vector<5x16xbf16>
    %cst_36 = arith.constant dense<0.000000e+00> : vector<5x5xf32>
    %100 = tpu.matmul %95, %97, %cst_36 {dimension_numbers = #tpu.dot_dimension_numbers<[1], [1], [0], [0], [0, 0, 1, 0], [], []>} : vector<5x16xbf16>, vector<5x16xbf16>, vector<5x5xf32> -> vector<5x5xf32>
    %cst_37 = arith.constant dense<0xFF800000> : vector<5xf32>
    %101 = vector.multi_reduction <maximumf>, %100, %cst_37 [1] : vector<5x5xf32> to vector<5xf32>
    %102 = vector.shape_cast %101 : vector<5xf32> to vector<5x1xf32>
    %103 = vector.broadcast %102 : vector<5x1xf32> to vector<5x5xf32>
    %104 = arith.subf %100, %103 : vector<5x5xf32>
    %105 = math.exp %104 : vector<5x5xf32>
    %cst_38 = arith.constant dense<0.000000e+00> : vector<5xf32>
    %106 = vector.multi_reduction <add>, %105, %cst_38 [1] : vector<5x5xf32> to vector<5xf32>
    %107 = vector.shape_cast %106 : vector<5xf32> to vector<5x1xf32>
    %108 = vector.broadcast %107 : vector<5x1xf32> to vector<5x5xf32>
    %109 = arith.divf %105, %108 : vector<5x5xf32>
    %110 = arith.truncf %109 : vector<5x5xf32> to vector<5x5xbf16>
    %cst_39 = arith.constant dense<0.000000e+00> : vector<5x16xf32>
    %111 = tpu.matmul %110, %99, %cst_39 {dimension_numbers = #tpu.dot_dimension_numbers<[1], [0], [0], [1], [0, 0, 1, 1], [], []>} : vector<5x5xbf16>, vector<5x16xbf16>, vector<5x16xf32> -> vector<5x16xf32>
    %112 = tpu.concatenate %57, %75, %93, %111 in 1 : vector<5x16xf32>, vector<5x16xf32>, vector<5x16xf32>, vector<5x16xf32> -> vector<5x64xf32>
    %113 = arith.truncf %112 : vector<5x64xf32> to vector<5x64xbf16>
    %c0_40 = arith.constant 0 : index
    %c0_41 = arith.constant 0 : index
    %c0_42 = arith.constant 0 : index
    %114 = vector.load %arg8[%c0_40, %c0_41, %c0_42] : memref<4x64x64xbf16, #tpu.memory_space<vmem>>, vector<1x64x64xbf16>
    %115 = vector.shape_cast %114 : vector<1x64x64xbf16> to vector<64x64xbf16>
    %cst_43 = arith.constant dense<0.000000e+00> : vector<5x64xf32>
    %116 = tpu.matmul %113, %115, %cst_43 {dimension_numbers = #tpu.dot_dimension_numbers<[1], [0], [0], [1], [0, 0, 1, 1], [], []>} : vector<5x64xbf16>, vector<64x64xbf16>, vector<5x64xf32> -> vector<5x64xf32>
    %117 = arith.addf %5, %116 : vector<5x64xf32>
    %c0_44 = arith.constant 0 : index
    %c0_45 = arith.constant 0 : index
    %c0_46 = arith.constant 0 : index
    %118 = vector.load %arg9[%c0_44, %c0_45, %c0_46] : memref<4x1x64xf32, #tpu.memory_space<vmem>>, vector<1x1x64xf32>
    %119 = vector.shape_cast %118 : vector<1x1x64xf32> to vector<1x64xf32>
    %120 = vector.broadcast %119 : vector<1x64xf32> to vector<5x64xf32>
    %121 = arith.addf %117, %120 : vector<5x64xf32>
    %c0_47 = arith.constant 0 : index
    %c0_48 = arith.constant 0 : index
    %c0_49 = arith.constant 0 : index
    %122 = vector.load %arg10[%c0_47, %c0_48, %c0_49] : memref<4x1x64xf32, #tpu.memory_space<vmem>>, vector<1x1x64xf32>
    %123 = vector.shape_cast %122 : vector<1x1x64xf32> to vector<1x64xf32>
    %c0_50 = arith.constant 0 : index
    %c0_51 = arith.constant 0 : index
    %c0_52 = arith.constant 0 : index
    %124 = vector.load %arg11[%c0_50, %c0_51, %c0_52] : memref<4x1x64xf32, #tpu.memory_space<vmem>>, vector<1x1x64xf32>
    %125 = vector.shape_cast %124 : vector<1x1x64xf32> to vector<1x64xf32>
    %cst_53 = arith.constant dense<0.000000e+00> : vector<5xf32>
    %126 = vector.multi_reduction <add>, %121, %cst_53 [1] : vector<5x64xf32> to vector<5xf32>
    %127 = vector.shape_cast %126 : vector<5xf32> to vector<5x1xf32>
    %cst_54 = arith.constant 6.400000e+01 : f32
    %128 = vector.broadcast %cst_54 : f32 to vector<5x1xf32>
    %129 = arith.divf %127, %128 : vector<5x1xf32>
    %130 = vector.broadcast %129 : vector<5x1xf32> to vector<5x64xf32>
    %131 = arith.subf %121, %130 : vector<5x64xf32>
    %132 = arith.mulf %131, %131 : vector<5x64xf32>
    %cst_55 = arith.constant dense<0.000000e+00> : vector<5xf32>
    %133 = vector.multi_reduction <add>, %132, %cst_55 [1] : vector<5x64xf32> to vector<5xf32>
    %134 = vector.shape_cast %133 : vector<5xf32> to vector<5x1xf32>
    %cst_56 = arith.constant 6.400000e+01 : f32
    %135 = vector.broadcast %cst_56 : f32 to vector<5x1xf32>
    %136 = arith.divf %134, %135 : vector<5x1xf32>
    %137 = vector.broadcast %129 : vector<5x1xf32> to vector<5x64xf32>
    %138 = arith.subf %121, %137 : vector<5x64xf32>
    %cst_57 = arith.constant 9.99999996E-13 : f32
    %139 = vector.broadcast %cst_57 : f32 to vector<5x1xf32>
    %140 = arith.addf %136, %139 : vector<5x1xf32>
    %141 = math.rsqrt %140 : vector<5x1xf32>
    %142 = vector.broadcast %141 : vector<5x1xf32> to vector<5x64xf32>
    %143 = arith.mulf %138, %142 : vector<5x64xf32>
    %144 = vector.broadcast %123 : vector<1x64xf32> to vector<5x64xf32>
    %145 = arith.mulf %143, %144 : vector<5x64xf32>
    %146 = vector.broadcast %125 : vector<1x64xf32> to vector<5x64xf32>
    %147 = arith.addf %145, %146 : vector<5x64xf32>
    %148 = arith.truncf %147 : vector<5x64xf32> to vector<5x64xbf16>
    %c0_58 = arith.constant 0 : index
    %c0_59 = arith.constant 0 : index
    %c0_60 = arith.constant 0 : index
    %149 = vector.load %arg12[%c0_58, %c0_59, %c0_60] : memref<4x64x256xbf16, #tpu.memory_space<vmem>>, vector<1x64x256xbf16>
    %150 = vector.shape_cast %149 : vector<1x64x256xbf16> to vector<64x256xbf16>
    %cst_61 = arith.constant dense<0.000000e+00> : vector<5x256xf32>
    %151 = tpu.matmul %148, %150, %cst_61 {dimension_numbers = #tpu.dot_dimension_numbers<[1], [0], [0], [1], [0, 0, 1, 1], [], []>} : vector<5x64xbf16>, vector<64x256xbf16>, vector<5x256xf32> -> vector<5x256xf32>
    %c0_62 = arith.constant 0 : index
    %c0_63 = arith.constant 0 : index
    %c0_64 = arith.constant 0 : index
    %152 = vector.load %arg13[%c0_62, %c0_63, %c0_64] : memref<4x1x256xf32, #tpu.memory_space<vmem>>, vector<1x1x256xf32>
    %153 = vector.shape_cast %152 : vector<1x1x256xf32> to vector<1x256xf32>
    %154 = vector.broadcast %153 : vector<1x256xf32> to vector<5x256xf32>
    %155 = arith.addf %151, %154 : vector<5x256xf32>
    %156 = arith.mulf %155, %155 : vector<5x256xf32>
    %157 = arith.mulf %155, %156 : vector<5x256xf32>
    %cst_65 = arith.constant 4.471500e-02 : f32
    %158 = vector.broadcast %cst_65 : f32 to vector<5x256xf32>
    %159 = arith.mulf %158, %157 : vector<5x256xf32>
    %160 = arith.addf %155, %159 : vector<5x256xf32>
    %cst_66 = arith.constant 0.797884583 : f32
    %161 = vector.broadcast %cst_66 : f32 to vector<5x256xf32>
    %162 = arith.mulf %161, %160 : vector<5x256xf32>
    %163 = math.tanh %162 : vector<5x256xf32>
    %cst_67 = arith.constant 1.000000e+00 : f32
    %164 = vector.broadcast %cst_67 : f32 to vector<5x256xf32>
    %165 = arith.addf %164, %163 : vector<5x256xf32>
    %cst_68 = arith.constant 5.000000e-01 : f32
    %166 = vector.broadcast %cst_68 : f32 to vector<5x256xf32>
    %167 = arith.mulf %166, %165 : vector<5x256xf32>
    %168 = arith.mulf %155, %167 : vector<5x256xf32>
    %169 = arith.truncf %168 : vector<5x256xf32> to vector<5x256xbf16>
    %c0_69 = arith.constant 0 : index
    %c0_70 = arith.constant 0 : index
    %c0_71 = arith.constant 0 : index
    %170 = vector.load %arg14[%c0_69, %c0_70, %c0_71] : memref<4x256x64xbf16, #tpu.memory_space<vmem>>, vector<1x256x64xbf16>
    %171 = vector.shape_cast %170 : vector<1x256x64xbf16> to vector<256x64xbf16>
    %cst_72 = arith.constant dense<0.000000e+00> : vector<5x64xf32>
    %172 = tpu.matmul %169, %171, %cst_72 {dimension_numbers = #tpu.dot_dimension_numbers<[1], [0], [0], [1], [0, 0, 1, 1], [], []>} : vector<5x256xbf16>, vector<256x64xbf16>, vector<5x64xf32> -> vector<5x64xf32>
    %173 = arith.addf %121, %172 : vector<5x64xf32>
    %c0_73 = arith.constant 0 : index
    %c0_74 = arith.constant 0 : index
    %c0_75 = arith.constant 0 : index
    %174 = vector.load %arg15[%c0_73, %c0_74, %c0_75] : memref<4x1x64xf32, #tpu.memory_space<vmem>>, vector<1x1x64xf32>
    %175 = vector.shape_cast %174 : vector<1x1x64xf32> to vector<1x64xf32>
    %176 = vector.broadcast %175 : vector<1x64xf32> to vector<5x64xf32>
    %177 = arith.addf %173, %176 : vector<5x64xf32>
    %178 = arith.truncf %177 : vector<5x64xf32> to vector<5x64xbf16>
    %c0_76 = arith.constant 0 : index
    %c0_77 = arith.constant 0 : index
    %179 = vector.load %arg16[%c0_76, %c0_77] : memref<64x32xbf16, #tpu.memory_space<vmem>>, vector<64x32xbf16>
    %cst_78 = arith.constant dense<0.000000e+00> : vector<5x32xf32>
    %180 = tpu.matmul %178, %179, %cst_78 {dimension_numbers = #tpu.dot_dimension_numbers<[1], [0], [0], [1], [0, 0, 1, 1], [], []>} : vector<5x64xbf16>, vector<64x32xbf16>, vector<5x32xf32> -> vector<5x32xf32>
    %c0_79 = arith.constant 0 : index
    %c0_80 = arith.constant 0 : index
    %181 = vector.load %arg17[%c0_79, %c0_80] : memref<1x32xf32, #tpu.memory_space<vmem>>, vector<1x32xf32>
    %182 = vector.broadcast %181 : vector<1x32xf32> to vector<5x32xf32>
    %183 = arith.addf %180, %182 : vector<5x32xf32>
    %cst_81 = arith.constant 0.000000e+00 : f32
    %184 = vector.broadcast %cst_81 : f32 to vector<5x32xf32>
    %185 = arith.maximumf %183, %184 : vector<5x32xf32>
    %186 = vector.shape_cast %185 : vector<5x32xf32> to vector<5x32x1xf32>
    %187 = vector.shape_cast %185 : vector<5x32xf32> to vector<5x1x32xf32>
    %188 = vector.broadcast %186 : vector<5x32x1xf32> to vector<5x32x32xf32>
    %189 = vector.broadcast %187 : vector<5x1x32xf32> to vector<5x32x32xf32>
    %190 = arith.cmpf olt, %188, %189 : vector<5x32x32xf32>
    %191 = arith.extui %190 : vector<5x32x32xi1> to vector<5x32x32xi32>
    %192 = arith.sitofp %191 : vector<5x32x32xi32> to vector<5x32x32xf32>
    %cst_82 = arith.constant dense<0.000000e+00> : vector<5x32xf32>
    %193 = vector.multi_reduction <add>, %192, %cst_82 [2] : vector<5x32x32xf32> to vector<5x32xf32>
    %cst_83 = arith.constant 8.000000e+00 : f32
    %194 = vector.broadcast %cst_83 : f32 to vector<5x32xf32>
    %195 = arith.cmpf olt, %193, %194 : vector<5x32xf32>
    %cst_84 = arith.constant 0.000000e+00 : f32
    %196 = vector.broadcast %cst_84 : f32 to vector<5x32xf32>
    %197 = arith.select %195, %185, %196 : vector<5x32xi1>, vector<5x32xf32>
    %c0_85 = arith.constant 0 : index
    %c0_86 = arith.constant 0 : index
    %c0_87 = arith.constant 0 : index
    %c0_88 = arith.constant 0 : index
    %198 = vector.load %arg24[%c0_85, %c0_86, %c0_87, %c0_88] : memref<1x2x5x32xf32, #tpu.memory_space<vmem>>, vector<1x1x5x32xf32>
    %199 = vector.shape_cast %198 : vector<1x1x5x32xf32> to vector<5x32xf32>
    %200 = vector.shape_cast %197 : vector<5x32xf32> to vector<1x1x5x32xf32>
    tpu.vector_store %arg24[%c0_85, %c0_86, %c0_87, %c0_88], %200 {strides = array<i32>} : memref<1x2x5x32xf32, #tpu.memory_space<vmem>>, vector<1x1x5x32xf32>,
    %c1 = arith.constant 1 : index
    %c0_89 = arith.constant 0 : index
    %c0_90 = arith.constant 0 : index
    %201 = vector.load %arg4[%c1, %c0_89, %c0_90] : memref<4x1x64xf32, #tpu.memory_space<vmem>>, vector<1x1x64xf32>
    %202 = vector.shape_cast %201 : vector<1x1x64xf32> to vector<1x64xf32>
    %c1_91 = arith.constant 1 : index
    %c0_92 = arith.constant 0 : index
    %c0_93 = arith.constant 0 : index
    %203 = vector.load %arg5[%c1_91, %c0_92, %c0_93] : memref<4x1x64xf32, #tpu.memory_space<vmem>>, vector<1x1x64xf32>
    %204 = vector.shape_cast %203 : vector<1x1x64xf32> to vector<1x64xf32>
    %cst_94 = arith.constant dense<0.000000e+00> : vector<5xf32>
    %205 = vector.multi_reduction <add>, %177, %cst_94 [1] : vector<5x64xf32> to vector<5xf32>
    %206 = vector.shape_cast %205 : vector<5xf32> to vector<5x1xf32>
    %cst_95 = arith.constant 6.400000e+01 : f32
    %207 = vector.broadcast %cst_95 : f32 to vector<5x1xf32>
    %208 = arith.divf %206, %207 : vector<5x1xf32>
    %209 = vector.broadcast %208 : vector<5x1xf32> to vector<5x64xf32>
    %210 = arith.subf %177, %209 : vector<5x64xf32>
    %211 = arith.mulf %210, %210 : vector<5x64xf32>
    %cst_96 = arith.constant dense<0.000000e+00> : vector<5xf32>
    %212 = vector.multi_reduction <add>, %211, %cst_96 [1] : vector<5x64xf32> to vector<5xf32>
    %213 = vector.shape_cast %212 : vector<5xf32> to vector<5x1xf32>
    %cst_97 = arith.constant 6.400000e+01 : f32
    %214 = vector.broadcast %cst_97 : f32 to vector<5x1xf32>
    %215 = arith.divf %213, %214 : vector<5x1xf32>
    %216 = vector.broadcast %208 : vector<5x1xf32> to vector<5x64xf32>
    %217 = arith.subf %177, %216 : vector<5x64xf32>
    %cst_98 = arith.constant 9.99999996E-13 : f32
    %218 = vector.broadcast %cst_98 : f32 to vector<5x1xf32>
    %219 = arith.addf %215, %218 : vector<5x1xf32>
    %220 = math.rsqrt %219 : vector<5x1xf32>
    %221 = vector.broadcast %220 : vector<5x1xf32> to vector<5x64xf32>
    %222 = arith.mulf %217, %221 : vector<5x64xf32>
    %223 = vector.broadcast %202 : vector<1x64xf32> to vector<5x64xf32>
    %224 = arith.mulf %222, %223 : vector<5x64xf32>
    %225 = vector.broadcast %204 : vector<1x64xf32> to vector<5x64xf32>
    %226 = arith.addf %224, %225 : vector<5x64xf32>
    %227 = arith.truncf %226 : vector<5x64xf32> to vector<5x64xbf16>
    %c1_99 = arith.constant 1 : index
    %c0_100 = arith.constant 0 : index
    %c0_101 = arith.constant 0 : index
    %228 = vector.load %arg6[%c1_99, %c0_100, %c0_101] : memref<4x64x192xbf16, #tpu.memory_space<vmem>>, vector<1x64x192xbf16>
    %229 = vector.shape_cast %228 : vector<1x64x192xbf16> to vector<64x192xbf16>
    %cst_102 = arith.constant dense<0.000000e+00> : vector<5x192xf32>
    %230 = tpu.matmul %227, %229, %cst_102 {dimension_numbers = #tpu.dot_dimension_numbers<[1], [0], [0], [1], [0, 0, 1, 1], [], []>} : vector<5x64xbf16>, vector<64x192xbf16>, vector<5x192xf32> -> vector<5x192xf32>
    %c1_103 = arith.constant 1 : index
    %c0_104 = arith.constant 0 : index
    %c0_105 = arith.constant 0 : index
    %231 = vector.load %arg7[%c1_103, %c0_104, %c0_105] : memref<4x1x192xf32, #tpu.memory_space<vmem>>, vector<1x1x192xf32>
    %232 = vector.shape_cast %231 : vector<1x1x192xf32> to vector<1x192xf32>
    %233 = vector.broadcast %232 : vector<1x192xf32> to vector<5x192xf32>
    %234 = arith.addf %230, %233 : vector<5x192xf32>
    %235 = vector.extract_strided_slice %234 {offsets = [0, 0], sizes = [5, 16], strides = [1, 1]} : vector<5x192xf32> to vector<5x16xf32>
    %236 = arith.truncf %235 : vector<5x16xf32> to vector<5x16xbf16>
    %237 = vector.extract_strided_slice %234 {offsets = [0, 64], sizes = [5, 16], strides = [1, 1]} : vector<5x192xf32> to vector<5x16xf32>
    %238 = arith.truncf %237 : vector<5x16xf32> to vector<5x16xbf16>
    %239 = vector.extract_strided_slice %234 {offsets = [0, 128], sizes = [5, 16], strides = [1, 1]} : vector<5x192xf32> to vector<5x16xf32>
    %240 = arith.truncf %239 : vector<5x16xf32> to vector<5x16xbf16>
    %cst_106 = arith.constant dense<0.000000e+00> : vector<5x5xf32>
    %241 = tpu.matmul %236, %238, %cst_106 {dimension_numbers = #tpu.dot_dimension_numbers<[1], [1], [0], [0], [0, 0, 1, 0], [], []>} : vector<5x16xbf16>, vector<5x16xbf16>, vector<5x5xf32> -> vector<5x5xf32>
    %cst_107 = arith.constant dense<0xFF800000> : vector<5xf32>
    %242 = vector.multi_reduction <maximumf>, %241, %cst_107 [1] : vector<5x5xf32> to vector<5xf32>
    %243 = vector.shape_cast %242 : vector<5xf32> to vector<5x1xf32>
    %244 = vector.broadcast %243 : vector<5x1xf32> to vector<5x5xf32>
    %245 = arith.subf %241, %244 : vector<5x5xf32>
    %246 = math.exp %245 : vector<5x5xf32>
    %cst_108 = arith.constant dense<0.000000e+00> : vector<5xf32>
    %247 = vector.multi_reduction <add>, %246, %cst_108 [1] : vector<5x5xf32> to vector<5xf32>
    %248 = vector.shape_cast %247 : vector<5xf32> to vector<5x1xf32>
    %249 = vector.broadcast %248 : vector<5x1xf32> to vector<5x5xf32>
    %250 = arith.divf %246, %249 : vector<5x5xf32>
    %251 = arith.truncf %250 : vector<5x5xf32> to vector<5x5xbf16>
    %cst_109 = arith.constant dense<0.000000e+00> : vector<5x16xf32>
    %252 = tpu.matmul %251, %240, %cst_109 {dimension_numbers = #tpu.dot_dimension_numbers<[1], [0], [0], [1], [0, 0, 1, 1], [], []>} : vector<5x5xbf16>, vector<5x16xbf16>, vector<5x16xf32> -> vector<5x16xf32>
    %253 = vector.extract_strided_slice %234 {offsets = [0, 16], sizes = [5, 16], strides = [1, 1]} : vector<5x192xf32> to vector<5x16xf32>
    %254 = arith.truncf %253 : vector<5x16xf32> to vector<5x16xbf16>
    %255 = vector.extract_strided_slice %234 {offsets = [0, 80], sizes = [5, 16], strides = [1, 1]} : vector<5x192xf32> to vector<5x16xf32>
    %256 = arith.truncf %255 : vector<5x16xf32> to vector<5x16xbf16>
    %257 = vector.extract_strided_slice %234 {offsets = [0, 144], sizes = [5, 16], strides = [1, 1]} : vector<5x192xf32> to vector<5x16xf32>
    %258 = arith.truncf %257 : vector<5x16xf32> to vector<5x16xbf16>
    %cst_110 = arith.constant dense<0.000000e+00> : vector<5x5xf32>
    %259 = tpu.matmul %254, %256, %cst_110 {dimension_numbers = #tpu.dot_dimension_numbers<[1], [1], [0], [0], [0, 0, 1, 0], [], []>} : vector<5x16xbf16>, vector<5x16xbf16>, vector<5x5xf32> -> vector<5x5xf32>
    %cst_111 = arith.constant dense<0xFF800000> : vector<5xf32>
    %260 = vector.multi_reduction <maximumf>, %259, %cst_111 [1] : vector<5x5xf32> to vector<5xf32>
    %261 = vector.shape_cast %260 : vector<5xf32> to vector<5x1xf32>
    %262 = vector.broadcast %261 : vector<5x1xf32> to vector<5x5xf32>
    %263 = arith.subf %259, %262 : vector<5x5xf32>
    %264 = math.exp %263 : vector<5x5xf32>
    %cst_112 = arith.constant dense<0.000000e+00> : vector<5xf32>
    %265 = vector.multi_reduction <add>, %264, %cst_112 [1] : vector<5x5xf32> to vector<5xf32>
    %266 = vector.shape_cast %265 : vector<5xf32> to vector<5x1xf32>
    %267 = vector.broadcast %266 : vector<5x1xf32> to vector<5x5xf32>
    %268 = arith.divf %264, %267 : vector<5x5xf32>
    %269 = arith.truncf %268 : vector<5x5xf32> to vector<5x5xbf16>
    %cst_113 = arith.constant dense<0.000000e+00> : vector<5x16xf32>
    %270 = tpu.matmul %269, %258, %cst_113 {dimension_numbers = #tpu.dot_dimension_numbers<[1], [0], [0], [1], [0, 0, 1, 1], [], []>} : vector<5x5xbf16>, vector<5x16xbf16>, vector<5x16xf32> -> vector<5x16xf32>
    %271 = vector.extract_strided_slice %234 {offsets = [0, 32], sizes = [5, 16], strides = [1, 1]} : vector<5x192xf32> to vector<5x16xf32>
    %272 = arith.truncf %271 : vector<5x16xf32> to vector<5x16xbf16>
    %273 = vector.extract_strided_slice %234 {offsets = [0, 96], sizes = [5, 16], strides = [1, 1]} : vector<5x192xf32> to vector<5x16xf32>
    %274 = arith.truncf %273 : vector<5x16xf32> to vector<5x16xbf16>
    %275 = vector.extract_strided_slice %234 {offsets = [0, 160], sizes = [5, 16], strides = [1, 1]} : vector<5x192xf32> to vector<5x16xf32>
    %276 = arith.truncf %275 : vector<5x16xf32> to vector<5x16xbf16>
    %cst_114 = arith.constant dense<0.000000e+00> : vector<5x5xf32>
    %277 = tpu.matmul %272, %274, %cst_114 {dimension_numbers = #tpu.dot_dimension_numbers<[1], [1], [0], [0], [0, 0, 1, 0], [], []>} : vector<5x16xbf16>, vector<5x16xbf16>, vector<5x5xf32> -> vector<5x5xf32>
    %cst_115 = arith.constant dense<0xFF800000> : vector<5xf32>
    %278 = vector.multi_reduction <maximumf>, %277, %cst_115 [1] : vector<5x5xf32> to vector<5xf32>
    %279 = vector.shape_cast %278 : vector<5xf32> to vector<5x1xf32>
    %280 = vector.broadcast %279 : vector<5x1xf32> to vector<5x5xf32>
    %281 = arith.subf %277, %280 : vector<5x5xf32>
    %282 = math.exp %281 : vector<5x5xf32>
    %cst_116 = arith.constant dense<0.000000e+00> : vector<5xf32>
    %283 = vector.multi_reduction <add>, %282, %cst_116 [1] : vector<5x5xf32> to vector<5xf32>
    %284 = vector.shape_cast %283 : vector<5xf32> to vector<5x1xf32>
    %285 = vector.broadcast %284 : vector<5x1xf32> to vector<5x5xf32>
    %286 = arith.divf %282, %285 : vector<5x5xf32>
    %287 = arith.truncf %286 : vector<5x5xf32> to vector<5x5xbf16>
    %cst_117 = arith.constant dense<0.000000e+00> : vector<5x16xf32>
    %288 = tpu.matmul %287, %276, %cst_117 {dimension_numbers = #tpu.dot_dimension_numbers<[1], [0], [0], [1], [0, 0, 1, 1], [], []>} : vector<5x5xbf16>, vector<5x16xbf16>, vector<5x16xf32> -> vector<5x16xf32>
    %289 = vector.extract_strided_slice %234 {offsets = [0, 48], sizes = [5, 16], strides = [1, 1]} : vector<5x192xf32> to vector<5x16xf32>
    %290 = arith.truncf %289 : vector<5x16xf32> to vector<5x16xbf16>
    %291 = vector.extract_strided_slice %234 {offsets = [0, 112], sizes = [5, 16], strides = [1, 1]} : vector<5x192xf32> to vector<5x16xf32>
    %292 = arith.truncf %291 : vector<5x16xf32> to vector<5x16xbf16>
    %293 = vector.extract_strided_slice %234 {offsets = [0, 176], sizes = [5, 16], strides = [1, 1]} : vector<5x192xf32> to vector<5x16xf32>
    %294 = arith.truncf %293 : vector<5x16xf32> to vector<5x16xbf16>
    %cst_118 = arith.constant dense<0.000000e+00> : vector<5x5xf32>
    %295 = tpu.matmul %290, %292, %cst_118 {dimension_numbers = #tpu.dot_dimension_numbers<[1], [1], [0], [0], [0, 0, 1, 0], [], []>} : vector<5x16xbf16>, vector<5x16xbf16>, vector<5x5xf32> -> vector<5x5xf32>
    %cst_119 = arith.constant dense<0xFF800000> : vector<5xf32>
    %296 = vector.multi_reduction <maximumf>, %295, %cst_119 [1] : vector<5x5xf32> to vector<5xf32>
    %297 = vector.shape_cast %296 : vector<5xf32> to vector<5x1xf32>
    %298 = vector.broadcast %297 : vector<5x1xf32> to vector<5x5xf32>
    %299 = arith.subf %295, %298 : vector<5x5xf32>
    %300 = math.exp %299 : vector<5x5xf32>
    %cst_120 = arith.constant dense<0.000000e+00> : vector<5xf32>
    %301 = vector.multi_reduction <add>, %300, %cst_120 [1] : vector<5x5xf32> to vector<5xf32>
    %302 = vector.shape_cast %301 : vector<5xf32> to vector<5x1xf32>
    %303 = vector.broadcast %302 : vector<5x1xf32> to vector<5x5xf32>
    %304 = arith.divf %300, %303 : vector<5x5xf32>
    %305 = arith.truncf %304 : vector<5x5xf32> to vector<5x5xbf16>
    %cst_121 = arith.constant dense<0.000000e+00> : vector<5x16xf32>
    %306 = tpu.matmul %305, %294, %cst_121 {dimension_numbers = #tpu.dot_dimension_numbers<[1], [0], [0], [1], [0, 0, 1, 1], [], []>} : vector<5x5xbf16>, vector<5x16xbf16>, vector<5x16xf32> -> vector<5x16xf32>
    %307 = tpu.concatenate %252, %270, %288, %306 in 1 : vector<5x16xf32>, vector<5x16xf32>, vector<5x16xf32>, vector<5x16xf32> -> vector<5x64xf32>
    %308 = arith.truncf %307 : vector<5x64xf32> to vector<5x64xbf16>
    %c1_122 = arith.constant 1 : index
    %c0_123 = arith.constant 0 : index
    %c0_124 = arith.constant 0 : index
    %309 = vector.load %arg8[%c1_122, %c0_123, %c0_124] : memref<4x64x64xbf16, #tpu.memory_space<vmem>>, vector<1x64x64xbf16>
    %310 = vector.shape_cast %309 : vector<1x64x64xbf16> to vector<64x64xbf16>
    %cst_125 = arith.constant dense<0.000000e+00> : vector<5x64xf32>
    %311 = tpu.matmul %308, %310, %cst_125 {dimension_numbers = #tpu.dot_dimension_numbers<[1], [0], [0], [1], [0, 0, 1, 1], [], []>} : vector<5x64xbf16>, vector<64x64xbf16>, vector<5x64xf32> -> vector<5x64xf32>
    %312 = arith.addf %177, %311 : vector<5x64xf32>
    %c1_126 = arith.constant 1 : index
    %c0_127 = arith.constant 0 : index
    %c0_128 = arith.constant 0 : index
    %313 = vector.load %arg9[%c1_126, %c0_127, %c0_128] : memref<4x1x64xf32, #tpu.memory_space<vmem>>, vector<1x1x64xf32>
    %314 = vector.shape_cast %313 : vector<1x1x64xf32> to vector<1x64xf32>
    %315 = vector.broadcast %314 : vector<1x64xf32> to vector<5x64xf32>
    %316 = arith.addf %312, %315 : vector<5x64xf32>
    %c1_129 = arith.constant 1 : index
    %c0_130 = arith.constant 0 : index
    %c0_131 = arith.constant 0 : index
    %317 = vector.load %arg10[%c1_129, %c0_130, %c0_131] : memref<4x1x64xf32, #tpu.memory_space<vmem>>, vector<1x1x64xf32>
    %318 = vector.shape_cast %317 : vector<1x1x64xf32> to vector<1x64xf32>
    %c1_132 = arith.constant 1 : index
    %c0_133 = arith.constant 0 : index
    %c0_134 = arith.constant 0 : index
    %319 = vector.load %arg11[%c1_132, %c0_133, %c0_134] : memref<4x1x64xf32, #tpu.memory_space<vmem>>, vector<1x1x64xf32>
    %320 = vector.shape_cast %319 : vector<1x1x64xf32> to vector<1x64xf32>
    %cst_135 = arith.constant dense<0.000000e+00> : vector<5xf32>
    %321 = vector.multi_reduction <add>, %316, %cst_135 [1] : vector<5x64xf32> to vector<5xf32>
    %322 = vector.shape_cast %321 : vector<5xf32> to vector<5x1xf32>
    %cst_136 = arith.constant 6.400000e+01 : f32
    %323 = vector.broadcast %cst_136 : f32 to vector<5x1xf32>
    %324 = arith.divf %322, %323 : vector<5x1xf32>
    %325 = vector.broadcast %324 : vector<5x1xf32> to vector<5x64xf32>
    %326 = arith.subf %316, %325 : vector<5x64xf32>
    %327 = arith.mulf %326, %326 : vector<5x64xf32>
    %cst_137 = arith.constant dense<0.000000e+00> : vector<5xf32>
    %328 = vector.multi_reduction <add>, %327, %cst_137 [1] : vector<5x64xf32> to vector<5xf32>
    %329 = vector.shape_cast %328 : vector<5xf32> to vector<5x1xf32>
    %cst_138 = arith.constant 6.400000e+01 : f32
    %330 = vector.broadcast %cst_138 : f32 to vector<5x1xf32>
    %331 = arith.divf %329, %330 : vector<5x1xf32>
    %332 = vector.broadcast %324 : vector<5x1xf32> to vector<5x64xf32>
    %333 = arith.subf %316, %332 : vector<5x64xf32>
    %cst_139 = arith.constant 9.99999996E-13 : f32
    %334 = vector.broadcast %cst_139 : f32 to vector<5x1xf32>
    %335 = arith.addf %331, %334 : vector<5x1xf32>
    %336 = math.rsqrt %335 : vector<5x1xf32>
    %337 = vector.broadcast %336 : vector<5x1xf32> to vector<5x64xf32>
    %338 = arith.mulf %333, %337 : vector<5x64xf32>
    %339 = vector.broadcast %318 : vector<1x64xf32> to vector<5x64xf32>
    %340 = arith.mulf %338, %339 : vector<5x64xf32>
    %341 = vector.broadcast %320 : vector<1x64xf32> to vector<5x64xf32>
    %342 = arith.addf %340, %341 : vector<5x64xf32>
    %343 = arith.truncf %342 : vector<5x64xf32> to vector<5x64xbf16>
    %c1_140 = arith.constant 1 : index
    %c0_141 = arith.constant 0 : index
    %c0_142 = arith.constant 0 : index
    %344 = vector.load %arg12[%c1_140, %c0_141, %c0_142] : memref<4x64x256xbf16, #tpu.memory_space<vmem>>, vector<1x64x256xbf16>
    %345 = vector.shape_cast %344 : vector<1x64x256xbf16> to vector<64x256xbf16>
    %cst_143 = arith.constant dense<0.000000e+00> : vector<5x256xf32>
    %346 = tpu.matmul %343, %345, %cst_143 {dimension_numbers = #tpu.dot_dimension_numbers<[1], [0], [0], [1], [0, 0, 1, 1], [], []>} : vector<5x64xbf16>, vector<64x256xbf16>, vector<5x256xf32> -> vector<5x256xf32>
    %c1_144 = arith.constant 1 : index
    %c0_145 = arith.constant 0 : index
    %c0_146 = arith.constant 0 : index
    %347 = vector.load %arg13[%c1_144, %c0_145, %c0_146] : memref<4x1x256xf32, #tpu.memory_space<vmem>>, vector<1x1x256xf32>
    %348 = vector.shape_cast %347 : vector<1x1x256xf32> to vector<1x256xf32>
    %349 = vector.broadcast %348 : vector<1x256xf32> to vector<5x256xf32>
    %350 = arith.addf %346, %349 : vector<5x256xf32>
    %351 = arith.mulf %350, %350 : vector<5x256xf32>
    %352 = arith.mulf %350, %351 : vector<5x256xf32>
    %cst_147 = arith.constant 4.471500e-02 : f32
    %353 = vector.broadcast %cst_147 : f32 to vector<5x256xf32>
    %354 = arith.mulf %353, %352 : vector<5x256xf32>
    %355 = arith.addf %350, %354 : vector<5x256xf32>
    %cst_148 = arith.constant 0.797884583 : f32
    %356 = vector.broadcast %cst_148 : f32 to vector<5x256xf32>
    %357 = arith.mulf %356, %355 : vector<5x256xf32>
    %358 = math.tanh %357 : vector<5x256xf32>
    %cst_149 = arith.constant 1.000000e+00 : f32
    %359 = vector.broadcast %cst_149 : f32 to vector<5x256xf32>
    %360 = arith.addf %359, %358 : vector<5x256xf32>
    %cst_150 = arith.constant 5.000000e-01 : f32
    %361 = vector.broadcast %cst_150 : f32 to vector<5x256xf32>
    %362 = arith.mulf %361, %360 : vector<5x256xf32>
    %363 = arith.mulf %350, %362 : vector<5x256xf32>
    %364 = arith.truncf %363 : vector<5x256xf32> to vector<5x256xbf16>
    %c1_151 = arith.constant 1 : index
    %c0_152 = arith.constant 0 : index
    %c0_153 = arith.constant 0 : index
    %365 = vector.load %arg14[%c1_151, %c0_152, %c0_153] : memref<4x256x64xbf16, #tpu.memory_space<vmem>>, vector<1x256x64xbf16>
    %366 = vector.shape_cast %365 : vector<1x256x64xbf16> to vector<256x64xbf16>
    %cst_154 = arith.constant dense<0.000000e+00> : vector<5x64xf32>
    %367 = tpu.matmul %364, %366, %cst_154 {dimension_numbers = #tpu.dot_dimension_numbers<[1], [0], [0], [1], [0, 0, 1, 1], [], []>} : vector<5x256xbf16>, vector<256x64xbf16>, vector<5x64xf32> -> vector<5x64xf32>
    %368 = arith.addf %316, %367 : vector<5x64xf32>
    %c1_155 = arith.constant 1 : index
    %c0_156 = arith.constant 0 : index
    %c0_157 = arith.constant 0 : index
    %369 = vector.load %arg15[%c1_155, %c0_156, %c0_157] : memref<4x1x64xf32, #tpu.memory_space<vmem>>, vector<1x1x64xf32>
    %370 = vector.shape_cast %369 : vector<1x1x64xf32> to vector<1x64xf32>
    %371 = vector.broadcast %370 : vector<1x64xf32> to vector<5x64xf32>
    %372 = arith.addf %368, %371 : vector<5x64xf32>
    %373 = arith.truncf %372 : vector<5x64xf32> to vector<5x64xbf16>
    %c0_158 = arith.constant 0 : index
    %c0_159 = arith.constant 0 : index
    %374 = vector.load %arg16[%c0_158, %c0_159] : memref<64x32xbf16, #tpu.memory_space<vmem>>, vector<64x32xbf16>
    %cst_160 = arith.constant dense<0.000000e+00> : vector<5x32xf32>
    %375 = tpu.matmul %373, %374, %cst_160 {dimension_numbers = #tpu.dot_dimension_numbers<[1], [0], [0], [1], [0, 0, 1, 1], [], []>} : vector<5x64xbf16>, vector<64x32xbf16>, vector<5x32xf32> -> vector<5x32xf32>
    %c0_161 = arith.constant 0 : index
    %c0_162 = arith.constant 0 : index
    %376 = vector.load %arg17[%c0_161, %c0_162] : memref<1x32xf32, #tpu.memory_space<vmem>>, vector<1x32xf32>
    %377 = vector.broadcast %376 : vector<1x32xf32> to vector<5x32xf32>
    %378 = arith.addf %375, %377 : vector<5x32xf32>
    %cst_163 = arith.constant 0.000000e+00 : f32
    %379 = vector.broadcast %cst_163 : f32 to vector<5x32xf32>
    %380 = arith.maximumf %378, %379 : vector<5x32xf32>
    %381 = vector.shape_cast %380 : vector<5x32xf32> to vector<5x32x1xf32>
    %382 = vector.shape_cast %380 : vector<5x32xf32> to vector<5x1x32xf32>
    %383 = vector.broadcast %381 : vector<5x32x1xf32> to vector<5x32x32xf32>
    %384 = vector.broadcast %382 : vector<5x1x32xf32> to vector<5x32x32xf32>
    %385 = arith.cmpf olt, %383, %384 : vector<5x32x32xf32>
    %386 = arith.extui %385 : vector<5x32x32xi1> to vector<5x32x32xi32>
    %387 = arith.sitofp %386 : vector<5x32x32xi32> to vector<5x32x32xf32>
    %cst_164 = arith.constant dense<0.000000e+00> : vector<5x32xf32>
    %388 = vector.multi_reduction <add>, %387, %cst_164 [2] : vector<5x32x32xf32> to vector<5x32xf32>
    %cst_165 = arith.constant 8.000000e+00 : f32
    %389 = vector.broadcast %cst_165 : f32 to vector<5x32xf32>
    %390 = arith.cmpf olt, %388, %389 : vector<5x32xf32>
    %cst_166 = arith.constant 0.000000e+00 : f32
    %391 = vector.broadcast %cst_166 : f32 to vector<5x32xf32>
    %392 = arith.select %390, %380, %391 : vector<5x32xi1>, vector<5x32xf32>
    %c0_167 = arith.constant 0 : index
    %c1_168 = arith.constant 1 : index
    %c0_169 = arith.constant 0 : index
    %c0_170 = arith.constant 0 : index
    %393 = vector.load %arg24[%c0_167, %c1_168, %c0_169, %c0_170] : memref<1x2x5x32xf32, #tpu.memory_space<vmem>>, vector<1x1x5x32xf32>
    %394 = vector.shape_cast %393 : vector<1x1x5x32xf32> to vector<5x32xf32>
    %395 = vector.shape_cast %392 : vector<5x32xf32> to vector<1x1x5x32xf32>
    tpu.vector_store %arg24[%c0_167, %c1_168, %c0_169, %c0_170], %395 {strides = array<i32>} : memref<1x2x5x32xf32, #tpu.memory_space<vmem>>, vector<1x1x5x32xf32>,
    %c2 = arith.constant 2 : index
    %c0_171 = arith.constant 0 : index
    %c0_172 = arith.constant 0 : index
    %396 = vector.load %arg4[%c2, %c0_171, %c0_172] : memref<4x1x64xf32, #tpu.memory_space<vmem>>, vector<1x1x64xf32>
    %397 = vector.shape_cast %396 : vector<1x1x64xf32> to vector<1x64xf32>
    %c2_173 = arith.constant 2 : index
    %c0_174 = arith.constant 0 : index
    %c0_175 = arith.constant 0 : index
    %398 = vector.load %arg5[%c2_173, %c0_174, %c0_175] : memref<4x1x64xf32, #tpu.memory_space<vmem>>, vector<1x1x64xf32>
    %399 = vector.shape_cast %398 : vector<1x1x64xf32> to vector<1x64xf32>
    %cst_176 = arith.constant dense<0.000000e+00> : vector<5xf32>
    %400 = vector.multi_reduction <add>, %372, %cst_176 [1] : vector<5x64xf32> to vector<5xf32>
    %401 = vector.shape_cast %400 : vector<5xf32> to vector<5x1xf32>
    %cst_177 = arith.constant 6.400000e+01 : f32
    %402 = vector.broadcast %cst_177 : f32 to vector<5x1xf32>
    %403 = arith.divf %401, %402 : vector<5x1xf32>
    %404 = vector.broadcast %403 : vector<5x1xf32> to vector<5x64xf32>
    %405 = arith.subf %372, %404 : vector<5x64xf32>
    %406 = arith.mulf %405, %405 : vector<5x64xf32>
    %cst_178 = arith.constant dense<0.000000e+00> : vector<5xf32>
    %407 = vector.multi_reduction <add>, %406, %cst_178 [1] : vector<5x64xf32> to vector<5xf32>
    %408 = vector.shape_cast %407 : vector<5xf32> to vector<5x1xf32>
    %cst_179 = arith.constant 6.400000e+01 : f32
    %409 = vector.broadcast %cst_179 : f32 to vector<5x1xf32>
    %410 = arith.divf %408, %409 : vector<5x1xf32>
    %411 = vector.broadcast %403 : vector<5x1xf32> to vector<5x64xf32>
    %412 = arith.subf %372, %411 : vector<5x64xf32>
    %cst_180 = arith.constant 9.99999996E-13 : f32
    %413 = vector.broadcast %cst_180 : f32 to vector<5x1xf32>
    %414 = arith.addf %410, %413 : vector<5x1xf32>
    %415 = math.rsqrt %414 : vector<5x1xf32>
    %416 = vector.broadcast %415 : vector<5x1xf32> to vector<5x64xf32>
    %417 = arith.mulf %412, %416 : vector<5x64xf32>
    %418 = vector.broadcast %397 : vector<1x64xf32> to vector<5x64xf32>
    %419 = arith.mulf %417, %418 : vector<5x64xf32>
    %420 = vector.broadcast %399 : vector<1x64xf32> to vector<5x64xf32>
    %421 = arith.addf %419, %420 : vector<5x64xf32>
    %422 = arith.truncf %421 : vector<5x64xf32> to vector<5x64xbf16>
    %c2_181 = arith.constant 2 : index
    %c0_182 = arith.constant 0 : index
    %c0_183 = arith.constant 0 : index
    %423 = vector.load %arg6[%c2_181, %c0_182, %c0_183] : memref<4x64x192xbf16, #tpu.memory_space<vmem>>, vector<1x64x192xbf16>
    %424 = vector.shape_cast %423 : vector<1x64x192xbf16> to vector<64x192xbf16>
    %cst_184 = arith.constant dense<0.000000e+00> : vector<5x192xf32>
    %425 = tpu.matmul %422, %424, %cst_184 {dimension_numbers = #tpu.dot_dimension_numbers<[1], [0], [0], [1], [0, 0, 1, 1], [], []>} : vector<5x64xbf16>, vector<64x192xbf16>, vector<5x192xf32> -> vector<5x192xf32>
    %c2_185 = arith.constant 2 : index
    %c0_186 = arith.constant 0 : index
    %c0_187 = arith.constant 0 : index
    %426 = vector.load %arg7[%c2_185, %c0_186, %c0_187] : memref<4x1x192xf32, #tpu.memory_space<vmem>>, vector<1x1x192xf32>
    %427 = vector.shape_cast %426 : vector<1x1x192xf32> to vector<1x192xf32>
    %428 = vector.broadcast %427 : vector<1x192xf32> to vector<5x192xf32>
    %429 = arith.addf %425, %428 : vector<5x192xf32>
    %430 = vector.extract_strided_slice %429 {offsets = [0, 0], sizes = [5, 16], strides = [1, 1]} : vector<5x192xf32> to vector<5x16xf32>
    %431 = arith.truncf %430 : vector<5x16xf32> to vector<5x16xbf16>
    %432 = vector.extract_strided_slice %429 {offsets = [0, 64], sizes = [5, 16], strides = [1, 1]} : vector<5x192xf32> to vector<5x16xf32>
    %433 = arith.truncf %432 : vector<5x16xf32> to vector<5x16xbf16>
    %434 = vector.extract_strided_slice %429 {offsets = [0, 128], sizes = [5, 16], strides = [1, 1]} : vector<5x192xf32> to vector<5x16xf32>
    %435 = arith.truncf %434 : vector<5x16xf32> to vector<5x16xbf16>
    %cst_188 = arith.constant dense<0.000000e+00> : vector<5x5xf32>
    %436 = tpu.matmul %431, %433, %cst_188 {dimension_numbers = #tpu.dot_dimension_numbers<[1], [1], [0], [0], [0, 0, 1, 0], [], []>} : vector<5x16xbf16>, vector<5x16xbf16>, vector<5x5xf32> -> vector<5x5xf32>
    %cst_189 = arith.constant dense<0xFF800000> : vector<5xf32>
    %437 = vector.multi_reduction <maximumf>, %436, %cst_189 [1] : vector<5x5xf32> to vector<5xf32>
    %438 = vector.shape_cast %437 : vector<5xf32> to vector<5x1xf32>
    %439 = vector.broadcast %438 : vector<5x1xf32> to vector<5x5xf32>
    %440 = arith.subf %436, %439 : vector<5x5xf32>
    %441 = math.exp %440 : vector<5x5xf32>
    %cst_190 = arith.constant dense<0.000000e+00> : vector<5xf32>
    %442 = vector.multi_reduction <add>, %441, %cst_190 [1] : vector<5x5xf32> to vector<5xf32>
    %443 = vector.shape_cast %442 : vector<5xf32> to vector<5x1xf32>
    %444 = vector.broadcast %443 : vector<5x1xf32> to vector<5x5xf32>
    %445 = arith.divf %441, %444 : vector<5x5xf32>
    %446 = arith.truncf %445 : vector<5x5xf32> to vector<5x5xbf16>
    %cst_191 = arith.constant dense<0.000000e+00> : vector<5x16xf32>
    %447 = tpu.matmul %446, %435, %cst_191 {dimension_numbers = #tpu.dot_dimension_numbers<[1], [0], [0], [1], [0, 0, 1, 1], [], []>} : vector<5x5xbf16>, vector<5x16xbf16>, vector<5x16xf32> -> vector<5x16xf32>
    %448 = vector.extract_strided_slice %429 {offsets = [0, 16], sizes = [5, 16], strides = [1, 1]} : vector<5x192xf32> to vector<5x16xf32>
    %449 = arith.truncf %448 : vector<5x16xf32> to vector<5x16xbf16>
    %450 = vector.extract_strided_slice %429 {offsets = [0, 80], sizes = [5, 16], strides = [1, 1]} : vector<5x192xf32> to vector<5x16xf32>
    %451 = arith.truncf %450 : vector<5x16xf32> to vector<5x16xbf16>
    %452 = vector.extract_strided_slice %429 {offsets = [0, 144], sizes = [5, 16], strides = [1, 1]} : vector<5x192xf32> to vector<5x16xf32>
    %453 = arith.truncf %452 : vector<5x16xf32> to vector<5x16xbf16>
    %cst_192 = arith.constant dense<0.000000e+00> : vector<5x5xf32>
    %454 = tpu.matmul %449, %451, %cst_192 {dimension_numbers = #tpu.dot_dimension_numbers<[1], [1], [0], [0], [0, 0, 1, 0], [], []>} : vector<5x16xbf16>, vector<5x16xbf16>, vector<5x5xf32> -> vector<5x5xf32>
    %cst_193 = arith.constant dense<0xFF800000> : vector<5xf32>
    %455 = vector.multi_reduction <maximumf>, %454, %cst_193 [1] : vector<5x5xf32> to vector<5xf32>
    %456 = vector.shape_cast %455 : vector<5xf32> to vector<5x1xf32>
    %457 = vector.broadcast %456 : vector<5x1xf32> to vector<5x5xf32>
    %458 = arith.subf %454, %457 : vector<5x5xf32>
    %459 = math.exp %458 : vector<5x5xf32>
    %cst_194 = arith.constant dense<0.000000e+00> : vector<5xf32>
    %460 = vector.multi_reduction <add>, %459, %cst_194 [1] : vector<5x5xf32> to vector<5xf32>
    %461 = vector.shape_cast %460 : vector<5xf32> to vector<5x1xf32>
    %462 = vector.broadcast %461 : vector<5x1xf32> to vector<5x5xf32>
    %463 = arith.divf %459, %462 : vector<5x5xf32>
    %464 = arith.truncf %463 : vector<5x5xf32> to vector<5x5xbf16>
    %cst_195 = arith.constant dense<0.000000e+00> : vector<5x16xf32>
    %465 = tpu.matmul %464, %453, %cst_195 {dimension_numbers = #tpu.dot_dimension_numbers<[1], [0], [0], [1], [0, 0, 1, 1], [], []>} : vector<5x5xbf16>, vector<5x16xbf16>, vector<5x16xf32> -> vector<5x16xf32>
    %466 = vector.extract_strided_slice %429 {offsets = [0, 32], sizes = [5, 16], strides = [1, 1]} : vector<5x192xf32> to vector<5x16xf32>
    %467 = arith.truncf %466 : vector<5x16xf32> to vector<5x16xbf16>
    %468 = vector.extract_strided_slice %429 {offsets = [0, 96], sizes = [5, 16], strides = [1, 1]} : vector<5x192xf32> to vector<5x16xf32>
    %469 = arith.truncf %468 : vector<5x16xf32> to vector<5x16xbf16>
    %470 = vector.extract_strided_slice %429 {offsets = [0, 160], sizes = [5, 16], strides = [1, 1]} : vector<5x192xf32> to vector<5x16xf32>
    %471 = arith.truncf %470 : vector<5x16xf32> to vector<5x16xbf16>
    %cst_196 = arith.constant dense<0.000000e+00> : vector<5x5xf32>
    %472 = tpu.matmul %467, %469, %cst_196 {dimension_numbers = #tpu.dot_dimension_numbers<[1], [1], [0], [0], [0, 0, 1, 0], [], []>} : vector<5x16xbf16>, vector<5x16xbf16>, vector<5x5xf32> -> vector<5x5xf32>
    %cst_197 = arith.constant dense<0xFF800000> : vector<5xf32>
    %473 = vector.multi_reduction <maximumf>, %472, %cst_197 [1] : vector<5x5xf32> to vector<5xf32>
    %474 = vector.shape_cast %473 : vector<5xf32> to vector<5x1xf32>
    %475 = vector.broadcast %474 : vector<5x1xf32> to vector<5x5xf32>
    %476 = arith.subf %472, %475 : vector<5x5xf32>
    %477 = math.exp %476 : vector<5x5xf32>
    %cst_198 = arith.constant dense<0.000000e+00> : vector<5xf32>
    %478 = vector.multi_reduction <add>, %477, %cst_198 [1] : vector<5x5xf32> to vector<5xf32>
    %479 = vector.shape_cast %478 : vector<5xf32> to vector<5x1xf32>
    %480 = vector.broadcast %479 : vector<5x1xf32> to vector<5x5xf32>
    %481 = arith.divf %477, %480 : vector<5x5xf32>
    %482 = arith.truncf %481 : vector<5x5xf32> to vector<5x5xbf16>
    %cst_199 = arith.constant dense<0.000000e+00> : vector<5x16xf32>
    %483 = tpu.matmul %482, %471, %cst_199 {dimension_numbers = #tpu.dot_dimension_numbers<[1], [0], [0], [1], [0, 0, 1, 1], [], []>} : vector<5x5xbf16>, vector<5x16xbf16>, vector<5x16xf32> -> vector<5x16xf32>
    %484 = vector.extract_strided_slice %429 {offsets = [0, 48], sizes = [5, 16], strides = [1, 1]} : vector<5x192xf32> to vector<5x16xf32>
    %485 = arith.truncf %484 : vector<5x16xf32> to vector<5x16xbf16>
    %486 = vector.extract_strided_slice %429 {offsets = [0, 112], sizes = [5, 16], strides = [1, 1]} : vector<5x192xf32> to vector<5x16xf32>
    %487 = arith.truncf %486 : vector<5x16xf32> to vector<5x16xbf16>
    %488 = vector.extract_strided_slice %429 {offsets = [0, 176], sizes = [5, 16], strides = [1, 1]} : vector<5x192xf32> to vector<5x16xf32>
    %489 = arith.truncf %488 : vector<5x16xf32> to vector<5x16xbf16>
    %cst_200 = arith.constant dense<0.000000e+00> : vector<5x5xf32>
    %490 = tpu.matmul %485, %487, %cst_200 {dimension_numbers = #tpu.dot_dimension_numbers<[1], [1], [0], [0], [0, 0, 1, 0], [], []>} : vector<5x16xbf16>, vector<5x16xbf16>, vector<5x5xf32> -> vector<5x5xf32>
    %cst_201 = arith.constant dense<0xFF800000> : vector<5xf32>
    %491 = vector.multi_reduction <maximumf>, %490, %cst_201 [1] : vector<5x5xf32> to vector<5xf32>
    %492 = vector.shape_cast %491 : vector<5xf32> to vector<5x1xf32>
    %493 = vector.broadcast %492 : vector<5x1xf32> to vector<5x5xf32>
    %494 = arith.subf %490, %493 : vector<5x5xf32>
    %495 = math.exp %494 : vector<5x5xf32>
    %cst_202 = arith.constant dense<0.000000e+00> : vector<5xf32>
    %496 = vector.multi_reduction <add>, %495, %cst_202 [1] : vector<5x5xf32> to vector<5xf32>
    %497 = vector.shape_cast %496 : vector<5xf32> to vector<5x1xf32>
    %498 = vector.broadcast %497 : vector<5x1xf32> to vector<5x5xf32>
    %499 = arith.divf %495, %498 : vector<5x5xf32>
    %500 = arith.truncf %499 : vector<5x5xf32> to vector<5x5xbf16>
    %cst_203 = arith.constant dense<0.000000e+00> : vector<5x16xf32>
    %501 = tpu.matmul %500, %489, %cst_203 {dimension_numbers = #tpu.dot_dimension_numbers<[1], [0], [0], [1], [0, 0, 1, 1], [], []>} : vector<5x5xbf16>, vector<5x16xbf16>, vector<5x16xf32> -> vector<5x16xf32>
    %502 = tpu.concatenate %447, %465, %483, %501 in 1 : vector<5x16xf32>, vector<5x16xf32>, vector<5x16xf32>, vector<5x16xf32> -> vector<5x64xf32>
    %503 = arith.truncf %502 : vector<5x64xf32> to vector<5x64xbf16>
    %c2_204 = arith.constant 2 : index
    %c0_205 = arith.constant 0 : index
    %c0_206 = arith.constant 0 : index
    %504 = vector.load %arg8[%c2_204, %c0_205, %c0_206] : memref<4x64x64xbf16, #tpu.memory_space<vmem>>, vector<1x64x64xbf16>
    %505 = vector.shape_cast %504 : vector<1x64x64xbf16> to vector<64x64xbf16>
    %cst_207 = arith.constant dense<0.000000e+00> : vector<5x64xf32>
    %506 = tpu.matmul %503, %505, %cst_207 {dimension_numbers = #tpu.dot_dimension_numbers<[1], [0], [0], [1], [0, 0, 1, 1], [], []>} : vector<5x64xbf16>, vector<64x64xbf16>, vector<5x64xf32> -> vector<5x64xf32>
    %507 = arith.addf %372, %506 : vector<5x64xf32>
    %c2_208 = arith.constant 2 : index
    %c0_209 = arith.constant 0 : index
    %c0_210 = arith.constant 0 : index
    %508 = vector.load %arg9[%c2_208, %c0_209, %c0_210] : memref<4x1x64xf32, #tpu.memory_space<vmem>>, vector<1x1x64xf32>
    %509 = vector.shape_cast %508 : vector<1x1x64xf32> to vector<1x64xf32>
    %510 = vector.broadcast %509 : vector<1x64xf32> to vector<5x64xf32>
    %511 = arith.addf %507, %510 : vector<5x64xf32>
    %c2_211 = arith.constant 2 : index
    %c0_212 = arith.constant 0 : index
    %c0_213 = arith.constant 0 : index
    %512 = vector.load %arg10[%c2_211, %c0_212, %c0_213] : memref<4x1x64xf32, #tpu.memory_space<vmem>>, vector<1x1x64xf32>
    %513 = vector.shape_cast %512 : vector<1x1x64xf32> to vector<1x64xf32>
    %c2_214 = arith.constant 2 : index
    %c0_215 = arith.constant 0 : index
    %c0_216 = arith.constant 0 : index
    %514 = vector.load %arg11[%c2_214, %c0_215, %c0_216] : memref<4x1x64xf32, #tpu.memory_space<vmem>>, vector<1x1x64xf32>
    %515 = vector.shape_cast %514 : vector<1x1x64xf32> to vector<1x64xf32>
    %cst_217 = arith.constant dense<0.000000e+00> : vector<5xf32>
    %516 = vector.multi_reduction <add>, %511, %cst_217 [1] : vector<5x64xf32> to vector<5xf32>
    %517 = vector.shape_cast %516 : vector<5xf32> to vector<5x1xf32>
    %cst_218 = arith.constant 6.400000e+01 : f32
    %518 = vector.broadcast %cst_218 : f32 to vector<5x1xf32>
    %519 = arith.divf %517, %518 : vector<5x1xf32>
    %520 = vector.broadcast %519 : vector<5x1xf32> to vector<5x64xf32>
    %521 = arith.subf %511, %520 : vector<5x64xf32>
    %522 = arith.mulf %521, %521 : vector<5x64xf32>
    %cst_219 = arith.constant dense<0.000000e+00> : vector<5xf32>
    %523 = vector.multi_reduction <add>, %522, %cst_219 [1] : vector<5x64xf32> to vector<5xf32>
    %524 = vector.shape_cast %523 : vector<5xf32> to vector<5x1xf32>
    %cst_220 = arith.constant 6.400000e+01 : f32
    %525 = vector.broadcast %cst_220 : f32 to vector<5x1xf32>
    %526 = arith.divf %524, %525 : vector<5x1xf32>
    %527 = vector.broadcast %519 : vector<5x1xf32> to vector<5x64xf32>
    %528 = arith.subf %511, %527 : vector<5x64xf32>
    %cst_221 = arith.constant 9.99999996E-13 : f32
    %529 = vector.broadcast %cst_221 : f32 to vector<5x1xf32>
    %530 = arith.addf %526, %529 : vector<5x1xf32>
    %531 = math.rsqrt %530 : vector<5x1xf32>
    %532 = vector.broadcast %531 : vector<5x1xf32> to vector<5x64xf32>
    %533 = arith.mulf %528, %532 : vector<5x64xf32>
    %534 = vector.broadcast %513 : vector<1x64xf32> to vector<5x64xf32>
    %535 = arith.mulf %533, %534 : vector<5x64xf32>
    %536 = vector.broadcast %515 : vector<1x64xf32> to vector<5x64xf32>
    %537 = arith.addf %535, %536 : vector<5x64xf32>
    %538 = arith.truncf %537 : vector<5x64xf32> to vector<5x64xbf16>
    %c2_222 = arith.constant 2 : index
    %c0_223 = arith.constant 0 : index
    %c0_224 = arith.constant 0 : index
    %539 = vector.load %arg12[%c2_222, %c0_223, %c0_224] : memref<4x64x256xbf16, #tpu.memory_space<vmem>>, vector<1x64x256xbf16>
    %540 = vector.shape_cast %539 : vector<1x64x256xbf16> to vector<64x256xbf16>
    %cst_225 = arith.constant dense<0.000000e+00> : vector<5x256xf32>
    %541 = tpu.matmul %538, %540, %cst_225 {dimension_numbers = #tpu.dot_dimension_numbers<[1], [0], [0], [1], [0, 0, 1, 1], [], []>} : vector<5x64xbf16>, vector<64x256xbf16>, vector<5x256xf32> -> vector<5x256xf32>
    %c2_226 = arith.constant 2 : index
    %c0_227 = arith.constant 0 : index
    %c0_228 = arith.constant 0 : index
    %542 = vector.load %arg13[%c2_226, %c0_227, %c0_228] : memref<4x1x256xf32, #tpu.memory_space<vmem>>, vector<1x1x256xf32>
    %543 = vector.shape_cast %542 : vector<1x1x256xf32> to vector<1x256xf32>
    %544 = vector.broadcast %543 : vector<1x256xf32> to vector<5x256xf32>
    %545 = arith.addf %541, %544 : vector<5x256xf32>
    %546 = arith.mulf %545, %545 : vector<5x256xf32>
    %547 = arith.mulf %545, %546 : vector<5x256xf32>
    %cst_229 = arith.constant 4.471500e-02 : f32
    %548 = vector.broadcast %cst_229 : f32 to vector<5x256xf32>
    %549 = arith.mulf %548, %547 : vector<5x256xf32>
    %550 = arith.addf %545, %549 : vector<5x256xf32>
    %cst_230 = arith.constant 0.797884583 : f32
    %551 = vector.broadcast %cst_230 : f32 to vector<5x256xf32>
    %552 = arith.mulf %551, %550 : vector<5x256xf32>
    %553 = math.tanh %552 : vector<5x256xf32>
    %cst_231 = arith.constant 1.000000e+00 : f32
    %554 = vector.broadcast %cst_231 : f32 to vector<5x256xf32>
    %555 = arith.addf %554, %553 : vector<5x256xf32>
    %cst_232 = arith.constant 5.000000e-01 : f32
    %556 = vector.broadcast %cst_232 : f32 to vector<5x256xf32>
    %557 = arith.mulf %556, %555 : vector<5x256xf32>
    %558 = arith.mulf %545, %557 : vector<5x256xf32>
    %559 = arith.truncf %558 : vector<5x256xf32> to vector<5x256xbf16>
    %c2_233 = arith.constant 2 : index
    %c0_234 = arith.constant 0 : index
    %c0_235 = arith.constant 0 : index
    %560 = vector.load %arg14[%c2_233, %c0_234, %c0_235] : memref<4x256x64xbf16, #tpu.memory_space<vmem>>, vector<1x256x64xbf16>
    %561 = vector.shape_cast %560 : vector<1x256x64xbf16> to vector<256x64xbf16>
    %cst_236 = arith.constant dense<0.000000e+00> : vector<5x64xf32>
    %562 = tpu.matmul %559, %561, %cst_236 {dimension_numbers = #tpu.dot_dimension_numbers<[1], [0], [0], [1], [0, 0, 1, 1], [], []>} : vector<5x256xbf16>, vector<256x64xbf16>, vector<5x64xf32> -> vector<5x64xf32>
    %563 = arith.addf %511, %562 : vector<5x64xf32>
    %c2_237 = arith.constant 2 : index
    %c0_238 = arith.constant 0 : index
    %c0_239 = arith.constant 0 : index
    %564 = vector.load %arg15[%c2_237, %c0_238, %c0_239] : memref<4x1x64xf32, #tpu.memory_space<vmem>>, vector<1x1x64xf32>
    %565 = vector.shape_cast %564 : vector<1x1x64xf32> to vector<1x64xf32>
    %566 = vector.broadcast %565 : vector<1x64xf32> to vector<5x64xf32>
    %567 = arith.addf %563, %566 : vector<5x64xf32>
    %c3 = arith.constant 3 : index
    %c0_240 = arith.constant 0 : index
    %c0_241 = arith.constant 0 : index
    %568 = vector.load %arg4[%c3, %c0_240, %c0_241] : memref<4x1x64xf32, #tpu.memory_space<vmem>>, vector<1x1x64xf32>
    %569 = vector.shape_cast %568 : vector<1x1x64xf32> to vector<1x64xf32>
    %c3_242 = arith.constant 3 : index
    %c0_243 = arith.constant 0 : index
    %c0_244 = arith.constant 0 : index
    %570 = vector.load %arg5[%c3_242, %c0_243, %c0_244] : memref<4x1x64xf32, #tpu.memory_space<vmem>>, vector<1x1x64xf32>
    %571 = vector.shape_cast %570 : vector<1x1x64xf32> to vector<1x64xf32>
    %cst_245 = arith.constant dense<0.000000e+00> : vector<5xf32>
    %572 = vector.multi_reduction <add>, %567, %cst_245 [1] : vector<5x64xf32> to vector<5xf32>
    %573 = vector.shape_cast %572 : vector<5xf32> to vector<5x1xf32>
    %cst_246 = arith.constant 6.400000e+01 : f32
    %574 = vector.broadcast %cst_246 : f32 to vector<5x1xf32>
    %575 = arith.divf %573, %574 : vector<5x1xf32>
    %576 = vector.broadcast %575 : vector<5x1xf32> to vector<5x64xf32>
    %577 = arith.subf %567, %576 : vector<5x64xf32>
    %578 = arith.mulf %577, %577 : vector<5x64xf32>
    %cst_247 = arith.constant dense<0.000000e+00> : vector<5xf32>
    %579 = vector.multi_reduction <add>, %578, %cst_247 [1] : vector<5x64xf32> to vector<5xf32>
    %580 = vector.shape_cast %579 : vector<5xf32> to vector<5x1xf32>
    %cst_248 = arith.constant 6.400000e+01 : f32
    %581 = vector.broadcast %cst_248 : f32 to vector<5x1xf32>
    %582 = arith.divf %580, %581 : vector<5x1xf32>
    %583 = vector.broadcast %575 : vector<5x1xf32> to vector<5x64xf32>
    %584 = arith.subf %567, %583 : vector<5x64xf32>
    %cst_249 = arith.constant 9.99999996E-13 : f32
    %585 = vector.broadcast %cst_249 : f32 to vector<5x1xf32>
    %586 = arith.addf %582, %585 : vector<5x1xf32>
    %587 = math.rsqrt %586 : vector<5x1xf32>
    %588 = vector.broadcast %587 : vector<5x1xf32> to vector<5x64xf32>
    %589 = arith.mulf %584, %588 : vector<5x64xf32>
    %590 = vector.broadcast %569 : vector<1x64xf32> to vector<5x64xf32>
    %591 = arith.mulf %589, %590 : vector<5x64xf32>
    %592 = vector.broadcast %571 : vector<1x64xf32> to vector<5x64xf32>
    %593 = arith.addf %591, %592 : vector<5x64xf32>
    %594 = arith.truncf %593 : vector<5x64xf32> to vector<5x64xbf16>
    %c3_250 = arith.constant 3 : index
    %c0_251 = arith.constant 0 : index
    %c0_252 = arith.constant 0 : index
    %595 = vector.load %arg6[%c3_250, %c0_251, %c0_252] : memref<4x64x192xbf16, #tpu.memory_space<vmem>>, vector<1x64x192xbf16>
    %596 = vector.shape_cast %595 : vector<1x64x192xbf16> to vector<64x192xbf16>
    %cst_253 = arith.constant dense<0.000000e+00> : vector<5x192xf32>
    %597 = tpu.matmul %594, %596, %cst_253 {dimension_numbers = #tpu.dot_dimension_numbers<[1], [0], [0], [1], [0, 0, 1, 1], [], []>} : vector<5x64xbf16>, vector<64x192xbf16>, vector<5x192xf32> -> vector<5x192xf32>
    %c3_254 = arith.constant 3 : index
    %c0_255 = arith.constant 0 : index
    %c0_256 = arith.constant 0 : index
    %598 = vector.load %arg7[%c3_254, %c0_255, %c0_256] : memref<4x1x192xf32, #tpu.memory_space<vmem>>, vector<1x1x192xf32>
    %599 = vector.shape_cast %598 : vector<1x1x192xf32> to vector<1x192xf32>
    %600 = vector.broadcast %599 : vector<1x192xf32> to vector<5x192xf32>
    %601 = arith.addf %597, %600 : vector<5x192xf32>
    %602 = vector.extract_strided_slice %601 {offsets = [0, 0], sizes = [5, 16], strides = [1, 1]} : vector<5x192xf32> to vector<5x16xf32>
    %603 = arith.truncf %602 : vector<5x16xf32> to vector<5x16xbf16>
    %604 = vector.extract_strided_slice %601 {offsets = [0, 64], sizes = [5, 16], strides = [1, 1]} : vector<5x192xf32> to vector<5x16xf32>
    %605 = arith.truncf %604 : vector<5x16xf32> to vector<5x16xbf16>
    %606 = vector.extract_strided_slice %601 {offsets = [0, 128], sizes = [5, 16], strides = [1, 1]} : vector<5x192xf32> to vector<5x16xf32>
    %607 = arith.truncf %606 : vector<5x16xf32> to vector<5x16xbf16>
    %cst_257 = arith.constant dense<0.000000e+00> : vector<5x5xf32>
    %608 = tpu.matmul %603, %605, %cst_257 {dimension_numbers = #tpu.dot_dimension_numbers<[1], [1], [0], [0], [0, 0, 1, 0], [], []>} : vector<5x16xbf16>, vector<5x16xbf16>, vector<5x5xf32> -> vector<5x5xf32>
    %cst_258 = arith.constant dense<0xFF800000> : vector<5xf32>
    %609 = vector.multi_reduction <maximumf>, %608, %cst_258 [1] : vector<5x5xf32> to vector<5xf32>
    %610 = vector.shape_cast %609 : vector<5xf32> to vector<5x1xf32>
    %611 = vector.broadcast %610 : vector<5x1xf32> to vector<5x5xf32>
    %612 = arith.subf %608, %611 : vector<5x5xf32>
    %613 = math.exp %612 : vector<5x5xf32>
    %cst_259 = arith.constant dense<0.000000e+00> : vector<5xf32>
    %614 = vector.multi_reduction <add>, %613, %cst_259 [1] : vector<5x5xf32> to vector<5xf32>
    %615 = vector.shape_cast %614 : vector<5xf32> to vector<5x1xf32>
    %616 = vector.broadcast %615 : vector<5x1xf32> to vector<5x5xf32>
    %617 = arith.divf %613, %616 : vector<5x5xf32>
    %618 = arith.truncf %617 : vector<5x5xf32> to vector<5x5xbf16>
    %cst_260 = arith.constant dense<0.000000e+00> : vector<5x16xf32>
    %619 = tpu.matmul %618, %607, %cst_260 {dimension_numbers = #tpu.dot_dimension_numbers<[1], [0], [0], [1], [0, 0, 1, 1], [], []>} : vector<5x5xbf16>, vector<5x16xbf16>, vector<5x16xf32> -> vector<5x16xf32>
    %620 = vector.extract_strided_slice %601 {offsets = [0, 16], sizes = [5, 16], strides = [1, 1]} : vector<5x192xf32> to vector<5x16xf32>
    %621 = arith.truncf %620 : vector<5x16xf32> to vector<5x16xbf16>
    %622 = vector.extract_strided_slice %601 {offsets = [0, 80], sizes = [5, 16], strides = [1, 1]} : vector<5x192xf32> to vector<5x16xf32>
    %623 = arith.truncf %622 : vector<5x16xf32> to vector<5x16xbf16>
    %624 = vector.extract_strided_slice %601 {offsets = [0, 144], sizes = [5, 16], strides = [1, 1]} : vector<5x192xf32> to vector<5x16xf32>
    %625 = arith.truncf %624 : vector<5x16xf32> to vector<5x16xbf16>
    %cst_261 = arith.constant dense<0.000000e+00> : vector<5x5xf32>
    %626 = tpu.matmul %621, %623, %cst_261 {dimension_numbers = #tpu.dot_dimension_numbers<[1], [1], [0], [0], [0, 0, 1, 0], [], []>} : vector<5x16xbf16>, vector<5x16xbf16>, vector<5x5xf32> -> vector<5x5xf32>
    %cst_262 = arith.constant dense<0xFF800000> : vector<5xf32>
    %627 = vector.multi_reduction <maximumf>, %626, %cst_262 [1] : vector<5x5xf32> to vector<5xf32>
    %628 = vector.shape_cast %627 : vector<5xf32> to vector<5x1xf32>
    %629 = vector.broadcast %628 : vector<5x1xf32> to vector<5x5xf32>
    %630 = arith.subf %626, %629 : vector<5x5xf32>
    %631 = math.exp %630 : vector<5x5xf32>
    %cst_263 = arith.constant dense<0.000000e+00> : vector<5xf32>
    %632 = vector.multi_reduction <add>, %631, %cst_263 [1] : vector<5x5xf32> to vector<5xf32>
    %633 = vector.shape_cast %632 : vector<5xf32> to vector<5x1xf32>
    %634 = vector.broadcast %633 : vector<5x1xf32> to vector<5x5xf32>
    %635 = arith.divf %631, %634 : vector<5x5xf32>
    %636 = arith.truncf %635 : vector<5x5xf32> to vector<5x5xbf16>
    %cst_264 = arith.constant dense<0.000000e+00> : vector<5x16xf32>
    %637 = tpu.matmul %636, %625, %cst_264 {dimension_numbers = #tpu.dot_dimension_numbers<[1], [0], [0], [1], [0, 0, 1, 1], [], []>} : vector<5x5xbf16>, vector<5x16xbf16>, vector<5x16xf32> -> vector<5x16xf32>
    %638 = vector.extract_strided_slice %601 {offsets = [0, 32], sizes = [5, 16], strides = [1, 1]} : vector<5x192xf32> to vector<5x16xf32>
    %639 = arith.truncf %638 : vector<5x16xf32> to vector<5x16xbf16>
    %640 = vector.extract_strided_slice %601 {offsets = [0, 96], sizes = [5, 16], strides = [1, 1]} : vector<5x192xf32> to vector<5x16xf32>
    %641 = arith.truncf %640 : vector<5x16xf32> to vector<5x16xbf16>
    %642 = vector.extract_strided_slice %601 {offsets = [0, 160], sizes = [5, 16], strides = [1, 1]} : vector<5x192xf32> to vector<5x16xf32>
    %643 = arith.truncf %642 : vector<5x16xf32> to vector<5x16xbf16>
    %cst_265 = arith.constant dense<0.000000e+00> : vector<5x5xf32>
    %644 = tpu.matmul %639, %641, %cst_265 {dimension_numbers = #tpu.dot_dimension_numbers<[1], [1], [0], [0], [0, 0, 1, 0], [], []>} : vector<5x16xbf16>, vector<5x16xbf16>, vector<5x5xf32> -> vector<5x5xf32>
    %cst_266 = arith.constant dense<0xFF800000> : vector<5xf32>
    %645 = vector.multi_reduction <maximumf>, %644, %cst_266 [1] : vector<5x5xf32> to vector<5xf32>
    %646 = vector.shape_cast %645 : vector<5xf32> to vector<5x1xf32>
    %647 = vector.broadcast %646 : vector<5x1xf32> to vector<5x5xf32>
    %648 = arith.subf %644, %647 : vector<5x5xf32>
    %649 = math.exp %648 : vector<5x5xf32>
    %cst_267 = arith.constant dense<0.000000e+00> : vector<5xf32>
    %650 = vector.multi_reduction <add>, %649, %cst_267 [1] : vector<5x5xf32> to vector<5xf32>
    %651 = vector.shape_cast %650 : vector<5xf32> to vector<5x1xf32>
    %652 = vector.broadcast %651 : vector<5x1xf32> to vector<5x5xf32>
    %653 = arith.divf %649, %652 : vector<5x5xf32>
    %654 = arith.truncf %653 : vector<5x5xf32> to vector<5x5xbf16>
    %cst_268 = arith.constant dense<0.000000e+00> : vector<5x16xf32>
    %655 = tpu.matmul %654, %643, %cst_268 {dimension_numbers = #tpu.dot_dimension_numbers<[1], [0], [0], [1], [0, 0, 1, 1], [], []>} : vector<5x5xbf16>, vector<5x16xbf16>, vector<5x16xf32> -> vector<5x16xf32>
    %656 = vector.extract_strided_slice %601 {offsets = [0, 48], sizes = [5, 16], strides = [1, 1]} : vector<5x192xf32> to vector<5x16xf32>
    %657 = arith.truncf %656 : vector<5x16xf32> to vector<5x16xbf16>
    %658 = vector.extract_strided_slice %601 {offsets = [0, 112], sizes = [5, 16], strides = [1, 1]} : vector<5x192xf32> to vector<5x16xf32>
    %659 = arith.truncf %658 : vector<5x16xf32> to vector<5x16xbf16>
    %660 = vector.extract_strided_slice %601 {offsets = [0, 176], sizes = [5, 16], strides = [1, 1]} : vector<5x192xf32> to vector<5x16xf32>
    %661 = arith.truncf %660 : vector<5x16xf32> to vector<5x16xbf16>
    %cst_269 = arith.constant dense<0.000000e+00> : vector<5x5xf32>
    %662 = tpu.matmul %657, %659, %cst_269 {dimension_numbers = #tpu.dot_dimension_numbers<[1], [1], [0], [0], [0, 0, 1, 0], [], []>} : vector<5x16xbf16>, vector<5x16xbf16>, vector<5x5xf32> -> vector<5x5xf32>
    %cst_270 = arith.constant dense<0xFF800000> : vector<5xf32>
    %663 = vector.multi_reduction <maximumf>, %662, %cst_270 [1] : vector<5x5xf32> to vector<5xf32>
    %664 = vector.shape_cast %663 : vector<5xf32> to vector<5x1xf32>
    %665 = vector.broadcast %664 : vector<5x1xf32> to vector<5x5xf32>
    %666 = arith.subf %662, %665 : vector<5x5xf32>
    %667 = math.exp %666 : vector<5x5xf32>
    %cst_271 = arith.constant dense<0.000000e+00> : vector<5xf32>
    %668 = vector.multi_reduction <add>, %667, %cst_271 [1] : vector<5x5xf32> to vector<5xf32>
    %669 = vector.shape_cast %668 : vector<5xf32> to vector<5x1xf32>
    %670 = vector.broadcast %669 : vector<5x1xf32> to vector<5x5xf32>
    %671 = arith.divf %667, %670 : vector<5x5xf32>
    %672 = arith.truncf %671 : vector<5x5xf32> to vector<5x5xbf16>
    %cst_272 = arith.constant dense<0.000000e+00> : vector<5x16xf32>
    %673 = tpu.matmul %672, %661, %cst_272 {dimension_numbers = #tpu.dot_dimension_numbers<[1], [0], [0], [1], [0, 0, 1, 1], [], []>} : vector<5x5xbf16>, vector<5x16xbf16>, vector<5x16xf32> -> vector<5x16xf32>
    %674 = tpu.concatenate %619, %637, %655, %673 in 1 : vector<5x16xf32>, vector<5x16xf32>, vector<5x16xf32>, vector<5x16xf32> -> vector<5x64xf32>
    %675 = arith.truncf %674 : vector<5x64xf32> to vector<5x64xbf16>
    %c3_273 = arith.constant 3 : index
    %c0_274 = arith.constant 0 : index
    %c0_275 = arith.constant 0 : index
    %676 = vector.load %arg8[%c3_273, %c0_274, %c0_275] : memref<4x64x64xbf16, #tpu.memory_space<vmem>>, vector<1x64x64xbf16>
    %677 = vector.shape_cast %676 : vector<1x64x64xbf16> to vector<64x64xbf16>
    %cst_276 = arith.constant dense<0.000000e+00> : vector<5x64xf32>
    %678 = tpu.matmul %675, %677, %cst_276 {dimension_numbers = #tpu.dot_dimension_numbers<[1], [0], [0], [1], [0, 0, 1, 1], [], []>} : vector<5x64xbf16>, vector<64x64xbf16>, vector<5x64xf32> -> vector<5x64xf32>
    %679 = arith.addf %567, %678 : vector<5x64xf32>
    %c3_277 = arith.constant 3 : index
    %c0_278 = arith.constant 0 : index
    %c0_279 = arith.constant 0 : index
    %680 = vector.load %arg9[%c3_277, %c0_278, %c0_279] : memref<4x1x64xf32, #tpu.memory_space<vmem>>, vector<1x1x64xf32>
    %681 = vector.shape_cast %680 : vector<1x1x64xf32> to vector<1x64xf32>
    %682 = vector.broadcast %681 : vector<1x64xf32> to vector<5x64xf32>
    %683 = arith.addf %679, %682 : vector<5x64xf32>
    %c3_280 = arith.constant 3 : index
    %c0_281 = arith.constant 0 : index
    %c0_282 = arith.constant 0 : index
    %684 = vector.load %arg10[%c3_280, %c0_281, %c0_282] : memref<4x1x64xf32, #tpu.memory_space<vmem>>, vector<1x1x64xf32>
    %685 = vector.shape_cast %684 : vector<1x1x64xf32> to vector<1x64xf32>
    %c3_283 = arith.constant 3 : index
    %c0_284 = arith.constant 0 : index
    %c0_285 = arith.constant 0 : index
    %686 = vector.load %arg11[%c3_283, %c0_284, %c0_285] : memref<4x1x64xf32, #tpu.memory_space<vmem>>, vector<1x1x64xf32>
    %687 = vector.shape_cast %686 : vector<1x1x64xf32> to vector<1x64xf32>
    %cst_286 = arith.constant dense<0.000000e+00> : vector<5xf32>
    %688 = vector.multi_reduction <add>, %683, %cst_286 [1] : vector<5x64xf32> to vector<5xf32>
    %689 = vector.shape_cast %688 : vector<5xf32> to vector<5x1xf32>
    %cst_287 = arith.constant 6.400000e+01 : f32
    %690 = vector.broadcast %cst_287 : f32 to vector<5x1xf32>
    %691 = arith.divf %689, %690 : vector<5x1xf32>
    %692 = vector.broadcast %691 : vector<5x1xf32> to vector<5x64xf32>
    %693 = arith.subf %683, %692 : vector<5x64xf32>
    %694 = arith.mulf %693, %693 : vector<5x64xf32>
    %cst_288 = arith.constant dense<0.000000e+00> : vector<5xf32>
    %695 = vector.multi_reduction <add>, %694, %cst_288 [1] : vector<5x64xf32> to vector<5xf32>
    %696 = vector.shape_cast %695 : vector<5xf32> to vector<5x1xf32>
    %cst_289 = arith.constant 6.400000e+01 : f32
    %697 = vector.broadcast %cst_289 : f32 to vector<5x1xf32>
    %698 = arith.divf %696, %697 : vector<5x1xf32>
    %699 = vector.broadcast %691 : vector<5x1xf32> to vector<5x64xf32>
    %700 = arith.subf %683, %699 : vector<5x64xf32>
    %cst_290 = arith.constant 9.99999996E-13 : f32
    %701 = vector.broadcast %cst_290 : f32 to vector<5x1xf32>
    %702 = arith.addf %698, %701 : vector<5x1xf32>
    %703 = math.rsqrt %702 : vector<5x1xf32>
    %704 = vector.broadcast %703 : vector<5x1xf32> to vector<5x64xf32>
    %705 = arith.mulf %700, %704 : vector<5x64xf32>
    %706 = vector.broadcast %685 : vector<1x64xf32> to vector<5x64xf32>
    %707 = arith.mulf %705, %706 : vector<5x64xf32>
    %708 = vector.broadcast %687 : vector<1x64xf32> to vector<5x64xf32>
    %709 = arith.addf %707, %708 : vector<5x64xf32>
    %710 = arith.truncf %709 : vector<5x64xf32> to vector<5x64xbf16>
    %c3_291 = arith.constant 3 : index
    %c0_292 = arith.constant 0 : index
    %c0_293 = arith.constant 0 : index
    %711 = vector.load %arg12[%c3_291, %c0_292, %c0_293] : memref<4x64x256xbf16, #tpu.memory_space<vmem>>, vector<1x64x256xbf16>
    %712 = vector.shape_cast %711 : vector<1x64x256xbf16> to vector<64x256xbf16>
    %cst_294 = arith.constant dense<0.000000e+00> : vector<5x256xf32>
    %713 = tpu.matmul %710, %712, %cst_294 {dimension_numbers = #tpu.dot_dimension_numbers<[1], [0], [0], [1], [0, 0, 1, 1], [], []>} : vector<5x64xbf16>, vector<64x256xbf16>, vector<5x256xf32> -> vector<5x256xf32>
    %c3_295 = arith.constant 3 : index
    %c0_296 = arith.constant 0 : index
    %c0_297 = arith.constant 0 : index
    %714 = vector.load %arg13[%c3_295, %c0_296, %c0_297] : memref<4x1x256xf32, #tpu.memory_space<vmem>>, vector<1x1x256xf32>
    %715 = vector.shape_cast %714 : vector<1x1x256xf32> to vector<1x256xf32>
    %716 = vector.broadcast %715 : vector<1x256xf32> to vector<5x256xf32>
    %717 = arith.addf %713, %716 : vector<5x256xf32>
    %718 = arith.mulf %717, %717 : vector<5x256xf32>
    %719 = arith.mulf %717, %718 : vector<5x256xf32>
    %cst_298 = arith.constant 4.471500e-02 : f32
    %720 = vector.broadcast %cst_298 : f32 to vector<5x256xf32>
    %721 = arith.mulf %720, %719 : vector<5x256xf32>
    %722 = arith.addf %717, %721 : vector<5x256xf32>
    %cst_299 = arith.constant 0.797884583 : f32
    %723 = vector.broadcast %cst_299 : f32 to vector<5x256xf32>
    %724 = arith.mulf %723, %722 : vector<5x256xf32>
    %725 = math.tanh %724 : vector<5x256xf32>
    %cst_300 = arith.constant 1.000000e+00 : f32
    %726 = vector.broadcast %cst_300 : f32 to vector<5x256xf32>
    %727 = arith.addf %726, %725 : vector<5x256xf32>
    %cst_301 = arith.constant 5.000000e-01 : f32
    %728 = vector.broadcast %cst_301 : f32 to vector<5x256xf32>
    %729 = arith.mulf %728, %727 : vector<5x256xf32>
    %730 = arith.mulf %717, %729 : vector<5x256xf32>
    %731 = arith.truncf %730 : vector<5x256xf32> to vector<5x256xbf16>
    %c3_302 = arith.constant 3 : index
    %c0_303 = arith.constant 0 : index
    %c0_304 = arith.constant 0 : index
    %732 = vector.load %arg14[%c3_302, %c0_303, %c0_304] : memref<4x256x64xbf16, #tpu.memory_space<vmem>>, vector<1x256x64xbf16>
    %733 = vector.shape_cast %732 : vector<1x256x64xbf16> to vector<256x64xbf16>
    %cst_305 = arith.constant dense<0.000000e+00> : vector<5x64xf32>
    %734 = tpu.matmul %731, %733, %cst_305 {dimension_numbers = #tpu.dot_dimension_numbers<[1], [0], [0], [1], [0, 0, 1, 1], [], []>} : vector<5x256xbf16>, vector<256x64xbf16>, vector<5x64xf32> -> vector<5x64xf32>
    %735 = arith.addf %683, %734 : vector<5x64xf32>
    %c3_306 = arith.constant 3 : index
    %c0_307 = arith.constant 0 : index
    %c0_308 = arith.constant 0 : index
    %736 = vector.load %arg15[%c3_306, %c0_307, %c0_308] : memref<4x1x64xf32, #tpu.memory_space<vmem>>, vector<1x1x64xf32>
    %737 = vector.shape_cast %736 : vector<1x1x64xf32> to vector<1x64xf32>
    %738 = vector.broadcast %737 : vector<1x64xf32> to vector<5x64xf32>
    %739 = arith.addf %735, %738 : vector<5x64xf32>
    %740 = vector.extract_strided_slice %739 {offsets = [0, 0], sizes = [1, 64], strides = [1, 1]} : vector<5x64xf32> to vector<1x64xf32>
    %c0_309 = arith.constant 0 : index
    %c0_310 = arith.constant 0 : index
    %741 = vector.load %arg18[%c0_309, %c0_310] : memref<1x64xf32, #tpu.memory_space<vmem>>, vector<1x64xf32>
    %c0_311 = arith.constant 0 : index
    %c0_312 = arith.constant 0 : index
    %742 = vector.load %arg19[%c0_311, %c0_312] : memref<1x64xf32, #tpu.memory_space<vmem>>, vector<1x64xf32>
    %cst_313 = arith.constant dense<0.000000e+00> : vector<1xf32>
    %743 = vector.multi_reduction <add>, %740, %cst_313 [1] : vector<1x64xf32> to vector<1xf32>
    %744 = vector.shape_cast %743 : vector<1xf32> to vector<1x1xf32>
    %cst_314 = arith.constant 6.400000e+01 : f32
    %745 = vector.broadcast %cst_314 : f32 to vector<1x1xf32>
    %746 = arith.divf %744, %745 : vector<1x1xf32>
    %747 = vector.broadcast %746 : vector<1x1xf32> to vector<1x64xf32>
    %748 = arith.subf %740, %747 : vector<1x64xf32>
    %749 = arith.mulf %748, %748 : vector<1x64xf32>
    %cst_315 = arith.constant dense<0.000000e+00> : vector<1xf32>
    %750 = vector.multi_reduction <add>, %749, %cst_315 [1] : vector<1x64xf32> to vector<1xf32>
    %751 = vector.shape_cast %750 : vector<1xf32> to vector<1x1xf32>
    %cst_316 = arith.constant 6.400000e+01 : f32
    %752 = vector.broadcast %cst_316 : f32 to vector<1x1xf32>
    %753 = arith.divf %751, %752 : vector<1x1xf32>
    %754 = vector.broadcast %746 : vector<1x1xf32> to vector<1x64xf32>
    %755 = arith.subf %740, %754 : vector<1x64xf32>
    %cst_317 = arith.constant 9.99999996E-13 : f32
    %756 = vector.broadcast %cst_317 : f32 to vector<1x1xf32>
    %757 = arith.addf %753, %756 : vector<1x1xf32>
    %758 = math.rsqrt %757 : vector<1x1xf32>
    %759 = vector.broadcast %758 : vector<1x1xf32> to vector<1x64xf32>
    %760 = arith.mulf %755, %759 : vector<1x64xf32>
    %761 = arith.mulf %760, %741 : vector<1x64xf32>
    %762 = arith.addf %761, %742 : vector<1x64xf32>
    %763 = arith.truncf %762 : vector<1x64xf32> to vector<1x64xbf16>
    %c0_318 = arith.constant 0 : index
    %c0_319 = arith.constant 0 : index
    %764 = vector.load %arg20[%c0_318, %c0_319] : memref<64x64xbf16, #tpu.memory_space<vmem>>, vector<64x64xbf16>
    %cst_320 = arith.constant dense<0.000000e+00> : vector<1x64xf32>
    %765 = tpu.matmul %763, %764, %cst_320 {dimension_numbers = #tpu.dot_dimension_numbers<[1], [0], [0], [1], [0, 0, 1, 1], [], []>} : vector<1x64xbf16>, vector<64x64xbf16>, vector<1x64xf32> -> vector<1x64xf32>
    %c0_321 = arith.constant 0 : index
    %c0_322 = arith.constant 0 : index
    %766 = vector.load %arg21[%c0_321, %c0_322] : memref<1x64xf32, #tpu.memory_space<vmem>>, vector<1x64xf32>
    %767 = arith.addf %765, %766 : vector<1x64xf32>
    %768 = math.tanh %767 : vector<1x64xf32>
    %769 = arith.truncf %768 : vector<1x64xf32> to vector<1x64xbf16>
    %c0_323 = arith.constant 0 : index
    %c0_324 = arith.constant 0 : index
    %770 = vector.load %arg22[%c0_323, %c0_324] : memref<64x10xbf16, #tpu.memory_space<vmem>>, vector<64x10xbf16>
    %cst_325 = arith.constant dense<0.000000e+00> : vector<1x10xf32>
    %771 = tpu.matmul %769, %770, %cst_325 {dimension_numbers = #tpu.dot_dimension_numbers<[1], [0], [0], [1], [0, 0, 1, 1], [], []>} : vector<1x64xbf16>, vector<64x10xbf16>, vector<1x10xf32> -> vector<1x10xf32>
    %c0_326 = arith.constant 0 : index
    %c0_327 = arith.constant 0 : index
    %772 = vector.load %arg23[%c0_326, %c0_327] : memref<1x10xf32, #tpu.memory_space<vmem>>, vector<1x10xf32>
    %773 = arith.addf %771, %772 : vector<1x10xf32>
    %c0_328 = arith.constant 0 : index
    %c0_329 = arith.constant 0 : index
    %c0_330 = arith.constant 0 : index
    %774 = vector.load %arg25[%c0_328, %c0_329, %c0_330] : memref<1x1x10xf32, #tpu.memory_space<vmem>>, vector<1x1x10xf32>
    %775 = vector.shape_cast %774 : vector<1x1x10xf32> to vector<1x10xf32>
    %776 = vector.shape_cast %773 : vector<1x10xf32> to vector<1x1x10xf32>
    tpu.vector_store %arg25[%c0_328, %c0_329, %c0_330], %776 {strides = array<i32>} : memref<1x1x10xf32, #tpu.memory_space<vmem>>, vector<1x1x10xf32>,
    return
  }
  func.func @transform_0(%arg0: i32) -> (i32, i32, i32) {
    %c0_i32 = arith.constant 0 : i32
    %c0_i32_0 = arith.constant 0 : i32
    %c0_i32_1 = arith.constant 0 : i32
    return %arg0, %c0_i32, %c0_i32_0 : i32, i32, i32
  }
  func.func @transform_1(%arg0: i32) -> (i32, i32) {
    %c0_i32 = arith.constant 0 : i32
    %c0_i32_0 = arith.constant 0 : i32
    %c0_i32_1 = arith.constant 0 : i32
    return %c0_i32, %c0_i32_0 : i32, i32
  }
  func.func @transform_2(%arg0: i32) -> (i32, i32) {
    %c0_i32 = arith.constant 0 : i32
    %c0_i32_0 = arith.constant 0 : i32
    %c0_i32_1 = arith.constant 0 : i32
    return %c0_i32, %c0_i32_0 : i32, i32
  }
  func.func @transform_3(%arg0: i32) -> (i32, i32, i32) {
    %c0_i32 = arith.constant 0 : i32
    %c0_i32_0 = arith.constant 0 : i32
    %c0_i32_1 = arith.constant 0 : i32
    %c0_i32_2 = arith.constant 0 : i32
    return %c0_i32, %c0_i32_0, %c0_i32_1 : i32, i32, i32
  }
  func.func @transform_4(%arg0: i32) -> (i32, i32, i32) {
    %c0_i32 = arith.constant 0 : i32
    %c0_i32_0 = arith.constant 0 : i32
    %c0_i32_1 = arith.constant 0 : i32
    %c0_i32_2 = arith.constant 0 : i32
    return %c0_i32, %c0_i32_0, %c0_i32_1 : i32, i32, i32
  }
  func.func @transform_5(%arg0: i32) -> (i32, i32, i32) {
    %c0_i32 = arith.constant 0 : i32
    %c0_i32_0 = arith.constant 0 : i32
    %c0_i32_1 = arith.constant 0 : i32
    %c0_i32_2 = arith.constant 0 : i32
    return %c0_i32, %c0_i32_0, %c0_i32_1 : i32, i32, i32
  }
  func.func @transform_6(%arg0: i32) -> (i32, i32, i32) {
    %c0_i32 = arith.constant 0 : i32
    %c0_i32_0 = arith.constant 0 : i32
    %c0_i32_1 = arith.constant 0 : i32
    %c0_i32_2 = arith.constant 0 : i32
    return %c0_i32, %c0_i32_0, %c0_i32_1 : i32, i32, i32
  }
  func.func @transform_7(%arg0: i32) -> (i32, i32, i32) {
    %c0_i32 = arith.constant 0 : i32
    %c0_i32_0 = arith.constant 0 : i32
    %c0_i32_1 = arith.constant 0 : i32
    %c0_i32_2 = arith.constant 0 : i32
    return %c0_i32, %c0_i32_0, %c0_i32_1 : i32, i32, i32
  }
  func.func @transform_8(%arg0: i32) -> (i32, i32, i32) {
    %c0_i32 = arith.constant 0 : i32
    %c0_i32_0 = arith.constant 0 : i32
    %c0_i32_1 = arith.constant 0 : i32
    %c0_i32_2 = arith.constant 0 : i32
    return %c0_i32, %c0_i32_0, %c0_i32_1 : i32, i32, i32
  }
  func.func @transform_9(%arg0: i32) -> (i32, i32, i32) {
    %c0_i32 = arith.constant 0 : i32
    %c0_i32_0 = arith.constant 0 : i32
    %c0_i32_1 = arith.constant 0 : i32
    %c0_i32_2 = arith.constant 0 : i32
    return %c0_i32, %c0_i32_0, %c0_i32_1 : i32, i32, i32
  }
  func.func @transform_10(%arg0: i32) -> (i32, i32, i32) {
    %c0_i32 = arith.constant 0 : i32
    %c0_i32_0 = arith.constant 0 : i32
    %c0_i32_1 = arith.constant 0 : i32
    %c0_i32_2 = arith.constant 0 : i32
    return %c0_i32, %c0_i32_0, %c0_i32_1 : i32, i32, i32
  }
  func.func @transform_11(%arg0: i32) -> (i32, i32, i32) {
    %c0_i32 = arith.constant 0 : i32
    %c0_i32_0 = arith.constant 0 : i32
    %c0_i32_1 = arith.constant 0 : i32
    %c0_i32_2 = arith.constant 0 : i32
    return %c0_i32, %c0_i32_0, %c0_i32_1 : i32, i32, i32
  }
  func.func @transform_12(%arg0: i32) -> (i32, i32, i32) {
    %c0_i32 = arith.constant 0 : i32
    %c0_i32_0 = arith.constant 0 : i32
    %c0_i32_1 = arith.constant 0 : i32
    %c0_i32_2 = arith.constant 0 : i32
    return %c0_i32, %c0_i32_0, %c0_i32_1 : i32, i32, i32
  }
  func.func @transform_13(%arg0: i32) -> (i32, i32, i32) {
    %c0_i32 = arith.constant 0 : i32
    %c0_i32_0 = arith.constant 0 : i32
    %c0_i32_1 = arith.constant 0 : i32
    %c0_i32_2 = arith.constant 0 : i32
    return %c0_i32, %c0_i32_0, %c0_i32_1 : i32, i32, i32
  }
  func.func @transform_14(%arg0: i32) -> (i32, i32, i32) {
    %c0_i32 = arith.constant 0 : i32
    %c0_i32_0 = arith.constant 0 : i32
    %c0_i32_1 = arith.constant 0 : i32
    %c0_i32_2 = arith.constant 0 : i32
    return %c0_i32, %c0_i32_0, %c0_i32_1 : i32, i32, i32
  }
  func.func @transform_15(%arg0: i32) -> (i32, i32) {
    %c0_i32 = arith.constant 0 : i32
    %c0_i32_0 = arith.constant 0 : i32
    %c0_i32_1 = arith.constant 0 : i32
    return %c0_i32, %c0_i32_0 : i32, i32
  }
  func.func @transform_16(%arg0: i32) -> (i32, i32) {
    %c0_i32 = arith.constant 0 : i32
    %c0_i32_0 = arith.constant 0 : i32
    %c0_i32_1 = arith.constant 0 : i32
    return %c0_i32, %c0_i32_0 : i32, i32
  }
  func.func @transform_17(%arg0: i32) -> (i32, i32) {
    %c0_i32 = arith.constant 0 : i32
    %c0_i32_0 = arith.constant 0 : i32
    %c0_i32_1 = arith.constant 0 : i32
    return %c0_i32, %c0_i32_0 : i32, i32
  }
  func.func @transform_18(%arg0: i32) -> (i32, i32) {
    %c0_i32 = arith.constant 0 : i32
    %c0_i32_0 = arith.constant 0 : i32
    %c0_i32_1 = arith.constant 0 : i32
    return %c0_i32, %c0_i32_0 : i32, i32
  }
  func.func @transform_19(%arg0: i32) -> (i32, i32) {
    %c0_i32 = arith.constant 0 : i32
    %c0_i32_0 = arith.constant 0 : i32
    %c0_i32_1 = arith.constant 0 : i32
    return %c0_i32, %c0_i32_0 : i32, i32
  }
  func.func @transform_20(%arg0: i32) -> (i32, i32) {
    %c0_i32 = arith.constant 0 : i32
    %c0_i32_0 = arith.constant 0 : i32
    %c0_i32_1 = arith.constant 0 : i32
    return %c0_i32, %c0_i32_0 : i32, i32
  }
  func.func @transform_21(%arg0: i32) -> (i32, i32) {
    %c0_i32 = arith.constant 0 : i32
    %c0_i32_0 = arith.constant 0 : i32
    %c0_i32_1 = arith.constant 0 : i32
    return %c0_i32, %c0_i32_0 : i32, i32
  }
  func.func @transform_22(%arg0: i32) -> (i32, i32) {
    %c0_i32 = arith.constant 0 : i32
    %c0_i32_0 = arith.constant 0 : i32
    %c0_i32_1 = arith.constant 0 : i32
    return %c0_i32, %c0_i32_0 : i32, i32
  }
  func.func @transform_23(%arg0: i32) -> (i32, i32, i32, i32) {
    %c0_i32 = arith.constant 0 : i32
    %c0_i32_0 = arith.constant 0 : i32
    %c0_i32_1 = arith.constant 0 : i32
    %c0_i32_2 = arith.constant 0 : i32
    return %arg0, %c0_i32, %c0_i32_0, %c0_i32_1 : i32, i32, i32, i32
  }
  func.func @transform_24(%arg0: i32) -> (i32, i32, i32) {
    %c0_i32 = arith.constant 0 : i32
    %c0_i32_0 = arith.constant 0 : i32
    %c0_i32_1 = arith.constant 0 : i32
    return %arg0, %c0_i32, %c0_i32_0 : i32, i32, i32
  }
}

</mosaic_0001>

<bundles_post_ra>
// kernel: tpu_custom_call.1
= control target key start
LH: loop header
LB: loop body
LE: loop exit
PB: predicated region body
PF: predicated region fallthrough
CT: control target
= control target key end

     0   :  { %s10609_s0 = inlined_call_operand.vmem [shape: bf16[2,5,768], index: 0, kind: input, shape index: {}]   ;;  %s10610_s1 = inlined_call_operand.vmem [shape: f32[5,64], index: 1, kind: input, shape index: {}]   ;;  %s10611_s2 = inlined_call_operand.vmem [shape: bf16[768,64], index: 2, kind: input, shape index: {}]   ;;  %s10612_s3 = inlined_call_operand.vmem [shape: f32[4,1,64], index: 3, kind: input, shape index: {}]   ;;  %s10613_s4 = inlined_call_operand.vmem [shape: f32[4,1,64], index: 4, kind: input, shape index: {}]   ;;  %s10614_s5 = inlined_call_operand.vmem [shape: bf16[4,64,192], index: 5, kind: input, shape index: {}]   ;;  %s10615_s6 = inlined_call_operand.vmem [shape: f32[4,1,192], index: 6, kind: input, shape index: {}]   ;;  %s10616_s7 = inlined_call_operand.vmem [shape: bf16[4,64,64], index: 7, kind: input, shape index: {}]   ;;  %s10617_s8 = inlined_call_operand.vmem [shape: f32[4,1,64], index: 8, kind: input, shape index: {}]   ;;  %s10618_s9 = inlined_call_operand.vmem [shape: f32[4,1,64], index: 9, kind: input, shape index: {}]   ;;  %s10619_s10 = inlined_call_operand.vmem [shape: f32[4,1,64], index: 10, kind: input, shape index: {}]   ;;  %s10620_s11 = inlined_call_operand.vmem [shape: bf16[4,64,256], index: 11, kind: input, shape index: {}]   ;;  %s10621_s12 = inlined_call_operand.vmem [shape: f32[4,1,256], index: 12, kind: input, shape index: {}]   ;;  %s10622_s13 = inlined_call_operand.vmem [shape: bf16[4,256,64], index: 13, kind: input, shape index: {}]   ;;  %s10623_s14 = inlined_call_operand.vmem [shape: f32[4,1,64], index: 14, kind: input, shape index: {}]   ;;  %s10624_s15 = inlined_call_operand.vmem [shape: bf16[64,32], index: 15, kind: input, shape index: {}]   ;;  %s10625_s16 = inlined_call_operand.vmem [shape: f32[1,32], index: 16, kind: input, shape index: {}]   ;;  %s10626_s17 = inlined_call_operand.vmem [shape: f32[1,64], index: 17, kind: input, shape index: {}]   ;;  %s10627_s18 = inlined_call_operand.vmem [shape: f32[1,64], index: 18, kind: input, shape index: {}]   ;;  %s10628_s19 = inlined_call_operand.vmem [shape: bf16[64,64], index: 19, kind: input, shape index: {}]   ;;  %s10629_s20 = inlined_call_operand.vmem [shape: f32[1,64], index: 20, kind: input, shape index: {}]   ;;  %s10630_s21 = inlined_call_operand.vmem [shape: bf16[64,10], index: 21, kind: input, shape index: {}]   ;;  %s10631_s22 = inlined_call_operand.vmem [shape: f32[1,10], index: 22, kind: input, shape index: {}]   ;;  %s10632_s23 = inlined_call_operand.vmem [shape: f32[2,2,5,32], index: 23, kind: output, shape index: {0}]   ;;  %s10633_s24 = inlined_call_operand.hbm [shape: f32[2,1,10], index: 24, kind: output, shape index: {1}]  }
   0x1   :  { %10679 = sst [smem:[#allocation21_spill]] %s10609_s0 }
   0x2   :  { %10680 = sst [smem:[#allocation22_spill]] %s10610_s1 }
   0x3   :  { %10681 = sst [smem:[#allocation23_spill]] %s10611_s2 }
   0x4   :  { %10682 = sst [smem:[#allocation24_spill]] %s10612_s3 }
   0x5   :  { %10683 = sst [smem:[#allocation25_spill]] %s10613_s4 }
   0x6   :  { %10684 = sst [smem:[#allocation26_spill]] %s10614_s5 }
   0x7   :  { %10685 = sst [smem:[#allocation27_spill]] %s10615_s6 }
   0x8   :  { %10686 = sst [smem:[#allocation28_spill]] %s10616_s7 }
   0x9   :  { %10687 = sst [smem:[#allocation29_spill]] %s10617_s8 }
   0xa   :  { %10688 = sst [smem:[#allocation30_spill]] %s10626_s17 }
   0xb   :  { %10689 = sst [smem:[#allocation31_spill]] %s10627_s18 }
   0xc   :  { %10690 = sst [smem:[#allocation32_spill]] %s10628_s19 }
   0xd   :  { %10691 = sst [smem:[#allocation33_spill]] %s10629_s20 }
   0xe   :  { %10692 = sst [smem:[#allocation34_spill]] %s10630_s21 }
   0xf   :  { %10693 = sst [smem:[#allocation35_spill]] %s10631_s22 }
  0x10   :  { %10694 = sst [smem:[#allocation36_spill]] %s10632_s23 }
  0x11   :  { %10695 = sst [smem:[#allocation37_spill]] %s10633_s24 }
  0x12   :  { %30 = vsyncpa [#allocation3], 0 }
  0x13   :  { %32 = vsyncpa [#allocation3 + $0x1], 0  ;;  %s8716_s5 = smov 0   ;;  %s8718_s26 = smov 0  }
  0x14   :  { %s8720_s27 = smov 0   ;;  %s8722_s28 = smov 0  }
  0x15 LB: > { %10696 = sst [smem:[#allocation5_spill]] %s8564_s5  ;;  %s8737_s6 = sadd.s32 4294967295, %s8576_s28   ;;  %s8576_s28 = sphi %s8722_s28, %s10754_s28   ;;  %s8572_s27 = sphi %s8720_s27, %s10757_s27   ;;  %s8568_s26 = sphi %s8718_s26, %s10756_s26   ;;  %s8564_s5 = sphi %s8716_s5, %s10755_s5  }
  0x16   : > { %10697 = sst [smem:[#allocation6_spill]] %s8568_s26  ;;  %s7036_s2 = sadd.s32 4294967294, %s8576_s28  }
  0x17   : > { %10698 = sst [smem:[#allocation7_spill]] %s8572_s27  ;;  %s8741_s29 = sadd.s32 1, %s8576_s28  }
  0x18   : > { %10699 = sst [smem:[#allocation8_spill]] %s8576_s28  ;;  %s559_s0 = sadd.s32 1, %s8572_s27 }
  0x19   : > { %10700 = sst [smem:[#allocation9_spill]] %s8737_s6  ;;  %s556_s7 = ssub.s32 %s8576_s28, %s8741_s29 }
  0x1a   : > { %10701 = sst [smem:[#allocation10_spill]] %s8741_s29  ;;  %p569_p0 = scmp.ne.s32.totalorder %s8572_s27, %s8568_s26 }
  0x1b   : > { %p557_p1 = scmp.eq.s32.totalorder %s556_s7, 0  ;;  %p570_p2 = scmp.eq.s32.totalorder %s8737_s6, 1 }
  0x1c   : > { %p575_p3 = scmp.ne.s32.totalorder %s8568_s26, %s8564_s5  ;;  %p576_p4 = scmp.eq.s32.totalorder %s7036_s2, 1 }
  0x1d   : > { %s8752_s30 = scalar_select %p557_p1, %s8572_s27, %s559_s0  }
  0x1e   : > { %p8754_p5 = por %p570_p2, %p569_p0  ;;  %p8758_p6 = por %p576_p4, %p575_p3 }
  0x1f   : > { %10702 = sst [smem:[#allocation11_spill]] %s8752_s30  ;;  %p7039_p7 = scmp.ge.s32.totalorder %s8576_s28, 1 }
  0x20   : > { %s10703_s3 = scalar_select %p8754_p5, 1, 0 }
  0x21   : > { %s10705_s25 = scalar_select %p8758_p6, 1, 0 }
  0x22   : > { %10704 = sst [smem:[#allocation12_spill]] %s10703_s3  ;;  %p668_p8 = scmp.lt.s32.totalorder %s8576_s28, 3 }
  0x23   : > { %10706 = sst [smem:[#allocation13_spill]] %s10705_s25 }
  0x24   : > { %p669_p9 = pnand %p7039_p7, %p668_p8 }
  0x26   : > { %672 = sbr.rel (%p669_p9) target bundleno = 11367 (0x2c67), region = 112 }
  0x2d   : > { %s10707_s1 = sld [smem:[#allocation23_spill]]  ;;  %p738_p10 = scmp.lt.s32.totalorder %s8737_s6, 1  ;;  %vm1280_vm0 = vcmask 520192   ;;  %vm1370_vm1 = vcmask 523264   ;;  %vm8580_vm2 = vmmov 0   ;;  %vm1420_vm3 = vcmask 130048  }
  0x2e   : > { %s10709_s3 = sld [smem:[#allocation21_spill]]  ;;  %s10711_s25 = sld [smem:[#allocation26_spill]]  ;;  %vm1484_vm4 = vcmask 1041408   ;;  %vm1485_vm5 = vcmask 1042432   ;;  %vm1467_vm6 = vcmask 36864   ;;  %vm1480_vm7 = vcmask 39936  }
  0x2f   : > { %s8829_s7 = scalar_select %p738_p10, %s8737_s6, 1  ;;  %vm1875_vm8 = vcmask 261120   ;;  %vm1877_vm9 = vcmask 392192  }
  0x30   : > { %s10712_s27 = sld [smem:[#allocation24_spill]]  ;;  %s10714_s29 = sld [smem:[#allocation25_spill]] }
  0x31   : > { %10708 = sst [smem:[#allocation14_spill]] %s8829_s7  ;;  %s8114_s4 = smul.u32 24, %s8829_s7 }
  0x32   : > { %s10716_s2 = sld [smem:[#allocation27_spill]]  ;;  %s10652_s30 = smov 112  }
  0x33   : > { %v8168_v0 = vld [vmem:[%s10707_s1 + $0x40] sm:$0xff]   ;;  %v8172_v4 = vld [vmem:[%s10707_s1 + $0x48] sm:$0xff]   ;;  %v8176_v8 = vld [vmem:[%s10707_s1 + $0x50] sm:$0xff]   ;;  %s10656_s0 = smov 64   ;;  %s10650_s5 = smov 80  }
  0x34   : > { %v8169_v1 = vld [vmem:[%s10707_s1] sm:$0xff]   ;;  %7568 = vmatprep.subr.bf16.mxu0 %v8168_v0  ;;  %v8173_v5 = vld [vmem:[%s10707_s1 + $0x8] sm:$0xff]   ;;  %v8177_v9 = vld [vmem:[%s10707_s1 + $0x10] sm:$0xff]   ;;  %s8859_s28 = scalar_lea.vmem %s10709_s3, %s8114_s4  ;;  %s10710_s4 = sld [smem:[#allocation22_spill]] }
  0x35   : > { %v8170_v2 = vld [vmem:[%s10707_s1 + $0xc0] sm:$0xff]   ;;  %7569 = vmatpush3.bf16.msra.mxu0 %v8169_v1  ;;  %v8174_v6 = vld [vmem:[%s10707_s1 + $0xc8] sm:$0xff]   ;;  %v8178_v10 = vld [vmem:[%s10707_s1 + $0xd0] sm:$0xff]   ;;  %s10654_s3 = smov 96   ;;  %s10721_s20 = smov 64  }
  0x36   : > { %v8171_v3 = vld [vmem:[%s10707_s1 + $0x80] sm:$0xff]   ;;  %7590 = vmatprep.subr.bf16.mxu1 %v8170_v2  ;;  %7570 = vmatprep.subr.bf16.mxu0 %v8172_v4  ;;  %v8175_v7 = vld [vmem:[%s10707_s1 + $0x88] sm:$0xff]   ;;  %v8179_v11 = vld [vmem:[%s10707_s1 + $0x90] sm:$0xff]   ;;  %s10713_s24 = smov %s10712_s27  ;;  %s10722_s23 = smov 96  }
  0x37   : > { %7591 = vmatpush3.bf16.msra.mxu1 %v8171_v3  ;;  %v8180_v12 = vld [vmem:[%s10707_s1 + $0x58] sm:$0xff]   ;;  %v8184_v16 = vld [vmem:[%s10707_s1 + $0x60] sm:$0xff]   ;;  %v8188_v20 = vld [vmem:[%s10707_s1 + $0x68] sm:$0xff]   ;;  %s10723_s26 = smov 112   ;;  %s10724_s6 = smov 80  }
  0x38   : > { %7592 = vmatprep.subr.bf16.mxu1 %v8174_v6  ;;  %v8181_v13 = vld [vmem:[%s10707_s1 + $0x18] sm:$0xff]   ;;  %v8185_v17 = vld [vmem:[%s10707_s1 + $0x20] sm:$0xff]   ;;  %v8189_v21 = vld [vmem:[%s10707_s1 + $0x28] sm:$0xff]   ;;  %s10733_s21 = sld [smem:[#allocation30_spill]]  ;;  %s10734_s8 = sld [smem:[#allocation31_spill]] }
  0x39   : > { %7571 = vmatpush3.bf16.msra.mxu0 %v8173_v5  ;;  %v8182_v14 = vld [vmem:[%s10707_s1 + $0xd8] sm:$0xff]   ;;  %v8186_v18 = vld [vmem:[%s10707_s1 + $0xe0] sm:$0xff]   ;;  %v8190_v22 = vld [vmem:[%s10707_s1 + $0xe8] sm:$0xff]   ;;  %s10743_s18 = sld [smem:[#allocation14_spill]]  ;;  %s10747_s7 = sld [smem:[#allocation9_spill]] }
  0x3a   : > { %7572 = vmatprep.subr.bf16.mxu0 %v8176_v8  ;;  %v8183_v15 = vld [vmem:[%s10707_s1 + $0x98] sm:$0xff]   ;;  %v8187_v19 = vld [vmem:[%s10707_s1 + $0xa0] sm:$0xff]   ;;  %v8191_v23 = vld [vmem:[%s10707_s1 + $0xa8] sm:$0xff]  }
  0x3b   : > { %7593 = vmatpush3.bf16.msra.mxu1 %v8175_v7  ;;  %v8192_v24 = vld [vmem:[%s10707_s1 + $0x70] sm:$0xff]   ;;  %v8196_v28 = vld [vmem:[%s10707_s1 + $0x78] sm:$0xff]   ;;  %v749_v31 = vld [vmem:[%s8859_s28] sm:$0x77] }
  0x3c   : > { %7594 = vmatprep.subr.bf16.mxu1 %v8178_v10  ;;  %v8193_v25 = vld [vmem:[%s10707_s1 + $0x30] sm:$0xff]   ;;  %v8197_v29 = vld [vmem:[%s10707_s1 + $0x38] sm:$0xff]   ;;  %v7043_v32 = vcombine.low %v749_v31, %v749_v31  ;;  %v7044_v33 = vcombine.high %v749_v31, %v749_v31  ;;  %v8202_v35 = vld [vmem:[%s10707_s1 + $0x140] sm:$0xff]  }
  0x3d   : > { %7573 = vmatpush3.bf16.msra.mxu0 %v8177_v9  ;;  %v8194_v26 = vld [vmem:[%s10707_s1 + $0xf0] sm:$0xff]   ;;  %v8198_v30 = vld [vmem:[%s10707_s1 + $0xf8] sm:$0xff]   ;;  %v750_v36 = vld [vmem:[%s8859_s28 + $0x8] sm:$0x77] }
  0x3e   : > { %7574 = vmatprep.subr.bf16.mxu0 %v8180_v12  ;;  %v8195_v27 = vld [vmem:[%s10707_s1 + $0xb0] sm:$0xff]   ;;  %v8201_v34 = vld [vmem:[%s10707_s1 + $0xb8] sm:$0xff]   ;;  %1190 = vmatprep.mubr.bf16.mxu0 %v7044_v33  ;;  %v7045_v37 = vcombine.low %v750_v36, %v750_v36  ;;  %v7046_v38 = vcombine.high %v750_v36, %v750_v36  ;;  %v8205_v39 = vld [vmem:[%s10707_s1 + $0x100] sm:$0xff]  }
  0x3f   : > { %7595 = vmatpush3.bf16.msra.mxu1 %v8179_v11  ;;  %v8206_v40 = vld [vmem:[%s10707_s1 + $0x148] sm:$0xff]   ;;  %v8208_v42 = vld [vmem:[%s10707_s1 + $0x150] sm:$0xff]   ;;  %v8210_v44 = vld [vmem:[%s10707_s1 + $0x158] sm:$0xff]   ;;  %s7567_s22 = sshll.u32 %s10743_s18, 4 }
  0x40   : > { %7596 = vmatprep.subr.bf16.mxu1 %v8182_v14  ;;  %1230 = vmatprep.mubr.bf16.mxu1 %v7046_v38  ;;  %v8207_v41 = vld [vmem:[%s10707_s1 + $0x108] sm:$0xff]   ;;  %v8209_v43 = vld [vmem:[%s10707_s1 + $0x110] sm:$0xff]   ;;  %v8211_v45 = vld [vmem:[%s10707_s1 + $0x118] sm:$0xff]  }
  0x41   : > { %7575 = vmatpush3.bf16.msra.mxu0 %v8181_v13  ;;  %v8212_v46 = vld [vmem:[%s10707_s1 + $0x160] sm:$0xff]   ;;  %v8214_v48 = vld [vmem:[%s10707_s1 + $0x168] sm:$0xff]   ;;  %v751_v49 = vld [vmem:[%s8859_s28 + $0x10] sm:$0x77]  ;;  %s10658_s28 = smov 48  }
  0x42   : > { %7576 = vmatprep.subr.bf16.mxu0 %v8184_v16  ;;  %v8213_v47 = vld [vmem:[%s10707_s1 + $0x120] sm:$0xff]   ;;  %v7048_v50 = vcombine.high %v751_v49, %v751_v49  ;;  %v8215_v51 = vld [vmem:[%s10707_s1 + $0x128] sm:$0xff]   ;;  %v8216_v52 = vld [vmem:[%s10707_s1 + $0x170] sm:$0xff]   ;;  %v7047_v56 = vcombine.low %v751_v49, %v751_v49 }
  0x43   : > { %7597 = vmatpush3.bf16.msra.mxu1 %v8183_v15  ;;  %v8217_v53 = vld [vmem:[%s10707_s1 + $0x130] sm:$0xff]   ;;  %v8218_v54 = vld [vmem:[%s10707_s1 + $0x178] sm:$0xff]   ;;  %v848_v58 = vld [vmem:[%s10710_s4] sm:$0x1f]  ;;  %s10662_s4 = smov 16  }
  0x44   : > { %7598 = vmatprep.subr.bf16.mxu1 %v8186_v18  ;;  %v8219_v55 = vld [vmem:[%s10707_s1 + $0x138] sm:$0xff]   ;;  %v8224_v18 = vld [vmem:[%s10711_s25 + $0x4] ss:$8 sps:$4 sm:$0xff]   ;;  %v7097_v31 = vld [vmem:[%s10712_s27] ss:$0 sm:$0xff]  ;;  %s10660_s27 = smov 32  }
  0x45   : > { %7577 = vmatpush3.bf16.msra.mxu0 %v8185_v17  ;;  %v7098_v33 = vld [vmem:[%s10714_s29] ss:$0 sm:$0xff] }
  0x46   : > { %7578 = vmatprep.subr.bf16.mxu0 %v8188_v20  ;;  %v8227_v20 = vld [vmem:[%s10711_s25 + $0x14] ss:$8 sps:$4 sm:$0xff]  }
  0x47   : > { %7599 = vmatpush3.bf16.msra.mxu1 %v8187_v19  ;;  %v8222_v19 = vld [vmem:[%s10711_s25] ss:$8 sps:$4 sm:$0xff]  }
  0x48   : > { %7600 = vmatprep.subr.bf16.mxu1 %v8190_v22  ;;  %v8230_v22 = vld [vmem:[%s10711_s25 + $0x24] ss:$8 sps:$4 sm:$0xff]  }
  0x49   : > { %7579 = vmatpush3.bf16.msra.mxu0 %v8189_v21  ;;  %v8225_v21 = vld [vmem:[%s10711_s25 + $0x10] ss:$8 sps:$4 sm:$0xff]  }
  0x4a   : > { %7580 = vmatprep.subr.bf16.mxu0 %v8192_v24  ;;  %v8233_v24 = vld [vmem:[%s10711_s25 + $0x34] ss:$8 sps:$4 sm:$0xff]  }
  0x4b   : > { %7601 = vmatpush3.bf16.msra.mxu1 %v8191_v23  ;;  %v8228_v23 = vld [vmem:[%s10711_s25 + $0x20] ss:$8 sps:$4 sm:$0xff]  }
  0x4c   : > { %7602 = vmatprep.subr.bf16.mxu1 %v8194_v26  ;;  %v8578_v26 = vmov 0  }
  0x4d   : > { %7581 = vmatpush3.bf16.msra.mxu0 %v8193_v25  ;;  %v8231_v25 = vld [vmem:[%s10711_s25 + $0x30] ss:$8 sps:$4 sm:$0xff]   ;;  %8166 = vset.pattern.permute.xlu1 %v8578_v26 }
  0x4e   : > { %7582 = vmatprep.subr.bf16.mxu0 %v8196_v28  ;;  %8167 = vset.pattern.permute.xlu0 %v8578_v26 }
  0x4f   : > { %7603 = vmatpush3.bf16.msra.mxu1 %v8195_v27 }
  0x50   : > { %7604 = vmatprep.subr.bf16.mxu1 %v8198_v30 }
  0x51   : > { %7583 = vmatpush3.bf16.msra.mxu0 %v8197_v29 }
  0x52   : > { %7612 = vmatprep.subr.bf16.mxu0 %v8202_v35 }
  0x53   : > { %7605 = vmatpush3.bf16.msra.mxu1 %v8201_v34 }
  0x54   : > { %1191 = vmatmul.mubr.bf16.vlgmr.msra.gmra.mrb[0].mxu0 %v7043_v32  ;;  %1374 = vmatprep.subr.bf16.mxu1 %v8224_v18 }
  0x55   : > { %7613 = vmatpush3.bf16.msra.mxu0 %v8205_v39  ;;  %1270 = vmatprep.mubr.bf16.mxu0 %v7048_v50  ;;  %v8579_v39 = vmov 0.0  }
  0x56   : > { %1231 = vmatmul.mubr.bf16.vlgmr.msra.gmra.mrb[0].mxu1 %v7045_v37  ;;  %7614 = vmatprep.subr.bf16.mxu0 %v8206_v40  ;;  %v10670_v37 = vlaneseq }
  0x57   : > { %1375 = vmatpush1.bf16.msra.mxu1 %v8222_v19  ;;  %1406 = vmatprep.mubr.bf16.mxu1 %v8578_v26 }
  0x58   : > { %1376 = vmatprep.subr.bf16.mxu1 %v8227_v20  ;;  %v8965_v38 = vshrl.u32 %v10670_v37, 7 }
  0x59   : > { %7615 = vmatpush3.bf16.msra.mxu0 %v8207_v41  ;;  %v1318_v41 = vld [vmem:[%s10716_s2] sm:$0x3] }
  0x5a   : > { %7616 = vmatprep.subr.bf16.mxu0 %v8208_v42  ;;  %10715 = vst [vmem:[#allocation15_spill] sm:$0xff] %v8965_v38  ;;  %v8970_v40 = vsub.s32 0, %v8965_v38  ;;  %v8988_v49 = vsub.s32 1, %v8965_v38 }
  0x5b   : > { %1377 = vmatpush1.bf16.msra.mxu1 %v8225_v21 }
  0x5c   : > { %1378 = vmatprep.subr.bf16.mxu1 %v8230_v22  ;;  %v1323_v42 = vrot.slane %v1318_v41, %v8970_v40  ;;  %v1327_v50 = vrot.slane %v1318_v41, %v8988_v49 }
  0x5d   : > { %7617 = vmatpush3.bf16.msra.mxu0 %v8209_v43 }
  0x5e   : > { %7618 = vmatprep.subr.bf16.mxu0 %v8210_v44 }
  0x5f   : > { %1379 = vmatpush1.bf16.msra.mxu1 %v8228_v23 }
  0x60   : > { %1380 = vmatprep.subr.bf16.mxu1 %v8233_v24 }
  0x61   : > { %7619 = vmatpush3.bf16.msra.mxu0 %v8211_v45 }
  0x62   : > { %7620 = vmatprep.subr.bf16.mxu0 %v8212_v46 }
  0x63   : > { %1381 = vmatpush1.bf16.msra.mxu1 %v8231_v25 }
  0x64   : > { %7826 = vmatprep.subr.bf16.mxu1 %v8579_v39 }
  0x65   : > { %7621 = vmatpush3.bf16.msra.mxu0 %v8213_v47 }
  0x66   : > { %7622 = vmatprep.subr.bf16.mxu0 %v8214_v48 }
  0x69   : > { %7623 = vmatpush3.bf16.msra.mxu0 %v8215_v51 }
  0x6a   : > { %7624 = vmatprep.subr.bf16.mxu0 %v8216_v52 }
  0x6d   : > { %7625 = vmatpush3.bf16.msra.mxu0 %v8217_v53 }
  0x6e   : > { %7626 = vmatprep.subr.bf16.mxu0 %v8218_v54  ;;  %v8588_v54 = vmov 65535  }
  0x71   : > { %7627 = vmatpush3.bf16.msra.mxu0 %v8219_v55  ;;  %v1486_v55 = vsel %vm1484_vm4, 4294967295, %v8588_v54 }
  0x72   : > { %7838 = vmatprep.subr.bf16.mxu0 %v8579_v39 }
  0x74   : > { %1271 = vmatmul.mubr.bf16.vlgmr.msra.gmra.mrb[4].mxu0 %v7047_v56 }
  0x75   : > { %7840 = vmatprep.mubr.msk.bf16.mxu0 %vm8580_vm2, %v8579_v39 }
 0x127   : > { %v7584_v57 = vpop.f32.mrb[0].mxu0 }
 0x128   : > { %v7585_v59 = vpop.f32.mrb[1].mxu0 }
 0x129   : > { %v7586_v60 = vadd.f32 %v7585_v59, %v7584_v57  ;;  %v7587_v61 = vpop.f32.mrb[2].mxu0  ;;  %v7606_v62 = vpop.f32.mrb[0].mxu1  ;;  %v8996_v59 = vsel %vm1485_vm5, %v1486_v55, 0 }
 0x12a   : > { %v7588_v63 = vpop.f32.mrb[3].mxu0  ;;  %v7607_v0 = vpop.f32.mrb[1].mxu1 }
 0x12b   : > { %v1193_v1 = vadd.f32 %v7586_v60, %v848_v58  ;;  %v7608_v2 = vadd.f32 %v7607_v0, %v7606_v62  ;;  %v7609_v3 = vpop.f32.mrb[2].mxu1 }
 0x12c   : > { %v7610_v4 = vpop.f32.mrb[3].mxu1 }
 0x12d   : > { %v1233_v5 = vadd.f32 %v7608_v2, %v1193_v1 }
 0x147   : > { %v7628_v6 = vpop.f32.mrb[4].mxu0 }
 0x148   : > { %v7629_v7 = vpop.f32.mrb[5].mxu0 }
 0x149   : > { %v7630_v8 = vadd.f32 %v7629_v7, %v7628_v6  ;;  %v7631_v9 = vpop.f32.mrb[6].mxu0 }
 0x14a   : > { %v7632_v10 = vpop.f32.mrb[7].mxu0 }
 0x14b   : > { %v8924_v11 = vadd.f32 %v7630_v8, %v1233_v5 }
 0x14d   : > { %v1281_v12 = vsel %vm1280_vm0, %v8924_v11, 0.0 }
 0x14e   : > { %1282 = vadd.xlane.f32.xlu0 %v1281_v12 }
 0x1db   : > { %v1283_v13 = vpop.xlane.xlu0 %1282 }
 0x1dc   : > { %v1285_v14 = vmul.f32 0.015625, %v1283_v13 }
 0x1de   : > { %v1286_v15 = vsub.f32 %v8924_v11, %v1285_v14 }
 0x1e0   : > { %v1287_v16 = vmul.f32 %v1286_v15, %v1286_v15 }
 0x1e2   : > { %v1288_v17 = vsel %vm1280_vm0, %v1287_v16, 0.0 }
 0x1e3   : > { %1289 = vadd.xlane.f32.xlu0 %v1288_v17 }
 0x270   : > { %v1290_v27 = vpop.xlane.xlu0 %1289 }
 0x271   : > { %v1291_v28 = vmul.f32 0.015625, %v1290_v27 }
 0x273   : > { %v1292_v29 = vadd.f32 1e-12, %v1291_v28 }
 0x275   : > { %8414 = vrsqrt.f32 %v1292_v29 }
 0x27f   : > { %v8415_v30 = vpop.eup %8414 }
 0x280   : > { %v1294_v32 = vmul.f32 %v8415_v30, %v1286_v15 }
 0x282   : > { %v1301_v34 = vmul.f32 %v7097_v31, %v1294_v32 }
 0x284   : > { %v1308_v35 = vadd.f32 %v7098_v33, %v1301_v34 }
 0x286   : > { %v1309_v36 = vpack.c.bf16 %v1308_v35, %v1308_v35 }
 0x288   : > { %7107 = vmatmul.mubr.msk.bf16.vlgmr.msra.gmra.mrb[4].mxu1 %vm1370_vm1, %v1309_v36 }
 0x289   : > { %7828 = vmatprep.mubr.msk.bf16.mxu1 %vm8580_vm2, %v8579_v39 }
 0x35b   : > { %v1408_v43 = vpop.f32.mrb[4].mxu1 }
 0x35c   : > { %v1409_v44 = vadd.f32 %v1408_v43, %v1323_v42  ;;  %v1410_v45 = vpop.f32.mrb[5].mxu1 }
 0x35d   : > { %v1412_v46 = vpop.f32.mrb[6].mxu1  ;;  %v1411_v51 = vadd.f32 %v1410_v45, %v1327_v50 }
 0x35e   : > { %v1415_v47 = vpack.c.bf16 %v1409_v44, %v1409_v44  ;;  %v1413_v48 = vpop.f32.mrb[7].mxu1 }
 0x35f   : > { %v8993_v56 = vpack.c.bf16 %v1411_v51, %v1411_v51 }
 0x360   : > { %1531 = vrot.lane.b32.xlu0 %v1415_v47, %s10652_s30  ;;  %1418 = vrot.lane.b32.xlu1 %v1415_v47, %s10656_s0  ;;  %s10719_s0 = smov 48  }
 0x361   : > { %v1489_v61 = vand.u32 %v8996_v59, %v8993_v56 }
 0x364   : > { %1533 = vrot.lane.b32.xlu1 %v1415_v47, %s10658_s28  ;;  %s10745_s28 = sld [smem:[#allocation36_spill]] }
 0x368   : > { %1644 = vrot.lane.b32.xlu1 %v1415_v47, %s10660_s27 }
 0x36c   : > { %1642 = vrot.lane.b32.xlu1 %v1415_v47, %s10654_s3 }
 0x370   : > { %1754 = vrot.lane.b32.xlu1 %v1415_v47, %s10662_s4 }
 0x374   : > { %1752 = vrot.lane.b32.xlu1 %v1415_v47, %s10650_s5 }
 0x3d2   : > { %v1419_v52 = vpop.permute.xlu1 %1418  ;;  %v1532_v62 = vpop.permute.xlu0 %1531 }
 0x3d3   : > { %v1425_v53 = vsel %vm1420_vm3, %v1419_v52, 0 }
 0x3d4   : > { %7827 = vmatpush3.bf16.xpose.msra.mxu1 %v1425_v53 }
 0x3d5   : > { %7832 = vmatprep.subr.bf16.mxu1 %v8579_v39 }
 0x3d6   : > { %v1534_v57 = vpop.permute.xlu1 %1533 }
 0x3d7   : > { %v1539_v58 = vsel %vm1420_vm3, %v1534_v57, 0 }
 0x3d8   : > { %7839 = vmatpush3.bf16.xpose.msra.mxu0 %v1539_v58 }
 0x3d9   : > { %7850 = vmatprep.subr.bf16.mxu0 %v8579_v39 }
 0x3da   : > { %v1645_v60 = vpop.permute.xlu1 %1644 }
 0x3db   : > { %7829 = vmatmul.mubr.msk.bf16.vlgmr.msra.gmra.mrb[8].mxu1 %vm1420_vm3, %v1415_v47  ;;  %v1650_v0 = vsel %vm1420_vm3, %v1645_v60, 0 }
 0x3dc   : > { %7833 = vmatpush3.bf16.msra.mxu1 %v1489_v61  ;;  %7834 = vmatprep.mubr.msk.bf16.mxu1 %vm8580_vm2, %v8579_v39 }
 0x3dd   : > { %7844 = vmatprep.subr.bf16.mxu1 %v8579_v39 }
 0x3de   : > { %v1643_v63 = vpop.permute.xlu1 %1642 }
 0x3df   : > { %7841 = vmatmul.mubr.msk.bf16.vlgmr.msra.gmra.mrb[8].mxu0 %vm1420_vm3, %v1532_v62 }
 0x3e0   : > { %7851 = vmatpush3.bf16.xpose.msra.mxu0 %v1650_v0  ;;  %7852 = vmatprep.mubr.msk.bf16.mxu0 %vm8580_vm2, %v8579_v39 }
 0x3e1   : > { %7862 = vmatprep.subr.bf16.mxu0 %v8579_v39 }
 0x3e2   : > { %v1755_v1 = vpop.permute.xlu1 %1754 }
 0x3e3   : > { %v1760_v2 = vsel %vm1420_vm3, %v1755_v1, 0 }
 0x3e6   : > { %v1753_v3 = vpop.permute.xlu1 %1752 }
 0x3e7   : > { %7853 = vmatmul.mubr.msk.bf16.vlgmr.msra.gmra.mrb[12].mxu0 %vm1420_vm3, %v1643_v63 }
 0x3e8   : > { %7863 = vmatpush3.bf16.xpose.msra.mxu0 %v1760_v2  ;;  %7864 = vmatprep.mubr.msk.bf16.mxu0 %vm8580_vm2, %v8579_v39 }
 0x3e9   : > { %7874 = vmatprep.subr.bf16.mxu0 %v8579_v39 }
 0x3ef   : > { %7865 = vmatmul.mubr.msk.bf16.vlgmr.msra.gmra.mrb[16].mxu0 %vm1420_vm3, %v1753_v3 }
 0x3f0   : > { %7882 = vmatprep.mubr.msk.bf16.mxu0 %vm8580_vm2, %v8579_v39 }
 0x4ae   : > { %v1461_v4 = vpop.f32.mrb[8].mxu1 }
 0x4af   : > { %v7830_v5 = vpop.f32.mrb[9].mxu1  ;;  %v1468_v6 = vsel %vm1467_vm6, %v1461_v4, -inf }
 0x4b0   : > { %1469 = vmax.xlane.f32.xlu1 %v1468_v6  ;;  %v1464_v7 = vpop.f32.mrb[10].mxu1 }
 0x4b1   : > { %v7831_v8 = vpop.f32.mrb[11].mxu1 }
 0x4b2   : > { %v1575_v9 = vpop.f32.mrb[8].mxu0 }
 0x4b3   : > { %v7842_v10 = vpop.f32.mrb[9].mxu0  ;;  %v1581_v12 = vsel %vm1467_vm6, %v1575_v9, -inf }
 0x4b4   : > { %1582 = vmax.xlane.f32.xlu0 %v1581_v12  ;;  %v1578_v13 = vpop.f32.mrb[10].mxu0 }
 0x4b5   : > { %v7843_v14 = vpop.f32.mrb[11].mxu0 }
 0x4ba   : > { %v1686_v15 = vpop.f32.mrb[12].mxu0 }
 0x4bb   : > { %v7854_v16 = vpop.f32.mrb[13].mxu0  ;;  %v1692_v17 = vsel %vm1467_vm6, %v1686_v15, -inf }
 0x4bc   : > { %1693 = vmax.xlane.f32.xlu1 %v1692_v17  ;;  %v1689_v18 = vpop.f32.mrb[14].mxu0 }
 0x4bd   : > { %v7855_v19 = vpop.f32.mrb[15].mxu0 }
 0x4c2   : > { %v1796_v20 = vpop.f32.mrb[16].mxu0 }
 0x4c3   : > { %v7866_v21 = vpop.f32.mrb[17].mxu0  ;;  %v1802_v22 = vsel %vm1467_vm6, %v1796_v20, -inf }
 0x4c4   : > { %1803 = vmax.xlane.f32.xlu0 %v1802_v22  ;;  %v1799_v23 = vpop.f32.mrb[18].mxu0 }
 0x4c5   : > { %v7867_v24 = vpop.f32.mrb[19].mxu0 }
 0x53d   : > { %v1470_v25 = vpop.xlane.xlu1 %1469 }
 0x53e   : > { %v1471_v27 = vsub.f32 %v1461_v4, %v1470_v25 }
 0x540   : > { %v1472_v28 = vmul.f32 1.442695, %v1471_v27 }
 0x541   : > { %v1583_v29 = vpop.xlane.xlu0 %1582 }
 0x542   : > { %8416 = vpow2.f32 %v1472_v28  ;;  %v1584_v30 = vsub.f32 %v1575_v9, %v1583_v29 }
 0x544   : > { %v1585_v31 = vmul.f32 1.442695, %v1584_v30 }
 0x546   : > { %8418 = vpow2.f32 %v1585_v31 }
 0x549   : > { %v1694_v45 = vpop.xlane.xlu1 %1693 }
 0x54a   : > { %v1695_v46 = vsub.f32 %v1686_v15, %v1694_v45 }
 0x54c   : > { %v8417_v32 = vpop.eup %8416  ;;  %v1696_v47 = vmul.f32 1.442695, %v1695_v46 }
 0x54d   : > { %v1474_v33 = vsel %vm1467_vm6, %v8417_v32, 0.0 }
 0x54e   : > { %1475 = vadd.xlane.f32.xlu1 %v1474_v33 }
 0x550   : > { %v8419_v34 = vpop.eup %8418 }
 0x551   : > { %v1804_v35 = vpop.xlane.xlu0 %1803  ;;  %v1587_v36 = vsel %vm1467_vm6, %v8419_v34, 0.0 }
 0x552   : > { %v1805_v41 = vsub.f32 %v1796_v20, %v1804_v35  ;;  %1588 = vadd.xlane.f32.xlu0 %v1587_v36 }
 0x554   : > { %v1806_v42 = vmul.f32 1.442695, %v1805_v41 }
 0x556   : > { %8420 = vpow2.f32 %v1806_v42 }
 0x557   : > { %8422 = vpow2.f32 %v1696_v47 }
 0x55f   : > { %1594 = vrot.lane.b32.xlu1 %v8993_v56, %s10652_s30  ;;  %s10717_s30 = sld [smem:[#allocation28_spill]] }
 0x560   : > { %v8421_v43 = vpop.eup %8420 }
 0x561   : > { %v1808_v44 = vsel %vm1467_vm6, %v8421_v43, 0.0  ;;  %v8423_v48 = vpop.eup %8422 }
 0x562   : > { %1809 = vadd.xlane.f32.xlu0 %v1808_v44  ;;  %v1698_v50 = vsel %vm1467_vm6, %v8423_v48, 0.0 }
 0x565   : > { %v8234_v10 = vld [vmem:[%s10717_s30] sm:$0xff]   ;;  %v8235_v20 = vld [vmem:[%s10717_s30 + $0x8] sm:$0xff]   ;;  %v8236_v21 = vld [vmem:[%s10717_s30 + $0x10] sm:$0xff]  }
 0x566   : > { %7875 = vmatpush3.bf16.msra.mxu0 %v8234_v10  ;;  %v8237_v22 = vld [vmem:[%s10717_s30 + $0x18] sm:$0xff]  }
 0x567   : > { %7876 = vmatprep.subr.bf16.mxu0 %v8579_v39 }
 0x56a   : > { %7877 = vmatpush3.bf16.msra.mxu0 %v8235_v20  ;;  %v8258_v20 = vld [vmem:[%s10622_s13 + $0x60] sm:$0xff]  }
 0x56b   : > { %7878 = vmatprep.subr.bf16.mxu0 %v8579_v39 }
 0x56e   : > { %7879 = vmatpush3.bf16.msra.mxu0 %v8236_v21  ;;  %v8259_v21 = vld [vmem:[%s10622_s13 + $0x20] sm:$0xff]  }
 0x56f   : > { %7880 = vmatprep.subr.bf16.mxu0 %v8579_v39 }
 0x572   : > { %7881 = vmatpush3.bf16.msra.mxu0 %v8237_v22  ;;  %v8260_v22 = vld [vmem:[%s10622_s13 + $0x68] sm:$0xff]  }
 0x578   : > { %1704 = vrot.lane.b32.xlu0 %v8993_v56, %s10654_s3  ;;  %s10720_s3 = sld [smem:[#allocation29_spill]] }
 0x57e   : > { %v7121_v44 = vld [vmem:[%s10720_s3] ss:$0 sm:$0xff] }
 0x583   : > { %1699 = vadd.xlane.f32.xlu1 %v1698_v50 }
 0x594   : > { %1814 = vrot.lane.b32.xlu1 %v8993_v56, %s10650_s5  ;;  %s10725_s5 = smov 16  }
 0x5db   : > { %v1476_v51 = vpop.xlane.xlu1 %1475 }
 0x5dc   : > { %8424 = vrcp.f32 %v1476_v51 }
 0x5df   : > { %v1589_v52 = vpop.xlane.xlu0 %1588  ;;  %v1595_v54 = vpop.permute.xlu1 %1594 }
 0x5e0   : > { %8426 = vrcp.f32 %v1589_v52  ;;  %v1600_v60 = vand.u32 %v1595_v54, %v8996_v59 }
 0x5e6   : > { %v8425_v53 = vpop.eup %8424 }
 0x5e7   : > { %v1478_v55 = vmul.f32 %v8425_v53, %v8417_v32 }
 0x5e9   : > { %v1479_v57 = vpack.c.bf16 %v1478_v55, %v1478_v55 }
 0x5ea   : > { %v8427_v58 = vpop.eup %8426 }
 0x5eb   : > { %7835 = vmatmul.mubr.msk.bf16.vlgmr.msra.gmra.mrb[12].mxu1 %vm1480_vm7, %v1479_v57  ;;  %v1591_v61 = vmul.f32 %v8427_v58, %v8419_v34  ;;  %v8238_v58 = vld [vmem:[%s10620_s11] ss:$8 sps:$4 sm:$0xff]  }
 0x5ec   : > { %7845 = vmatpush3.bf16.msra.mxu1 %v1600_v60  ;;  %7846 = vmatprep.mubr.msk.bf16.mxu1 %vm8580_vm2, %v8579_v39  ;;  %v8243_v60 = vld [vmem:[%s10620_s11 + $0x14] ss:$8 sps:$4 sm:$0xff]  }
 0x5ed   : > { %7856 = vmatprep.subr.bf16.mxu1 %v8579_v39  ;;  %v1592_v62 = vpack.c.bf16 %v1591_v61, %v1591_v61  ;;  %v8241_v61 = vld [vmem:[%s10620_s11 + $0x10] ss:$8 sps:$4 sm:$0xff]  }
 0x5ef   : > { %v1810_v56 = vpop.xlane.xlu0 %1809 }
 0x5f3   : > { %v1705_v63 = vpop.permute.xlu0 %1704  ;;  %7847 = vmatmul.mubr.msk.bf16.vlgmr.msra.gmra.mrb[16].mxu1 %vm1480_vm7, %v1592_v62  ;;  %v8244_v62 = vld [vmem:[%s10620_s11 + $0x20] ss:$8 sps:$4 sm:$0xff]  }
 0x5f4   : > { %v1710_v0 = vand.u32 %v1705_v63, %v8996_v59  ;;  %7858 = vmatprep.mubr.msk.bf16.mxu1 %vm8580_vm2, %v8579_v39  ;;  %v8249_v63 = vld [vmem:[%s10620_s11 + $0x34] ss:$8 sps:$4 sm:$0xff]  }
 0x5f6   : > { %7857 = vmatpush3.bf16.msra.mxu1 %v1710_v0  ;;  %v8247_v0 = vld [vmem:[%s10620_s11 + $0x30] ss:$8 sps:$4 sm:$0xff]  }
 0x5f7   : > { %7868 = vmatprep.subr.bf16.mxu1 %v8579_v39 }
 0x610   : > { %v1700_v1 = vpop.xlane.xlu1 %1699 }
 0x611   : > { %8428 = vrcp.f32 %v1700_v1 }
 0x612   : > { %8430 = vrcp.f32 %v1810_v56  ;;  %v8246_v56 = vld [vmem:[%s10620_s11 + $0x24] ss:$8 sps:$4 sm:$0xff]  }
 0x614   : > { %v1815_v3 = vpop.permute.xlu1 %1814 }
 0x615   : > { %v1820_v7 = vand.u32 %v1815_v3, %v8996_v59 }
 0x61b   : > { %v8429_v2 = vpop.eup %8428 }
 0x61c   : > { %v1702_v4 = vmul.f32 %v8429_v2, %v8423_v48  ;;  %v8431_v6 = vpop.eup %8430 }
 0x61d   : > { %v1812_v8 = vmul.f32 %v8431_v6, %v8421_v43 }
 0x61e   : > { %v1703_v5 = vpack.c.bf16 %v1702_v4, %v1702_v4 }
 0x61f   : > { %v1813_v9 = vpack.c.bf16 %v1812_v8, %v1812_v8 }
 0x620   : > { %7859 = vmatmul.mubr.msk.bf16.vlgmr.msra.gmra.mrb[20].mxu1 %vm1480_vm7, %v1703_v5  ;;  %v7122_v5 = vld [vmem:[%s10618_s9] ss:$0 sm:$0xff] }
 0x621   : > { %7869 = vmatpush3.bf16.msra.mxu1 %v1820_v7  ;;  %7870 = vmatprep.mubr.msk.bf16.mxu1 %vm8580_vm2, %v8579_v39  ;;  %v7123_v7 = vld [vmem:[%s10619_s10] ss:$0 sm:$0xff] }
 0x628   : > { %7871 = vmatmul.mubr.msk.bf16.vlgmr.msra.gmra.mrb[24].mxu1 %vm1480_vm7, %v1813_v9 }
 0x629   : > { %2089 = vmatprep.mubr.bf16.mxu1 %v8578_v26 }
 0x6be   : > { %v1525_v12 = vpop.f32.mrb[12].mxu1 }
 0x6bf   : > { %v7836_v13 = vpop.f32.mrb[13].mxu1 }
 0x6c0   : > { %v1528_v14 = vpop.f32.mrb[14].mxu1  ;;  %v8251_v13 = vld [vmem:[%s10622_s13] sm:$0xff]  }
 0x6c1   : > { %v7837_v15 = vpop.f32.mrb[15].mxu1  ;;  %v8252_v14 = vld [vmem:[%s10622_s13 + $0x48] sm:$0xff]  }
 0x6c2   : > { %v8253_v15 = vld [vmem:[%s10622_s13 + $0x8] sm:$0xff]  }
 0x6c6   : > { %v1636_v16 = vpop.f32.mrb[16].mxu1 }
 0x6c7   : > { %1863 = vrot.lane.b32.xlu1 %v1636_v16, %s10662_s4  ;;  %v7848_v17 = vpop.f32.mrb[17].mxu1  ;;  %s10718_s4 = smov 32   ;;  %v8254_v16 = vld [vmem:[%s10622_s13 + $0x50] sm:$0xff]  }
 0x6c8   : > { %v1639_v18 = vpop.f32.mrb[18].mxu1  ;;  %v8255_v17 = vld [vmem:[%s10622_s13 + $0x10] sm:$0xff]  }
 0x6c9   : > { %v7849_v19 = vpop.f32.mrb[19].mxu1  ;;  %v8256_v18 = vld [vmem:[%s10622_s13 + $0x58] sm:$0xff]  }
 0x6ca   : > { %v8257_v19 = vld [vmem:[%s10622_s13 + $0x18] sm:$0xff]  }
 0x6f3   : > { %v1746_v23 = vpop.f32.mrb[20].mxu1 }
 0x6f4   : > { %1867 = vrot.lane.b32.xlu0 %v1746_v23, %s10718_s4  ;;  %v7860_v24 = vpop.f32.mrb[21].mxu1  ;;  %v8261_v23 = vld [vmem:[%s10622_s13 + $0x28] sm:$0xff]  }
 0x6f5   : > { %v1749_v25 = vpop.f32.mrb[22].mxu1  ;;  %v8262_v24 = vld [vmem:[%s10622_s13 + $0x70] sm:$0xff]  }
 0x6f6   : > { %v7861_v27 = vpop.f32.mrb[23].mxu1  ;;  %v8263_v25 = vld [vmem:[%s10622_s13 + $0x30] sm:$0xff]  }
 0x6f7   : > { %v8264_v27 = vld [vmem:[%s10622_s13 + $0x78] sm:$0xff]  }
 0x6fb   : > { %v1856_v28 = vpop.f32.mrb[24].mxu1 }
 0x6fc   : > { %1871 = vrot.lane.b32.xlu1 %v1856_v28, %s10719_s0  ;;  %v7872_v29 = vpop.f32.mrb[25].mxu1  ;;  %v8265_v28 = vld [vmem:[%s10622_s13 + $0x38] sm:$0xff]  }
 0x6fd   : > { %v1859_v30 = vpop.f32.mrb[26].mxu1  ;;  %v8266_v29 = vld [vmem:[%s10624_s15] sm:$0xff]  }
 0x6fe   : > { %v7873_v31 = vpop.f32.mrb[27].mxu1  ;;  %v8267_v30 = vld [vmem:[%s10624_s15 + $0x8] sm:$0xff]  }
 0x6ff   : > { %v2002_v31 = vld [vmem:[%s10621_s12] sm:$0x3] }
 0x739   : > { %v1864_v32 = vpop.permute.xlu1 %1863 }
 0x73a   : > { %v1874_v34 = vsel %vm1420_vm3, %v1525_v12, %v1864_v32  ;;  %v8250_v12 = vld [vmem:[%s10622_s13 + $0x40] sm:$0xff]   ;;  %v2007_v32 = vrot.slane %v2002_v31, %v8970_v40 }
 0x73b   : > { %7655 = vmatprep.subr.bf16.mxu0 %v8250_v12 }
 0x766   : > { %v1868_v33 = vpop.permute.xlu0 %1867 }
 0x767   : > { %v1876_v35 = vsel %vm1875_vm8, %v1874_v34, %v1868_v33  ;;  %v2011_v33 = vrot.slane %v2002_v31, %v8988_v49 }
 0x76e   : > { %v1872_v36 = vpop.permute.xlu1 %1871 }
 0x76f   : > { %v1878_v41 = vsel %vm1877_vm9, %v1876_v35, %v1872_v36 }
 0x770   : > { %v1879_v42 = vpack.c.bf16 %v1878_v41, %v1878_v41 }
 0x772   : > { %7883 = vmatmul.mubr.msk.bf16.vlgmr.msra.gmra.mrb[20].mxu0 %vm1370_vm1, %v1879_v42 }
 0x773   : > { %7656 = vmatpush3.bf16.msra.mxu0 %v8251_v13 }
 0x774   : > { %7657 = vmatprep.subr.bf16.mxu0 %v8252_v14 }
 0x777   : > { %7658 = vmatpush3.bf16.msra.mxu0 %v8253_v15 }
 0x778   : > { %7659 = vmatprep.subr.bf16.mxu0 %v8254_v16 }
 0x77b   : > { %7660 = vmatpush3.bf16.msra.mxu0 %v8255_v17 }
 0x77c   : > { %7661 = vmatprep.subr.bf16.mxu0 %v8256_v18 }
 0x77f   : > { %7662 = vmatpush3.bf16.msra.mxu0 %v8257_v19  ;;  %v8272_v19 = vld [vmem:[%s10711_s25 + $0x44] ss:$8 sps:$4 sm:$0xff]  }
 0x780   : > { %7663 = vmatprep.subr.bf16.mxu0 %v8258_v20  ;;  %v8270_v20 = vld [vmem:[%s10711_s25 + $0x40] ss:$8 sps:$4 sm:$0xff]  }
 0x783   : > { %7664 = vmatpush3.bf16.msra.mxu0 %v8259_v21  ;;  %v8275_v21 = vld [vmem:[%s10711_s25 + $0x54] ss:$8 sps:$4 sm:$0xff]  }
 0x784   : > { %7665 = vmatprep.subr.bf16.mxu0 %v8260_v22  ;;  %v8273_v22 = vld [vmem:[%s10711_s25 + $0x50] ss:$8 sps:$4 sm:$0xff]  }
 0x787   : > { %7666 = vmatpush3.bf16.msra.mxu0 %v8261_v23  ;;  %v8278_v23 = vld [vmem:[%s10711_s25 + $0x64] ss:$8 sps:$4 sm:$0xff]  }
 0x788   : > { %7667 = vmatprep.subr.bf16.mxu0 %v8262_v24  ;;  %v8276_v24 = vld [vmem:[%s10711_s25 + $0x60] ss:$8 sps:$4 sm:$0xff]  }
 0x78b   : > { %7668 = vmatpush3.bf16.msra.mxu0 %v8263_v25  ;;  %v8281_v25 = vld [vmem:[%s10711_s25 + $0x74] ss:$8 sps:$4 sm:$0xff]  }
 0x78c   : > { %7669 = vmatprep.subr.bf16.mxu0 %v8264_v27  ;;  %v8279_v27 = vld [vmem:[%s10711_s25 + $0x70] ss:$8 sps:$4 sm:$0xff]  }
 0x78f   : > { %7670 = vmatpush3.bf16.msra.mxu0 %v8265_v28 }
 0x790   : > { %7898 = vmatprep.subr.bf16.mxu0 %v8579_v39 }
 0x845   : > { %v1949_v43 = vpop.f32.mrb[20].mxu0 }
 0x846   : > { %v1955_v45 = vadd.f32 %v1949_v43, %v8924_v11  ;;  %v7884_v46 = vpop.f32.mrb[21].mxu0  ;;  %v8240_v11 = vld [vmem:[%s10620_s11 + $0x4] ss:$8 sps:$4 sm:$0xff]  }
 0x847   : > { %v1952_v47 = vpop.f32.mrb[22].mxu0  ;;  %2057 = vmatprep.subr.bf16.mxu1 %v8240_v11 }
 0x848   : > { %v9074_v48 = vadd.f32 %v7121_v44, %v1955_v45  ;;  %v7885_v50 = vpop.f32.mrb[23].mxu0  ;;  %2058 = vmatpush1.bf16.msra.mxu1 %v8238_v58 }
 0x849   : > { %2059 = vmatprep.subr.bf16.mxu1 %v8243_v60 }
 0x84a   : > { %v1966_v51 = vsel %vm1280_vm0, %v9074_v48, 0.0 }
 0x84b   : > { %1967 = vadd.xlane.f32.xlu0 %v1966_v51 }
 0x84c   : > { %2060 = vmatpush1.bf16.msra.mxu1 %v8241_v61 }
 0x84d   : > { %2061 = vmatprep.subr.bf16.mxu1 %v8246_v56 }
 0x850   : > { %2062 = vmatpush1.bf16.msra.mxu1 %v8244_v62 }
 0x851   : > { %2063 = vmatprep.subr.bf16.mxu1 %v8249_v63 }
 0x854   : > { %2064 = vmatpush1.bf16.msra.mxu1 %v8247_v0 }
 0x855   : > { %7886 = vmatprep.subr.bf16.mxu1 %v8579_v39 }
 0x8d8   : > { %v1968_v52 = vpop.xlane.xlu0 %1967 }
 0x8d9   : > { %v1969_v53 = vmul.f32 0.015625, %v1968_v52 }
 0x8db   : > { %v1970_v54 = vsub.f32 %v9074_v48, %v1969_v53 }
 0x8dd   : > { %v1971_v55 = vmul.f32 %v1970_v54, %v1970_v54 }
 0x8df   : > { %v1972_v57 = vsel %vm1280_vm0, %v1971_v55, 0.0 }
 0x8e0   : > { %1973 = vadd.xlane.f32.xlu1 %v1972_v57 }
 0x96d   : > { %v1974_v1 = vpop.xlane.xlu1 %1973 }
 0x96e   : > { %v1975_v2 = vmul.f32 0.015625, %v1974_v1 }
 0x970   : > { %v1976_v3 = vadd.f32 1e-12, %v1975_v2  ;;  %v8268_v2 = vld [vmem:[%s10624_s15 + $0x10] sm:$0xff]  }
 0x972   : > { %8432 = vrsqrt.f32 %v1976_v3  ;;  %v8269_v3 = vld [vmem:[%s10624_s15 + $0x18] sm:$0xff]  }
 0x97c   : > { %v8433_v4 = vpop.eup %8432 }
 0x97d   : > { %v1978_v6 = vmul.f32 %v8433_v4, %v1970_v54 }
 0x97f   : > { %v1985_v8 = vmul.f32 %v7122_v5, %v1978_v6 }
 0x981   : > { %v1992_v9 = vadd.f32 %v7123_v7, %v1985_v8  ;;  %v7149_v8 = vld [vmem:[%s10623_s14] ss:$0 sm:$0xff] }
 0x983   : > { %v1993_v10 = vpack.c.bf16 %v1992_v9, %v1992_v9 }
 0x985   : > { %7132 = vmatmul.mubr.msk.bf16.vlgmr.msra.gmra.mrb[28].mxu1 %vm1370_vm1, %v1993_v10 }
 0x986   : > { %7894 = vmatprep.mubr.msk.bf16.mxu1 %vm8580_vm2, %v8579_v39  ;;  %7887 = vmatpush3.bf16.msra.mxu1 %v8266_v29 }
 0x987   : > { %7888 = vmatprep.subr.bf16.mxu1 %v8579_v39 }
 0x98a   : > { %7889 = vmatpush3.bf16.msra.mxu1 %v8267_v30 }
 0x98b   : > { %7890 = vmatprep.subr.bf16.mxu1 %v8579_v39 }
 0x98e   : > { %7891 = vmatpush3.bf16.msra.mxu1 %v8268_v2 }
 0x98f   : > { %7892 = vmatprep.subr.bf16.mxu1 %v8579_v39 }
 0x992   : > { %7893 = vmatpush3.bf16.msra.mxu1 %v8269_v3 }
 0x993   : > { %3105 = vmatprep.subr.bf16.mxu1 %v8272_v19 }
 0xa58   : > { %v2091_v34 = vpop.f32.mrb[28].mxu1 }
 0xa59   : > { %v2092_v35 = vadd.f32 %v2091_v34, %v2007_v32  ;;  %v2093_v36 = vpop.f32.mrb[29].mxu1 }
 0xa5a   : > { %v2094_v41 = vadd.f32 %v2093_v36, %v2011_v33  ;;  %v2095_v42 = vpop.f32.mrb[30].mxu1  ;;  %v7178_v36 = vld [vmem:[%s10713_s24 + $0x1] ss:$0 sm:$0xff] }
 0xa5b   : > { %v2098_v43 = vmul.f32 %v2092_v35, %v2092_v35  ;;  %v2096_v44 = vpop.f32.mrb[31].mxu1  ;;  %v7179_v42 = vld [vmem:[%s10714_s29 + $0x1] ss:$0 sm:$0xff] }
 0xa5c   : > { %v2099_v45 = vmul.f32 %v2094_v41, %v2094_v41 }
 0xa5d   : > { %v2100_v46 = vmul.f32 %v2098_v43, %v2092_v35 }
 0xa5e   : > { %v2101_v47 = vmul.f32 %v2099_v45, %v2094_v41 }
 0xa5f   : > { %v2102_v50 = vmul.f32 0.044715, %v2100_v46  ;;  %v7188_v46 = vld [vmem:[%s10716_s2 + $0x2] sm:$0x3] }
 0xa60   : > { %v2103_v51 = vmul.f32 0.044715, %v2101_v47  ;;  %v3055_v47 = vrot.slane %v7188_v46, %v8970_v40 }
 0xa61   : > { %v2104_v52 = vadd.f32 %v2102_v50, %v2092_v35  ;;  %v3059_v50 = vrot.slane %v7188_v46, %v8988_v49 }
 0xa62   : > { %v2105_v53 = vadd.f32 %v2103_v51, %v2094_v41 }
 0xa63   : > { %v2106_v54 = vmul.f32 0.7978846, %v2104_v52 }
 0xa64   : > { %v2107_v55 = vmul.f32 0.7978846, %v2105_v53 }
 0xa65   : > { %8434 = vtanh.f32 %v2106_v54 }
 0xa66   : > { %8436 = vtanh.f32 %v2107_v55 }
 0xa6f   : > { %v8435_v57 = vpop.eup %8434 }
 0xa70   : > { %v8437_v11 = vpop.eup %8436  ;;  %v2110_v58 = vadd.f32 1.0, %v8435_v57 }
 0xa71   : > { %v2111_v60 = vadd.f32 1.0, %v8437_v11 }
 0xa72   : > { %v2112_v61 = vmul.f32 0.5, %v2110_v58 }
 0xa73   : > { %v2113_v56 = vmul.f32 0.5, %v2111_v60 }
 0xa74   : > { %v2114_v62 = vmul.f32 %v2112_v61, %v2092_v35 }
 0xa75   : > { %v2115_v63 = vmul.f32 %v2113_v56, %v2094_v41 }
 0xa76   : > { %v2116_v1 = vpack.c.bf16 %v2114_v62, %v2114_v62 }
 0xa77   : > { %v2117_v0 = vpack.c.bf16 %v2115_v63, %v2115_v63 }
 0xa79   : > { %2278 = vmatprep.mubr.bf16.mxu0 %v2117_v0 }
 0xa7a   : > { %2279 = vmatmul.mubr.bf16.vlgmr.msra.gmra.mrb[24].mxu0 %v2116_v1 }
 0xa7b   : > { %7900 = vmatprep.mubr.msk.bf16.mxu0 %vm8580_vm2, %v8579_v39 }
 0xb4d   : > { %v7671_v4 = vpop.f32.mrb[24].mxu0 }
 0xb4e   : > { %v7672_v5 = vpop.f32.mrb[25].mxu0 }
 0xb4f   : > { %v7673_v6 = vadd.f32 %v7672_v5, %v7671_v4  ;;  %v7674_v7 = vpop.f32.mrb[26].mxu0 }
 0xb50   : > { %v7675_v9 = vpop.f32.mrb[27].mxu0 }
 0xb51   : > { %v2286_v10 = vadd.f32 %v7673_v6, %v9074_v48 }
 0xb53   : > { %v9189_v12 = vadd.f32 %v7149_v8, %v2286_v10 }
 0xb55   : > { %v3012_v13 = vsel %vm1280_vm0, %v9189_v12, 0.0  ;;  %v2295_v14 = vpack.c.bf16 %v9189_v12, %v9189_v12 }
 0xb56   : > { %3013 = vadd.xlane.f32.xlu0 %v3012_v13 }
 0xb57   : > { %7895 = vmatmul.mubr.msk.bf16.vlgmr.msra.gmra.mrb[32].mxu1 %vm1370_vm1, %v2295_v14 }
 0xb58   : > { %3137 = vmatprep.mubr.bf16.mxu1 %v8578_v26  ;;  %3106 = vmatpush1.bf16.msra.mxu1 %v8270_v20 }
 0xb59   : > { %3107 = vmatprep.subr.bf16.mxu1 %v8275_v21 }
 0xb5c   : > { %3108 = vmatpush1.bf16.msra.mxu1 %v8273_v22 }
 0xb5d   : > { %3109 = vmatprep.subr.bf16.mxu1 %v8278_v23 }
 0xb60   : > { %3110 = vmatpush1.bf16.msra.mxu1 %v8276_v24 }
 0xb61   : > { %3111 = vmatprep.subr.bf16.mxu1 %v8281_v25 }
 0xb64   : > { %3112 = vmatpush1.bf16.msra.mxu1 %v8279_v27 }
 0xb65   : > { %7904 = vmatprep.subr.bf16.mxu1 %v8579_v39 }
 0xbe3   : > { %v3014_v15 = vpop.xlane.xlu0 %3013 }
 0xbe4   : > { %v3015_v16 = vmul.f32 0.015625, %v3014_v15 }
 0xbe6   : > { %v3016_v17 = vsub.f32 %v9189_v12, %v3015_v16 }
 0xbe8   : > { %v3017_v18 = vmul.f32 %v3016_v17, %v3016_v17 }
 0xbea   : > { %v3018_v48 = vsel %vm1280_vm0, %v3017_v18, 0.0 }
 0xbeb   : > { %3019 = vadd.xlane.f32.xlu0 %v3018_v48 }
 0xc2a   : > { %v9224_v28 = vpop.f32.mrb[32].mxu1 }
 0xc2b   : > { %v7896_v29 = vpop.f32.mrb[33].mxu1 }
 0xc2c   : > { %v2375_v30 = vpop.f32.mrb[34].mxu1 }
 0xc2d   : > { %v7897_v31 = vpop.f32.mrb[35].mxu1 }
 0xc78   : > { %v3020_v32 = vpop.xlane.xlu0 %3019 }
 0xc79   : > { %v3021_v33 = vmul.f32 0.015625, %v3020_v32 }
 0xc7b   : > { %v3022_v34 = vadd.f32 1e-12, %v3021_v33 }
 0xc7d   : > { %8438 = vrsqrt.f32 %v3022_v34 }
 0xc87   : > { %v8439_v35 = vpop.eup %8438 }
 0xc88   : > { %v3024_v41 = vmul.f32 %v8439_v35, %v3016_v17 }
 0xc8a   : > { %v3031_v43 = vmul.f32 %v7178_v36, %v3024_v41 }
 0xc8c   : > { %v3038_v44 = vadd.f32 %v7179_v42, %v3031_v43 }
 0xc8e   : > { %v3039_v45 = vpack.c.bf16 %v3038_v44, %v3038_v44 }
 0xc90   : > { %7197 = vmatmul.mubr.msk.bf16.vlgmr.msra.gmra.mrb[36].mxu1 %vm1370_vm1, %v3039_v45 }
 0xc91   : > { %7906 = vmatprep.mubr.msk.bf16.mxu1 %vm8580_vm2, %v8579_v39 }
 0xd63   : > { %v3139_v51 = vpop.f32.mrb[36].mxu1 }
 0xd64   : > { %v3140_v52 = vadd.f32 %v3139_v51, %v3055_v47  ;;  %v3141_v53 = vpop.f32.mrb[37].mxu1 }
 0xd65   : > { %v3142_v54 = vadd.f32 %v3141_v53, %v3059_v50  ;;  %v3143_v55 = vpop.f32.mrb[38].mxu1 }
 0xd66   : > { %v3146_v57 = vpack.c.bf16 %v3140_v52, %v3140_v52  ;;  %v3144_v11 = vpop.f32.mrb[39].mxu1 }
 0xd67   : > { %v9240_v58 = vpack.c.bf16 %v3142_v54, %v3142_v54 }
 0xd68   : > { %3257 = vrot.lane.b32.xlu0 %v3146_v57, %s10719_s0  ;;  %3149 = vrot.lane.b32.xlu1 %v3146_v57, %s10721_s20 }
 0xd69   : > { %v3213_v60 = vand.u32 %v9240_v58, %v8996_v59 }
 0xd6b   : > { %7905 = vmatpush3.bf16.msra.mxu1 %v3213_v60 }
 0xd6c   : > { %3366 = vrot.lane.b32.xlu0 %v3146_v57, %s10722_s23  ;;  %3255 = vrot.lane.b32.xlu1 %v3146_v57, %s10723_s26 }
 0xd6d   : > { %7916 = vmatprep.subr.bf16.mxu1 %v8579_v39 }
 0xd70   : > { %3476 = vrot.lane.b32.xlu0 %v3146_v57, %s10724_s6  ;;  %3368 = vrot.lane.b32.xlu1 %v3146_v57, %s10718_s4 }
 0xd74   : > { %3478 = vrot.lane.b32.xlu1 %v3146_v57, %s10725_s5 }
 0xdda   : > { %v3150_v61 = vpop.permute.xlu1 %3149  ;;  %v3258_v62 = vpop.permute.xlu0 %3257 }
 0xddb   : > { %v3155_v56 = vsel %vm1420_vm3, %v3150_v61, 0  ;;  %v3263_v0 = vsel %vm1420_vm3, %v3258_v62, 0 }
 0xddc   : > { %7899 = vmatpush3.bf16.xpose.msra.mxu0 %v3155_v56 }
 0xddd   : > { %7910 = vmatprep.subr.bf16.mxu0 %v8579_v39 }
 0xdde   : > { %v3256_v63 = vpop.permute.xlu1 %3255  ;;  %v3367_v4 = vpop.permute.xlu0 %3366 }
 0xde2   : > { %v3369_v1 = vpop.permute.xlu1 %3368  ;;  %v3477_v6 = vpop.permute.xlu0 %3476 }
 0xde3   : > { %7901 = vmatmul.mubr.msk.bf16.vlgmr.msra.gmra.mrb[28].mxu0 %vm1420_vm3, %v3146_v57  ;;  %v3374_v2 = vsel %vm1420_vm3, %v3369_v1, 0 }
 0xde4   : > { %7911 = vmatpush3.bf16.xpose.msra.mxu0 %v3263_v0  ;;  %7912 = vmatprep.mubr.msk.bf16.mxu0 %vm8580_vm2, %v8579_v39 }
 0xde5   : > { %7922 = vmatprep.subr.bf16.mxu0 %v8579_v39 }
 0xde6   : > { %v3479_v3 = vpop.permute.xlu1 %3478 }
 0xde7   : > { %v3484_v5 = vsel %vm1420_vm3, %v3479_v3, 0 }
 0xdeb   : > { %7913 = vmatmul.mubr.msk.bf16.vlgmr.msra.gmra.mrb[32].mxu0 %vm1420_vm3, %v3256_v63 }
 0xdec   : > { %7923 = vmatpush3.bf16.xpose.msra.mxu0 %v3374_v2  ;;  %7924 = vmatprep.mubr.msk.bf16.mxu0 %vm8580_vm2, %v8579_v39 }
 0xded   : > { %7934 = vmatprep.subr.bf16.mxu0 %v8579_v39 }
 0xdf3   : > { %7925 = vmatmul.mubr.msk.bf16.vlgmr.msra.gmra.mrb[36].mxu0 %vm1420_vm3, %v3367_v4 }
 0xdf4   : > { %7935 = vmatpush3.bf16.xpose.msra.mxu0 %v3484_v5  ;;  %7936 = vmatprep.mubr.msk.bf16.mxu0 %vm8580_vm2, %v8579_v39 }
 0xdf5   : > { %7946 = vmatprep.subr.bf16.mxu0 %v8579_v39 }
 0xdfb   : > { %7937 = vmatmul.mubr.msk.bf16.vlgmr.msra.gmra.mrb[40].mxu0 %vm1420_vm3, %v3477_v6 }
 0xdfc   : > { %7954 = vmatprep.mubr.msk.bf16.mxu0 %vm8580_vm2, %v8579_v39 }
 0xeb6   : > { %v3191_v7 = vpop.f32.mrb[28].mxu0 }
 0xeb7   : > { %v7902_v8 = vpop.f32.mrb[29].mxu0  ;;  %v3197_v9 = vsel %vm1467_vm6, %v3191_v7, -inf }
 0xeb8   : > { %3198 = vmax.xlane.f32.xlu1 %v3197_v9  ;;  %v3194_v10 = vpop.f32.mrb[30].mxu0 }
 0xeb9   : > { %v7903_v13 = vpop.f32.mrb[31].mxu0 }
 0xebe   : > { %v3299_v14 = vpop.f32.mrb[32].mxu0 }
 0xebf   : > { %v7914_v15 = vpop.f32.mrb[33].mxu0  ;;  %v3305_v16 = vsel %vm1467_vm6, %v3299_v14, -inf }
 0xec0   : > { %3306 = vmax.xlane.f32.xlu0 %v3305_v16  ;;  %v3302_v17 = vpop.f32.mrb[34].mxu0 }
 0xec1   : > { %v7915_v18 = vpop.f32.mrb[35].mxu0 }
 0xec6   : > { %v3410_v48 = vpop.f32.mrb[36].mxu0 }
 0xec7   : > { %v7926_v19 = vpop.f32.mrb[37].mxu0  ;;  %v3416_v20 = vsel %vm1467_vm6, %v3410_v48, -inf }
 0xec8   : > { %3417 = vmax.xlane.f32.xlu0 %v3416_v20  ;;  %v3413_v21 = vpop.f32.mrb[38].mxu0  ;;  %v8282_v19 = vld [vmem:[%s10717_s30 + $0x20] sm:$0xff]   ;;  %v8283_v20 = vld [vmem:[%s10717_s30 + $0x28] sm:$0xff]  }
 0xec9   : > { %v7927_v22 = vpop.f32.mrb[39].mxu0  ;;  %7947 = vmatpush3.bf16.msra.mxu0 %v8282_v19  ;;  %v8300_v19 = vld [vmem:[%s10622_s13 + $0xc8] sm:$0xff]  }
 0xeca   : > { %7948 = vmatprep.subr.bf16.mxu0 %v8579_v39 }
 0xecd   : > { %7949 = vmatpush3.bf16.msra.mxu0 %v8283_v20  ;;  %v8301_v20 = vld [vmem:[%s10622_s13 + $0x88] sm:$0xff]  }
 0xece   : > { %v3520_v23 = vpop.f32.mrb[40].mxu0  ;;  %7950 = vmatprep.subr.bf16.mxu0 %v8579_v39 }
 0xecf   : > { %v7938_v24 = vpop.f32.mrb[41].mxu0  ;;  %v3526_v25 = vsel %vm1467_vm6, %v3520_v23, -inf }
 0xed0   : > { %3527 = vmax.xlane.f32.xlu1 %v3526_v25  ;;  %v3523_v27 = vpop.f32.mrb[42].mxu0  ;;  %v8284_v24 = vld [vmem:[%s10717_s30 + $0x30] sm:$0xff]  }
 0xed1   : > { %v7939_v29 = vpop.f32.mrb[43].mxu0  ;;  %7951 = vmatpush3.bf16.msra.mxu0 %v8284_v24  ;;  %v8305_v24 = vld [vmem:[%s10622_s13 + $0x98] sm:$0xff]  }
 0xed2   : > { %7952 = vmatprep.subr.bf16.mxu0 %v8579_v39 }
 0xf45   : > { %v3199_v30 = vpop.xlane.xlu1 %3198 }
 0xf46   : > { %v3200_v31 = vsub.f32 %v3191_v7, %v3199_v30 }
 0xf48   : > { %v3201_v32 = vmul.f32 1.442695, %v3200_v31 }
 0xf4a   : > { %8440 = vpow2.f32 %v3201_v32  ;;  %v8285_v32 = vld [vmem:[%s10717_s30 + $0x38] sm:$0xff]  }
 0xf4b   : > { %7953 = vmatpush3.bf16.msra.mxu0 %v8285_v32  ;;  %v8311_v32 = vld [vmem:[%s10622_s13 + $0xb0] sm:$0xff]  }
 0xf4d   : > { %v3307_v33 = vpop.xlane.xlu0 %3306 }
 0xf4e   : > { %v3308_v34 = vsub.f32 %v3299_v14, %v3307_v33 }
 0xf50   : > { %v3309_v35 = vmul.f32 1.442695, %v3308_v34 }
 0xf52   : > { %8442 = vpow2.f32 %v3309_v35 }
 0xf54   : > { %v8441_v36 = vpop.eup %8440 }
 0xf55   : > { %v3418_v41 = vpop.xlane.xlu0 %3417  ;;  %v3203_v42 = vsel %vm1467_vm6, %v8441_v36, 0.0 }
 0xf56   : > { %v3419_v43 = vsub.f32 %v3410_v48, %v3418_v41  ;;  %3204 = vadd.xlane.f32.xlu0 %v3203_v42 }
 0xf58   : > { %v3420_v44 = vmul.f32 1.442695, %v3419_v43 }
 0xf5a   : > { %8444 = vpow2.f32 %v3420_v44 }
 0xf5c   : > { %v8443_v45 = vpop.eup %8442 }
 0xf5d   : > { %v3311_v46 = vsel %vm1467_vm6, %v8443_v45, 0.0  ;;  %v3528_v51 = vpop.xlane.xlu1 %3527 }
 0xf5e   : > { %3312 = vadd.xlane.f32.xlu1 %v3311_v46  ;;  %v3529_v52 = vsub.f32 %v3520_v23, %v3528_v51  ;;  %v7220_v51 = vld [vmem:[%s10720_s3 + $0x1] ss:$0 sm:$0xff] }
 0xf60   : > { %v3530_v53 = vmul.f32 1.442695, %v3529_v52 }
 0xf62   : > { %8446 = vpow2.f32 %v3530_v53 }
 0xf64   : > { %v8445_v47 = vpop.eup %8444 }
 0xf65   : > { %v3422_v50 = vsel %vm1467_vm6, %v8445_v47, 0.0 }
 0xf66   : > { %3423 = vadd.xlane.f32.xlu0 %v3422_v50 }
 0xf6c   : > { %v8447_v54 = vpop.eup %8446 }
 0xf6d   : > { %v3532_v55 = vsel %vm1467_vm6, %v8447_v54, 0.0 }
 0xf6f   : > { %3428 = vrot.lane.b32.xlu1 %v9240_v58, %s10722_s23 }
 0xf7c   : > { %3318 = vrot.lane.b32.xlu0 %v9240_v58, %s10723_s26 }
 0xf93   : > { %3533 = vadd.xlane.f32.xlu1 %v3532_v55 }
 0xfa4   : > { %3538 = vrot.lane.b32.xlu1 %v9240_v58, %s10724_s6 }
 0xfe3   : > { %v3205_v57 = vpop.xlane.xlu0 %3204 }
 0xfe4   : > { %8448 = vrcp.f32 %v3205_v57 }
 0xfeb   : > { %v3313_v11 = vpop.xlane.xlu1 %3312 }
 0xfec   : > { %8450 = vrcp.f32 %v3313_v11 }
 0xfee   : > { %v8449_v60 = vpop.eup %8448 }
 0xfef   : > { %v3207_v61 = vmul.f32 %v8449_v60, %v8441_v36  ;;  %v3429_v58 = vpop.permute.xlu1 %3428 }
 0xff0   : > { %v3434_v4 = vand.u32 %v3429_v58, %v8996_v59  ;;  %v8294_v58 = vld [vmem:[%s10620_s11 + $0x64] ss:$8 sps:$4 sm:$0xff]  }
 0xff1   : > { %v3208_v56 = vpack.c.bf16 %v3207_v61, %v3207_v61 }
 0xff3   : > { %7907 = vmatmul.mubr.msk.bf16.vlgmr.msra.gmra.mrb[40].mxu1 %vm1480_vm7, %v3208_v56  ;;  %v3424_v62 = vpop.xlane.xlu0 %3423 }
 0xff4   : > { %8452 = vrcp.f32 %v3424_v62  ;;  %7918 = vmatprep.mubr.msk.bf16.mxu1 %vm8580_vm2, %v8579_v39 }
 0xff6   : > { %v8451_v63 = vpop.eup %8450 }
 0xff7   : > { %v3319_v0 = vpop.permute.xlu0 %3318  ;;  %v3315_v1 = vmul.f32 %v8451_v63, %v8443_v45 }
 0xff8   : > { %v3324_v2 = vand.u32 %v3319_v0, %v8996_v59  ;;  %v8286_v0 = vld [vmem:[%s10620_s11 + $0x40] ss:$8 sps:$4 sm:$0xff]  }
 0xff9   : > { %v3316_v3 = vpack.c.bf16 %v3315_v1, %v3315_v1  ;;  %v8291_v1 = vld [vmem:[%s10620_s11 + $0x54] ss:$8 sps:$4 sm:$0xff]  }
 0xffa   : > { %7917 = vmatpush3.bf16.msra.mxu1 %v3324_v2  ;;  %v8289_v2 = vld [vmem:[%s10620_s11 + $0x50] ss:$8 sps:$4 sm:$0xff]  }
 0xffb   : > { %7928 = vmatprep.subr.bf16.mxu1 %v8579_v39 }
 0xffd   : > { %7919 = vmatmul.mubr.msk.bf16.vlgmr.msra.gmra.mrb[44].mxu1 %vm1480_vm7, %v3316_v3  ;;  %v8292_v3 = vld [vmem:[%s10620_s11 + $0x60] ss:$8 sps:$4 sm:$0xff]  }
 0xffe   : > { %v8453_v5 = vpop.eup %8452  ;;  %7929 = vmatpush3.bf16.msra.mxu1 %v3434_v4  ;;  %7930 = vmatprep.mubr.msk.bf16.mxu1 %vm8580_vm2, %v8579_v39  ;;  %v8297_v4 = vld [vmem:[%s10620_s11 + $0x74] ss:$8 sps:$4 sm:$0xff]  }
 0xfff   : > { %v3426_v6 = vmul.f32 %v8453_v5, %v8445_v47  ;;  %7940 = vmatprep.subr.bf16.mxu1 %v8579_v39  ;;  %v8295_v5 = vld [vmem:[%s10620_s11 + $0x70] ss:$8 sps:$4 sm:$0xff]  }
0x1001   : > { %v3427_v7 = vpack.c.bf16 %v3426_v6, %v3426_v6 }
0x1005   : > { %7931 = vmatmul.mubr.msk.bf16.vlgmr.msra.gmra.mrb[48].mxu1 %vm1480_vm7, %v3427_v7 }
0x1006   : > { %7942 = vmatprep.mubr.msk.bf16.mxu1 %vm8580_vm2, %v8579_v39 }
0x1020   : > { %v3534_v8 = vpop.xlane.xlu1 %3533 }
0x1021   : > { %8454 = vrcp.f32 %v3534_v8 }
0x1024   : > { %v3539_v9 = vpop.permute.xlu1 %3538 }
0x1025   : > { %v3544_v10 = vand.u32 %v3539_v9, %v8996_v59 }
0x1027   : > { %7941 = vmatpush3.bf16.msra.mxu1 %v3544_v10  ;;  %v7223_v10 = vld [vmem:[%s10618_s9 + $0x1] ss:$0 sm:$0xff] }
0x102b   : > { %v8455_v13 = vpop.eup %8454 }
0x102c   : > { %v3536_v14 = vmul.f32 %v8455_v13, %v8447_v54 }
0x102e   : > { %v3537_v15 = vpack.c.bf16 %v3536_v14, %v3536_v14  ;;  %v7224_v14 = vld [vmem:[%s10619_s10 + $0x1] ss:$0 sm:$0xff] }
0x1030   : > { %7943 = vmatmul.mubr.msk.bf16.vlgmr.msra.gmra.mrb[52].mxu1 %vm1480_vm7, %v3537_v15 }
0x1031   : > { %3817 = vmatprep.mubr.bf16.mxu1 %v8578_v26 }
0x10c6   : > { %v3249_v16 = vpop.f32.mrb[40].mxu1 }
0x10c7   : > { %v7908_v17 = vpop.f32.mrb[41].mxu1 }
0x10c8   : > { %v3252_v18 = vpop.f32.mrb[42].mxu1 }
0x10c9   : > { %v7909_v48 = vpop.f32.mrb[43].mxu1  ;;  %v8298_v18 = vld [vmem:[%s10622_s13 + $0xc0] sm:$0xff]  }
0x10ca   : > { %v8299_v48 = vld [vmem:[%s10622_s13 + $0x80] sm:$0xff]   ;;  %7703 = vmatprep.subr.bf16.mxu0 %v8298_v18 }
0x10d0   : > { %v3360_v21 = vpop.f32.mrb[44].mxu1 }
0x10d1   : > { %3587 = vrot.lane.b32.xlu0 %v3360_v21, %s10725_s5  ;;  %v7920_v22 = vpop.f32.mrb[45].mxu1  ;;  %v8302_v21 = vld [vmem:[%s10622_s13 + $0xd0] sm:$0xff]  }
0x10d2   : > { %v3363_v23 = vpop.f32.mrb[46].mxu1  ;;  %v8303_v22 = vld [vmem:[%s10622_s13 + $0x90] sm:$0xff]  }
0x10d3   : > { %v7921_v25 = vpop.f32.mrb[47].mxu1  ;;  %v8304_v23 = vld [vmem:[%s10622_s13 + $0xd8] sm:$0xff]  }
0x10d4   : > { %v8306_v25 = vld [vmem:[%s10622_s13 + $0xe0] sm:$0xff]  }
0x10d8   : > { %v3470_v27 = vpop.f32.mrb[48].mxu1 }
0x10d9   : > { %3591 = vrot.lane.b32.xlu1 %v3470_v27, %s10718_s4  ;;  %v7932_v29 = vpop.f32.mrb[49].mxu1  ;;  %v8307_v27 = vld [vmem:[%s10622_s13 + $0xa0] sm:$0xff]  }
0x10da   : > { %v3473_v30 = vpop.f32.mrb[50].mxu1  ;;  %v8308_v29 = vld [vmem:[%s10622_s13 + $0xe8] sm:$0xff]  }
0x10db   : > { %v7933_v31 = vpop.f32.mrb[51].mxu1  ;;  %v8309_v30 = vld [vmem:[%s10622_s13 + $0xa8] sm:$0xff]  }
0x10dc   : > { %v8310_v31 = vld [vmem:[%s10622_s13 + $0xf0] sm:$0xff]  }
0x1103   : > { %v3580_v33 = vpop.f32.mrb[52].mxu1 }
0x1104   : > { %3595 = vrot.lane.b32.xlu0 %v3580_v33, %s10719_s0  ;;  %v7944_v34 = vpop.f32.mrb[53].mxu1  ;;  %v8312_v33 = vld [vmem:[%s10622_s13 + $0xf8] sm:$0xff]  }
0x1105   : > { %v3583_v35 = vpop.f32.mrb[54].mxu1  ;;  %v8313_v34 = vld [vmem:[%s10622_s13 + $0xb8] sm:$0xff]  }
0x1106   : > { %v7945_v36 = vpop.f32.mrb[55].mxu1  ;;  %v8314_v35 = vld [vmem:[%s10624_s15] sm:$0xff]  }
0x1107   : > { %v8315_v36 = vld [vmem:[%s10624_s15 + $0x8] sm:$0xff]  }
0x1143   : > { %v3588_v41 = vpop.permute.xlu0 %3587 }
0x1144   : > { %v3598_v43 = vsel %vm1420_vm3, %v3249_v16, %v3588_v41  ;;  %v7233_v41 = vld [vmem:[%s10621_s12 + $0x2] sm:$0x3] }
0x114b   : > { %v3592_v42 = vpop.permute.xlu1 %3591 }
0x114c   : > { %v3599_v44 = vsel %vm1875_vm8, %v3598_v43, %v3592_v42  ;;  %v3735_v42 = vrot.slane %v7233_v41, %v8970_v40  ;;  %v3739_v43 = vrot.slane %v7233_v41, %v8988_v49 }
0x1176   : > { %v3596_v45 = vpop.permute.xlu0 %3595 }
0x1177   : > { %v3600_v46 = vsel %vm1877_vm9, %v3599_v44, %v3596_v45 }
0x1178   : > { %v3601_v47 = vpack.c.bf16 %v3600_v46, %v3600_v46 }
0x117a   : > { %7955 = vmatmul.mubr.msk.bf16.vlgmr.msra.gmra.mrb[44].mxu0 %vm1370_vm1, %v3601_v47 }
0x117b   : > { %7704 = vmatpush3.bf16.msra.mxu0 %v8299_v48 }
0x117c   : > { %7705 = vmatprep.subr.bf16.mxu0 %v8300_v19 }
0x117f   : > { %7706 = vmatpush3.bf16.msra.mxu0 %v8301_v20 }
0x1180   : > { %7707 = vmatprep.subr.bf16.mxu0 %v8302_v21 }
0x1183   : > { %7708 = vmatpush3.bf16.msra.mxu0 %v8303_v22 }
0x1184   : > { %7709 = vmatprep.subr.bf16.mxu0 %v8304_v23 }
0x1187   : > { %7710 = vmatpush3.bf16.msra.mxu0 %v8305_v24 }
0x1188   : > { %7711 = vmatprep.subr.bf16.mxu0 %v8306_v25  ;;  %v8320_v25 = vld [vmem:[%s10711_s25 + $0x84] ss:$8 sps:$4 sm:$0xff]  }
0x118b   : > { %7712 = vmatpush3.bf16.msra.mxu0 %v8307_v27  ;;  %v8318_v27 = vld [vmem:[%s10711_s25 + $0x80] ss:$8 sps:$4 sm:$0xff]  }
0x118c   : > { %7713 = vmatprep.subr.bf16.mxu0 %v8308_v29  ;;  %v8323_v29 = vld [vmem:[%s10711_s25 + $0x94] ss:$8 sps:$4 sm:$0xff]  }
0x118f   : > { %7714 = vmatpush3.bf16.msra.mxu0 %v8309_v30  ;;  %v8321_v30 = vld [vmem:[%s10711_s25 + $0x90] ss:$8 sps:$4 sm:$0xff]  }
0x1190   : > { %7715 = vmatprep.subr.bf16.mxu0 %v8310_v31  ;;  %v8326_v31 = vld [vmem:[%s10711_s25 + $0xa4] ss:$8 sps:$4 sm:$0xff]  }
0x1193   : > { %7716 = vmatpush3.bf16.msra.mxu0 %v8311_v32  ;;  %v8324_v32 = vld [vmem:[%s10711_s25 + $0xa0] ss:$8 sps:$4 sm:$0xff]  }
0x1194   : > { %7717 = vmatprep.subr.bf16.mxu0 %v8312_v33  ;;  %v8329_v33 = vld [vmem:[%s10711_s25 + $0xb4] ss:$8 sps:$4 sm:$0xff]  }
0x1197   : > { %7718 = vmatpush3.bf16.msra.mxu0 %v8313_v34  ;;  %v8327_v34 = vld [vmem:[%s10711_s25 + $0xb0] ss:$8 sps:$4 sm:$0xff]  }
0x1198   : > { %7970 = vmatprep.subr.bf16.mxu0 %v8579_v39 }
0x124d   : > { %v3672_v50 = vpop.f32.mrb[44].mxu0 }
0x124e   : > { %v3678_v52 = vadd.f32 %v3672_v50, %v9189_v12  ;;  %v7956_v53 = vpop.f32.mrb[45].mxu0  ;;  %v8288_v12 = vld [vmem:[%s10620_s11 + $0x44] ss:$8 sps:$4 sm:$0xff]  }
0x124f   : > { %v3675_v54 = vpop.f32.mrb[46].mxu0  ;;  %3785 = vmatprep.subr.bf16.mxu1 %v8288_v12 }
0x1250   : > { %v9328_v55 = vadd.f32 %v7220_v51, %v3678_v52  ;;  %v7957_v57 = vpop.f32.mrb[47].mxu0  ;;  %3786 = vmatpush1.bf16.msra.mxu1 %v8286_v0 }
0x1251   : > { %3787 = vmatprep.subr.bf16.mxu1 %v8291_v1 }
0x1252   : > { %v3692_v11 = vsel %vm1280_vm0, %v9328_v55, 0.0 }
0x1253   : > { %3693 = vadd.xlane.f32.xlu1 %v3692_v11 }
0x1254   : > { %3788 = vmatpush1.bf16.msra.mxu1 %v8289_v2 }
0x1255   : > { %3789 = vmatprep.subr.bf16.mxu1 %v8294_v58 }
0x1258   : > { %3790 = vmatpush1.bf16.msra.mxu1 %v8292_v3 }
0x1259   : > { %3791 = vmatprep.subr.bf16.mxu1 %v8297_v4 }
0x125c   : > { %3792 = vmatpush1.bf16.msra.mxu1 %v8295_v5 }
0x125d   : > { %7958 = vmatprep.subr.bf16.mxu1 %v8579_v39 }
0x12e0   : > { %v3694_v60 = vpop.xlane.xlu1 %3693 }
0x12e1   : > { %v3695_v61 = vmul.f32 0.015625, %v3694_v60 }
0x12e3   : > { %v3696_v56 = vsub.f32 %v9328_v55, %v3695_v61 }
0x12e5   : > { %v3697_v62 = vmul.f32 %v3696_v56, %v3696_v56 }
0x12e7   : > { %v3698_v63 = vsel %vm1280_vm0, %v3697_v62, 0.0 }
0x12e8   : > { %3699 = vadd.xlane.f32.xlu0 %v3698_v63 }
0x1375   : > { %v3700_v6 = vpop.xlane.xlu0 %3699 }
0x1376   : > { %v3701_v7 = vmul.f32 0.015625, %v3700_v6 }
0x1378   : > { %v3702_v8 = vadd.f32 1e-12, %v3701_v7 }
0x137a   : > { %8456 = vrsqrt.f32 %v3702_v8  ;;  %v8316_v8 = vld [vmem:[%s10624_s15 + $0x10] sm:$0xff]  }
0x1384   : > { %v8457_v9 = vpop.eup %8456 }
0x1385   : > { %v3704_v13 = vmul.f32 %v8457_v9, %v3696_v56  ;;  %v8317_v9 = vld [vmem:[%s10624_s15 + $0x18] sm:$0xff]  }
0x1387   : > { %v3711_v15 = vmul.f32 %v7223_v10, %v3704_v13 }
0x1389   : > { %v3718_v16 = vadd.f32 %v7224_v14, %v3711_v15 }
0x138b   : > { %v3719_v17 = vpack.c.bf16 %v3718_v16, %v3718_v16  ;;  %v7292_v16 = vld [vmem:[%s10623_s14 + $0x1] ss:$0 sm:$0xff] }
0x138d   : > { %7242 = vmatmul.mubr.msk.bf16.vlgmr.msra.gmra.mrb[56].mxu1 %vm1370_vm1, %v3719_v17 }
0x138e   : > { %7966 = vmatprep.mubr.msk.bf16.mxu1 %vm8580_vm2, %v8579_v39  ;;  %7959 = vmatpush3.bf16.msra.mxu1 %v8314_v35 }
0x138f   : > { %7960 = vmatprep.subr.bf16.mxu1 %v8579_v39 }
0x1392   : > { %7961 = vmatpush3.bf16.msra.mxu1 %v8315_v36 }
0x1393   : > { %7962 = vmatprep.subr.bf16.mxu1 %v8579_v39 }
0x1396   : > { %7963 = vmatpush3.bf16.msra.mxu1 %v8316_v8 }
0x1397   : > { %7964 = vmatprep.subr.bf16.mxu1 %v8579_v39 }
0x139a   : > { %7965 = vmatpush3.bf16.msra.mxu1 %v8317_v9 }
0x139b   : > { %4823 = vmatprep.subr.bf16.mxu1 %v8320_v25 }
0x1460   : > { %v3819_v44 = vpop.f32.mrb[56].mxu1 }
0x1461   : > { %v3820_v45 = vadd.f32 %v3819_v44, %v3735_v42  ;;  %v3821_v46 = vpop.f32.mrb[57].mxu1 }
0x1462   : > { %v3822_v47 = vadd.f32 %v3821_v46, %v3739_v43  ;;  %v3823_v50 = vpop.f32.mrb[58].mxu1 }
0x1463   : > { %v3826_v51 = vmul.f32 %v3820_v45, %v3820_v45  ;;  %v3824_v52 = vpop.f32.mrb[59].mxu1 }
0x1464   : > { %v3827_v53 = vmul.f32 %v3822_v47, %v3822_v47 }
0x1465   : > { %v3828_v54 = vmul.f32 %v3826_v51, %v3820_v45  ;;  %v7323_v51 = vld [vmem:[%s10714_s29 + $0x2] ss:$0 sm:$0xff] }
0x1466   : > { %v3829_v57 = vmul.f32 %v3827_v53, %v3822_v47 }
0x1467   : > { %v3830_v11 = vmul.f32 0.044715, %v3828_v54 }
0x1468   : > { %v3831_v60 = vmul.f32 0.044715, %v3829_v57  ;;  %v7332_v57 = vld [vmem:[%s10716_s2 + $0x4] sm:$0x3] }
0x1469   : > { %v3832_v61 = vadd.f32 %v3830_v11, %v3820_v45  ;;  %v4773_v11 = vrot.slane %v7332_v57, %v8970_v40 }
0x146a   : > { %v3833_v56 = vadd.f32 %v3831_v60, %v3822_v47  ;;  %v4777_v60 = vrot.slane %v7332_v57, %v8988_v49 }
0x146b   : > { %v3834_v62 = vmul.f32 0.7978846, %v3832_v61 }
0x146c   : > { %v3835_v63 = vmul.f32 0.7978846, %v3833_v56 }
0x146d   : > { %8458 = vtanh.f32 %v3834_v62 }
0x146e   : > { %8460 = vtanh.f32 %v3835_v63 }
0x1477   : > { %v8459_v12 = vpop.eup %8458 }
0x1478   : > { %v8461_v0 = vpop.eup %8460  ;;  %v3838_v1 = vadd.f32 1.0, %v8459_v12 }
0x1479   : > { %v3839_v2 = vadd.f32 1.0, %v8461_v0 }
0x147a   : > { %v3840_v58 = vmul.f32 0.5, %v3838_v1 }
0x147b   : > { %v3841_v3 = vmul.f32 0.5, %v3839_v2 }
0x147c   : > { %v3842_v4 = vmul.f32 %v3840_v58, %v3820_v45 }
0x147d   : > { %v3843_v5 = vmul.f32 %v3841_v3, %v3822_v47  ;;  %v7322_v47 = vld [vmem:[%s10713_s24 + $0x2] ss:$0 sm:$0xff] }
0x147e   : > { %v3844_v7 = vpack.c.bf16 %v3842_v4, %v3842_v4 }
0x147f   : > { %v3845_v6 = vpack.c.bf16 %v3843_v5, %v3843_v5 }
0x1481   : > { %4007 = vmatprep.mubr.bf16.mxu0 %v3845_v6 }
0x1482   : > { %4008 = vmatmul.mubr.bf16.vlgmr.msra.gmra.mrb[48].mxu0 %v3844_v7 }
0x1483   : > { %7972 = vmatprep.mubr.msk.bf16.mxu0 %vm8580_vm2, %v8579_v39 }
0x1555   : > { %v7719_v10 = vpop.f32.mrb[48].mxu0 }
0x1556   : > { %v7720_v13 = vpop.f32.mrb[49].mxu0 }
0x1557   : > { %v7721_v14 = vadd.f32 %v7720_v13, %v7719_v10  ;;  %v7722_v15 = vpop.f32.mrb[50].mxu0 }
0x1558   : > { %v7723_v17 = vpop.f32.mrb[51].mxu0 }
0x1559   : > { %v4015_v18 = vadd.f32 %v7721_v14, %v9328_v55 }
0x155b   : > { %v9443_v48 = vadd.f32 %v7292_v16, %v4015_v18 }
0x155d   : > { %v4730_v19 = vsel %vm1280_vm0, %v9443_v48, 0.0  ;;  %v4025_v20 = vpack.c.bf16 %v9443_v48, %v9443_v48 }
0x155e   : > { %4731 = vadd.xlane.f32.xlu0 %v4730_v19 }
0x155f   : > { %7967 = vmatmul.mubr.msk.bf16.vlgmr.msra.gmra.mrb[60].mxu1 %vm1370_vm1, %v4025_v20 }
0x1560   : > { %4855 = vmatprep.mubr.bf16.mxu1 %v8578_v26  ;;  %4824 = vmatpush1.bf16.msra.mxu1 %v8318_v27 }
0x1561   : > { %4825 = vmatprep.subr.bf16.mxu1 %v8323_v29 }
0x1564   : > { %4826 = vmatpush1.bf16.msra.mxu1 %v8321_v30 }
0x1565   : > { %4827 = vmatprep.subr.bf16.mxu1 %v8326_v31 }
0x1568   : > { %4828 = vmatpush1.bf16.msra.mxu1 %v8324_v32 }
0x1569   : > { %4829 = vmatprep.subr.bf16.mxu1 %v8329_v33 }
0x156c   : > { %4830 = vmatpush1.bf16.msra.mxu1 %v8327_v34 }
0x156d   : > { %7976 = vmatprep.subr.bf16.mxu1 %v8579_v39 }
0x15eb   : > { %v4732_v21 = vpop.xlane.xlu0 %4731 }
0x15ec   : > { %v4733_v22 = vmul.f32 0.015625, %v4732_v21 }
0x15ee   : > { %v4734_v23 = vsub.f32 %v9443_v48, %v4733_v22 }
0x15f0   : > { %v4735_v24 = vmul.f32 %v4734_v23, %v4734_v23 }
0x15f2   : > { %v4736_v55 = vsel %vm1280_vm0, %v4735_v24, 0.0 }
0x15f3   : > { %4737 = vadd.xlane.f32.xlu1 %v4736_v55 }
0x1632   : > { %v9478_v35 = vpop.f32.mrb[60].mxu1 }
0x1633   : > { %v7968_v36 = vpop.f32.mrb[61].mxu1 }
0x1634   : > { %v4105_v41 = vpop.f32.mrb[62].mxu1 }
0x1635   : > { %v7969_v42 = vpop.f32.mrb[63].mxu1 }
0x1680   : > { %v4738_v43 = vpop.xlane.xlu1 %4737 }
0x1681   : > { %v4739_v44 = vmul.f32 0.015625, %v4738_v43 }
0x1683   : > { %v4740_v45 = vadd.f32 1e-12, %v4739_v44 }
0x1685   : > { %8462 = vrsqrt.f32 %v4740_v45 }
0x168f   : > { %v8463_v46 = vpop.eup %8462 }
0x1690   : > { %v4742_v50 = vmul.f32 %v8463_v46, %v4734_v23 }
0x1692   : > { %v4749_v52 = vmul.f32 %v7322_v47, %v4742_v50 }
0x1694   : > { %v4756_v53 = vadd.f32 %v7323_v51, %v4749_v52 }
0x1696   : > { %v4757_v54 = vpack.c.bf16 %v4756_v53, %v4756_v53 }
0x1698   : > { %7341 = vmatmul.mubr.msk.bf16.vlgmr.msra.gmra.mrb[64].mxu1 %vm1370_vm1, %v4757_v54 }
0x1699   : > { %7978 = vmatprep.mubr.msk.bf16.mxu1 %vm8580_vm2, %v8579_v39 }
0x176b   : > { %v4857_v61 = vpop.f32.mrb[64].mxu1 }
0x176c   : > { %v4858_v56 = vadd.f32 %v4857_v61, %v4773_v11  ;;  %v4859_v62 = vpop.f32.mrb[65].mxu1 }
0x176d   : > { %v4860_v63 = vadd.f32 %v4859_v62, %v4777_v60  ;;  %v4861_v12 = vpop.f32.mrb[66].mxu1 }
0x176e   : > { %v4864_v0 = vpack.c.bf16 %v4858_v56, %v4858_v56  ;;  %v4862_v1 = vpop.f32.mrb[67].mxu1 }
0x176f   : > { %v9494_v2 = vpack.c.bf16 %v4860_v63, %v4860_v63 }
0x1770   : > { %4975 = vrot.lane.b32.xlu1 %v4864_v0, %s10719_s0  ;;  %4867 = vrot.lane.b32.xlu0 %v4864_v0, %s10721_s20 }
0x1771   : > { %v4931_v58 = vand.u32 %v9494_v2, %v8996_v59 }
0x1773   : > { %7977 = vmatpush3.bf16.msra.mxu1 %v4931_v58 }
0x1774   : > { %4973 = vrot.lane.b32.xlu1 %v4864_v0, %s10723_s26  ;;  %5086 = vrot.lane.b32.xlu0 %v4864_v0, %s10718_s4 }
0x1775   : > { %7988 = vmatprep.subr.bf16.mxu1 %v8579_v39 }
0x1778   : > { %5084 = vrot.lane.b32.xlu1 %v4864_v0, %s10722_s23  ;;  %5196 = vrot.lane.b32.xlu0 %v4864_v0, %s10725_s5 }
0x177c   : > { %5194 = vrot.lane.b32.xlu1 %v4864_v0, %s10724_s6 }
0x17e2   : > { %v4868_v3 = vpop.permute.xlu0 %4867  ;;  %v4976_v5 = vpop.permute.xlu1 %4975 }
0x17e3   : > { %v4873_v4 = vsel %vm1420_vm3, %v4868_v3, 0  ;;  %v4981_v6 = vsel %vm1420_vm3, %v4976_v5, 0 }
0x17e4   : > { %7971 = vmatpush3.bf16.xpose.msra.mxu0 %v4873_v4 }
0x17e5   : > { %7982 = vmatprep.subr.bf16.mxu0 %v8579_v39 }
0x17e6   : > { %v5087_v7 = vpop.permute.xlu0 %5086  ;;  %v4974_v8 = vpop.permute.xlu1 %4973 }
0x17e7   : > { %v5092_v9 = vsel %vm1420_vm3, %v5087_v7, 0 }
0x17ea   : > { %v5197_v10 = vpop.permute.xlu0 %5196  ;;  %v5085_v13 = vpop.permute.xlu1 %5084 }
0x17eb   : > { %7973 = vmatmul.mubr.msk.bf16.vlgmr.msra.gmra.mrb[52].mxu0 %vm1420_vm3, %v4864_v0  ;;  %v5202_v14 = vsel %vm1420_vm3, %v5197_v10, 0 }
0x17ec   : > { %7983 = vmatpush3.bf16.xpose.msra.mxu0 %v4981_v6  ;;  %7984 = vmatprep.mubr.msk.bf16.mxu0 %vm8580_vm2, %v8579_v39 }
0x17ed   : > { %7994 = vmatprep.subr.bf16.mxu0 %v8579_v39 }
0x17ee   : > { %v5195_v15 = vpop.permute.xlu1 %5194 }
0x17f3   : > { %7985 = vmatmul.mubr.msk.bf16.vlgmr.msra.gmra.mrb[56].mxu0 %vm1420_vm3, %v4974_v8 }
0x17f4   : > { %7995 = vmatpush3.bf16.xpose.msra.mxu0 %v5092_v9  ;;  %7996 = vmatprep.mubr.msk.bf16.mxu0 %vm8580_vm2, %v8579_v39 }
0x17f5   : > { %8006 = vmatprep.subr.bf16.mxu0 %v8579_v39 }
0x17fb   : > { %7997 = vmatmul.mubr.msk.bf16.vlgmr.msra.gmra.mrb[60].mxu0 %vm1420_vm3, %v5085_v13 }
0x17fc   : > { %8007 = vmatpush3.bf16.xpose.msra.mxu0 %v5202_v14  ;;  %8008 = vmatprep.mubr.msk.bf16.mxu0 %vm8580_vm2, %v8579_v39 }
0x17fd   : > { %8018 = vmatprep.subr.bf16.mxu0 %v8579_v39 }
0x1803   : > { %8009 = vmatmul.mubr.msk.bf16.vlgmr.msra.gmra.mrb[64].mxu0 %vm1420_vm3, %v5195_v15 }
0x1804   : > { %8026 = vmatprep.mubr.msk.bf16.mxu0 %vm8580_vm2, %v8579_v39 }
0x18be   : > { %v4909_v16 = vpop.f32.mrb[52].mxu0 }
0x18bf   : > { %v7974_v17 = vpop.f32.mrb[53].mxu0  ;;  %v4915_v18 = vsel %vm1467_vm6, %v4909_v16, -inf }
0x18c0   : > { %4916 = vmax.xlane.f32.xlu0 %v4915_v18  ;;  %v4912_v19 = vpop.f32.mrb[54].mxu0 }
0x18c1   : > { %v7975_v20 = vpop.f32.mrb[55].mxu0 }
0x18c6   : > { %v5017_v21 = vpop.f32.mrb[56].mxu0 }
0x18c7   : > { %v7986_v22 = vpop.f32.mrb[57].mxu0  ;;  %v5023_v23 = vsel %vm1467_vm6, %v5017_v21, -inf }
0x18c8   : > { %5024 = vmax.xlane.f32.xlu1 %v5023_v23  ;;  %v5020_v24 = vpop.f32.mrb[58].mxu0 }
0x18c9   : > { %v7987_v55 = vpop.f32.mrb[59].mxu0  ;;  %v8330_v24 = vld [vmem:[%s10717_s30 + $0x40] sm:$0xff]  }
0x18ca   : > { %8019 = vmatpush3.bf16.msra.mxu0 %v8330_v24 }
0x18cb   : > { %8020 = vmatprep.subr.bf16.mxu0 %v8579_v39 }
0x18ce   : > { %v5128_v25 = vpop.f32.mrb[60].mxu0 }
0x18cf   : > { %v7998_v27 = vpop.f32.mrb[61].mxu0  ;;  %v5134_v29 = vsel %vm1467_vm6, %v5128_v25, -inf }
0x18d0   : > { %5135 = vmax.xlane.f32.xlu0 %v5134_v29  ;;  %v5131_v30 = vpop.f32.mrb[62].mxu0 }
0x18d1   : > { %v7999_v31 = vpop.f32.mrb[63].mxu0 }
0x18d6   : > { %v5238_v32 = vpop.f32.mrb[64].mxu0 }
0x18d7   : > { %v8010_v33 = vpop.f32.mrb[65].mxu0  ;;  %v5244_v34 = vsel %vm1467_vm6, %v5238_v32, -inf }
0x18d8   : > { %5245 = vmax.xlane.f32.xlu0 %v5244_v34  ;;  %v5241_v36 = vpop.f32.mrb[66].mxu0  ;;  %v8331_v34 = vld [vmem:[%s10717_s30 + $0x48] sm:$0xff]  }
0x18d9   : > { %v8011_v41 = vpop.f32.mrb[67].mxu0  ;;  %8021 = vmatpush3.bf16.msra.mxu0 %v8331_v34  ;;  %v8332_v36 = vld [vmem:[%s10717_s30 + $0x50] sm:$0xff]   ;;  %v8352_v34 = vld [vmem:[%s10622_s13 + $0x158] sm:$0xff]  }
0x18da   : > { %8022 = vmatprep.subr.bf16.mxu0 %v8579_v39  ;;  %v8333_v41 = vld [vmem:[%s10717_s30 + $0x58] sm:$0xff]  }
0x18dd   : > { %8023 = vmatpush3.bf16.msra.mxu0 %v8332_v36  ;;  %v8353_v36 = vld [vmem:[%s10622_s13 + $0x118] sm:$0xff]  }
0x18de   : > { %8024 = vmatprep.subr.bf16.mxu0 %v8579_v39 }
0x18e1   : > { %8025 = vmatpush3.bf16.msra.mxu0 %v8333_v41  ;;  %v8354_v41 = vld [vmem:[%s10622_s13 + $0x160] sm:$0xff]  }
0x194d   : > { %v4917_v42 = vpop.xlane.xlu0 %4916 }
0x194e   : > { %v4918_v43 = vsub.f32 %v4909_v16, %v4917_v42 }
0x1950   : > { %v4919_v44 = vmul.f32 1.442695, %v4918_v43 }
0x1952   : > { %8464 = vpow2.f32 %v4919_v44 }
0x1955   : > { %v5025_v45 = vpop.xlane.xlu1 %5024 }
0x1956   : > { %v5026_v46 = vsub.f32 %v5017_v21, %v5025_v45 }
0x1958   : > { %v5027_v47 = vmul.f32 1.442695, %v5026_v46 }
0x195a   : > { %8466 = vpow2.f32 %v5027_v47 }
0x195c   : > { %v8465_v50 = vpop.eup %8464 }
0x195d   : > { %v4921_v51 = vsel %vm1467_vm6, %v8465_v50, 0.0  ;;  %v5136_v52 = vpop.xlane.xlu0 %5135 }
0x195e   : > { %4922 = vadd.xlane.f32.xlu1 %v4921_v51  ;;  %v5137_v62 = vsub.f32 %v5128_v25, %v5136_v52 }
0x1960   : > { %v5138_v63 = vmul.f32 1.442695, %v5137_v62  ;;  %v7364_v62 = vld [vmem:[%s10720_s3 + $0x2] ss:$0 sm:$0xff] }
0x1964   : > { %v8467_v53 = vpop.eup %8466 }
0x1965   : > { %v5246_v54 = vpop.xlane.xlu0 %5245  ;;  %v5029_v57 = vsel %vm1467_vm6, %v8467_v53, 0.0 }
0x1966   : > { %v5247_v11 = vsub.f32 %v5238_v32, %v5246_v54  ;;  %5030 = vadd.xlane.f32.xlu0 %v5029_v57 }
0x1968   : > { %v5248_v60 = vmul.f32 1.442695, %v5247_v11 }
0x196a   : > { %8468 = vpow2.f32 %v5248_v60 }
0x196b   : > { %8470 = vpow2.f32 %v5138_v63 }
0x196f   : > { %5036 = vrot.lane.b32.xlu1 %v9494_v2, %s10723_s26 }
0x1974   : > { %v8469_v61 = vpop.eup %8468 }
0x1975   : > { %v5250_v56 = vsel %vm1467_vm6, %v8469_v61, 0.0  ;;  %v8471_v12 = vpop.eup %8470 }
0x1976   : > { %5251 = vadd.xlane.f32.xlu0 %v5250_v56  ;;  %v5140_v0 = vsel %vm1467_vm6, %v8471_v12, 0.0 }
0x198c   : > { %5146 = vrot.lane.b32.xlu0 %v9494_v2, %s10722_s23 }
0x1993   : > { %5141 = vadd.xlane.f32.xlu1 %v5140_v0 }
0x19a4   : > { %5256 = vrot.lane.b32.xlu1 %v9494_v2, %s10724_s6 }
0x19eb   : > { %v4923_v1 = vpop.xlane.xlu1 %4922 }
0x19ec   : > { %8472 = vrcp.f32 %v4923_v1 }
0x19ef   : > { %v5037_v4 = vpop.permute.xlu1 %5036 }
0x19f0   : > { %v5042_v7 = vand.u32 %v5037_v4, %v8996_v59 }
0x19f3   : > { %v5031_v58 = vpop.xlane.xlu0 %5030 }
0x19f4   : > { %8474 = vrcp.f32 %v5031_v58 }
0x19f6   : > { %v8473_v3 = vpop.eup %8472 }
0x19f7   : > { %v4925_v5 = vmul.f32 %v8473_v3, %v8465_v50 }
0x19f9   : > { %v4926_v6 = vpack.c.bf16 %v4925_v5, %v4925_v5 }
0x19fb   : > { %7979 = vmatmul.mubr.msk.bf16.vlgmr.msra.gmra.mrb[68].mxu1 %vm1480_vm7, %v4926_v6 }
0x19fc   : > { %7989 = vmatpush3.bf16.msra.mxu1 %v5042_v7  ;;  %7990 = vmatprep.mubr.msk.bf16.mxu1 %vm8580_vm2, %v8579_v39 }
0x19fd   : > { %8000 = vmatprep.subr.bf16.mxu1 %v8579_v39 }
0x19fe   : > { %v8475_v8 = vpop.eup %8474 }
0x19ff   : > { %v5033_v2 = vmul.f32 %v8475_v8, %v8467_v53 }
0x1a01   : > { %v5034_v9 = vpack.c.bf16 %v5033_v2, %v5033_v2  ;;  %v8334_v2 = vld [vmem:[%s10620_s11 + $0x80] ss:$8 sps:$4 sm:$0xff]  }
0x1a03   : > { %7991 = vmatmul.mubr.msk.bf16.vlgmr.msra.gmra.mrb[72].mxu1 %vm1480_vm7, %v5034_v9  ;;  %v5252_v10 = vpop.xlane.xlu0 %5251  ;;  %v8339_v9 = vld [vmem:[%s10620_s11 + $0x94] ss:$8 sps:$4 sm:$0xff]  }
0x1a04   : > { %8002 = vmatprep.mubr.msk.bf16.mxu1 %vm8580_vm2, %v8579_v39 }
0x1a07   : > { %v5147_v13 = vpop.permute.xlu0 %5146 }
0x1a08   : > { %v5152_v14 = vand.u32 %v5147_v13, %v8996_v59  ;;  %v8342_v13 = vld [vmem:[%s10620_s11 + $0xa4] ss:$8 sps:$4 sm:$0xff]  }
0x1a0a   : > { %8001 = vmatpush3.bf16.msra.mxu1 %v5152_v14  ;;  %v8340_v14 = vld [vmem:[%s10620_s11 + $0xa0] ss:$8 sps:$4 sm:$0xff]  }
0x1a0b   : > { %8012 = vmatprep.subr.bf16.mxu1 %v8579_v39 }
0x1a20   : > { %v5142_v15 = vpop.xlane.xlu1 %5141 }
0x1a21   : > { %8476 = vrcp.f32 %v5142_v15  ;;  %v8345_v15 = vld [vmem:[%s10620_s11 + $0xb4] ss:$8 sps:$4 sm:$0xff]  }
0x1a22   : > { %8478 = vrcp.f32 %v5252_v10  ;;  %v8337_v10 = vld [vmem:[%s10620_s11 + $0x90] ss:$8 sps:$4 sm:$0xff]  }
0x1a24   : > { %v5257_v17 = vpop.permute.xlu1 %5256 }
0x1a25   : > { %v5262_v21 = vand.u32 %v5257_v17, %v8996_v59 }
0x1a2b   : > { %v8477_v16 = vpop.eup %8476 }
0x1a2c   : > { %v5144_v18 = vmul.f32 %v8477_v16, %v8471_v12  ;;  %v8479_v20 = vpop.eup %8478  ;;  %v8343_v16 = vld [vmem:[%s10620_s11 + $0xb0] ss:$8 sps:$4 sm:$0xff]  }
0x1a2d   : > { %v5254_v22 = vmul.f32 %v8479_v20, %v8469_v61 }
0x1a2e   : > { %v5145_v19 = vpack.c.bf16 %v5144_v18, %v5144_v18 }
0x1a2f   : > { %v5255_v23 = vpack.c.bf16 %v5254_v22, %v5254_v22 }
0x1a30   : > { %8003 = vmatmul.mubr.msk.bf16.vlgmr.msra.gmra.mrb[76].mxu1 %vm1480_vm7, %v5145_v19 }
0x1a31   : > { %8013 = vmatpush3.bf16.msra.mxu1 %v5262_v21  ;;  %8014 = vmatprep.mubr.msk.bf16.mxu1 %vm8580_vm2, %v8579_v39  ;;  %v7367_v21 = vld [vmem:[%s10618_s9 + $0x2] ss:$0 sm:$0xff] }
0x1a38   : > { %8015 = vmatmul.mubr.msk.bf16.vlgmr.msra.gmra.mrb[80].mxu1 %vm1480_vm7, %v5255_v23  ;;  %v7368_v23 = vld [vmem:[%s10619_s10 + $0x2] ss:$0 sm:$0xff] }
0x1a39   : > { %5535 = vmatprep.mubr.bf16.mxu1 %v8578_v26 }
0x1ace   : > { %v4967_v55 = vpop.f32.mrb[68].mxu1 }
0x1acf   : > { %v7980_v25 = vpop.f32.mrb[69].mxu1 }
0x1ad0   : > { %v4970_v27 = vpop.f32.mrb[70].mxu1 }
0x1ad1   : > { %v7981_v29 = vpop.f32.mrb[71].mxu1  ;;  %v8346_v27 = vld [vmem:[%s10622_s13 + $0x140] sm:$0xff]  }
0x1ad2   : > { %v8347_v29 = vld [vmem:[%s10622_s13 + $0x100] sm:$0xff]   ;;  %7751 = vmatprep.subr.bf16.mxu0 %v8346_v27 }
0x1ad6   : > { %v5078_v30 = vpop.f32.mrb[72].mxu1 }
0x1ad7   : > { %5305 = vrot.lane.b32.xlu1 %v5078_v30, %s10725_s5  ;;  %v7992_v31 = vpop.f32.mrb[73].mxu1  ;;  %v8348_v30 = vld [vmem:[%s10622_s13 + $0x148] sm:$0xff]  }
0x1ad8   : > { %v5081_v32 = vpop.f32.mrb[74].mxu1  ;;  %v8349_v31 = vld [vmem:[%s10622_s13 + $0x108] sm:$0xff]  }
0x1ad9   : > { %v7993_v33 = vpop.f32.mrb[75].mxu1  ;;  %v8350_v32 = vld [vmem:[%s10622_s13 + $0x150] sm:$0xff]  }
0x1ada   : > { %v8351_v33 = vld [vmem:[%s10622_s13 + $0x110] sm:$0xff]  }
0x1b03   : > { %v5188_v42 = vpop.f32.mrb[76].mxu1 }
0x1b04   : > { %5309 = vrot.lane.b32.xlu0 %v5188_v42, %s10718_s4  ;;  %v8004_v43 = vpop.f32.mrb[77].mxu1  ;;  %v8355_v42 = vld [vmem:[%s10622_s13 + $0x120] sm:$0xff]  }
0x1b05   : > { %v5191_v44 = vpop.f32.mrb[78].mxu1  ;;  %v8356_v43 = vld [vmem:[%s10622_s13 + $0x168] sm:$0xff]  }
0x1b06   : > { %v8005_v45 = vpop.f32.mrb[79].mxu1  ;;  %v8357_v44 = vld [vmem:[%s10622_s13 + $0x128] sm:$0xff]  }
0x1b07   : > { %v8358_v45 = vld [vmem:[%s10622_s13 + $0x170] sm:$0xff]  }
0x1b0b   : > { %v5298_v46 = vpop.f32.mrb[80].mxu1 }
0x1b0c   : > { %5313 = vrot.lane.b32.xlu1 %v5298_v46, %s10719_s0  ;;  %v8016_v47 = vpop.f32.mrb[81].mxu1  ;;  %v8359_v46 = vld [vmem:[%s10622_s13 + $0x130] sm:$0xff]  }
0x1b0d   : > { %v5301_v50 = vpop.f32.mrb[82].mxu1  ;;  %v8360_v47 = vld [vmem:[%s10622_s13 + $0x178] sm:$0xff]  }
0x1b0e   : > { %v8017_v51 = vpop.f32.mrb[83].mxu1  ;;  %v8361_v50 = vld [vmem:[%s10622_s13 + $0x138] sm:$0xff]  }
0x1b0f   : > { %v7377_v51 = vld [vmem:[%s10621_s12 + $0x4] sm:$0x3] }
0x1b49   : > { %v5306_v52 = vpop.permute.xlu1 %5305 }
0x1b4a   : > { %v5316_v54 = vsel %vm1420_vm3, %v4967_v55, %v5306_v52  ;;  %v5453_v52 = vrot.slane %v7377_v51, %v8970_v40 }
0x1b76   : > { %v5310_v53 = vpop.permute.xlu0 %5309 }
0x1b77   : > { %v5317_v57 = vsel %vm1875_vm8, %v5316_v54, %v5310_v53  ;;  %v5457_v53 = vrot.slane %v7377_v51, %v8988_v49  ;;  %v7439_v51 = vld [vmem:[%s10713_s24 + $0x3] ss:$0 sm:$0xff] }
0x1b7e   : > { %v5314_v11 = vpop.permute.xlu1 %5313 }
0x1b7f   : > { %v5318_v60 = vsel %vm1877_vm9, %v5317_v57, %v5314_v11 }
0x1b80   : > { %v5319_v61 = vpack.c.bf16 %v5318_v60, %v5318_v60 }
0x1b82   : > { %8027 = vmatmul.mubr.msk.bf16.vlgmr.msra.gmra.mrb[68].mxu0 %vm1370_vm1, %v5319_v61 }
0x1b83   : > { %7752 = vmatpush3.bf16.msra.mxu0 %v8347_v29 }
0x1b84   : > { %7753 = vmatprep.subr.bf16.mxu0 %v8348_v30 }
0x1b87   : > { %7754 = vmatpush3.bf16.msra.mxu0 %v8349_v31 }
0x1b88   : > { %7755 = vmatprep.subr.bf16.mxu0 %v8350_v32 }
0x1b8b   : > { %7756 = vmatpush3.bf16.msra.mxu0 %v8351_v33  ;;  %v8364_v33 = vld [vmem:[%s10711_s25 + $0xc4] ss:$8 sps:$4 sm:$0xff]  }
0x1b8c   : > { %7757 = vmatprep.subr.bf16.mxu0 %v8352_v34  ;;  %v8367_v34 = vld [vmem:[%s10711_s25 + $0xd4] ss:$8 sps:$4 sm:$0xff]  }
0x1b8f   : > { %7758 = vmatpush3.bf16.msra.mxu0 %v8353_v36  ;;  %v8365_v36 = vld [vmem:[%s10711_s25 + $0xd0] ss:$8 sps:$4 sm:$0xff]  }
0x1b90   : > { %7759 = vmatprep.subr.bf16.mxu0 %v8354_v41  ;;  %v8370_v41 = vld [vmem:[%s10711_s25 + $0xe4] ss:$8 sps:$4 sm:$0xff]  }
0x1b93   : > { %7760 = vmatpush3.bf16.msra.mxu0 %v8355_v42  ;;  %v8368_v42 = vld [vmem:[%s10711_s25 + $0xe0] ss:$8 sps:$4 sm:$0xff]  }
0x1b94   : > { %7761 = vmatprep.subr.bf16.mxu0 %v8356_v43  ;;  %v8373_v43 = vld [vmem:[%s10711_s25 + $0xf4] ss:$8 sps:$4 sm:$0xff]  }
0x1b97   : > { %7762 = vmatpush3.bf16.msra.mxu0 %v8357_v44  ;;  %v8371_v44 = vld [vmem:[%s10711_s25 + $0xf0] ss:$8 sps:$4 sm:$0xff]  }
0x1b98   : > { %7763 = vmatprep.subr.bf16.mxu0 %v8358_v45 }
0x1b9b   : > { %7764 = vmatpush3.bf16.msra.mxu0 %v8359_v46 }
0x1b9c   : > { %7765 = vmatprep.subr.bf16.mxu0 %v8360_v47 }
0x1b9f   : > { %7766 = vmatpush3.bf16.msra.mxu0 %v8361_v50 }
0x1ba0   : > { %8042 = vmatprep.subr.bf16.mxu0 %v8579_v39 }
0x1c55   : > { %v5390_v56 = vpop.f32.mrb[68].mxu0 }
0x1c56   : > { %v5396_v63 = vadd.f32 %v5390_v56, %v9443_v48  ;;  %v8028_v12 = vpop.f32.mrb[69].mxu0  ;;  %v8336_v48 = vld [vmem:[%s10620_s11 + $0x84] ss:$8 sps:$4 sm:$0xff]  }
0x1c57   : > { %v5393_v0 = vpop.f32.mrb[70].mxu0  ;;  %5503 = vmatprep.subr.bf16.mxu1 %v8336_v48 }
0x1c58   : > { %v9582_v1 = vadd.f32 %v7364_v62, %v5396_v63  ;;  %v8029_v58 = vpop.f32.mrb[71].mxu0  ;;  %5504 = vmatpush1.bf16.msra.mxu1 %v8334_v2 }
0x1c59   : > { %5505 = vmatprep.subr.bf16.mxu1 %v8339_v9 }
0x1c5a   : > { %v5410_v3 = vsel %vm1280_vm0, %v9582_v1, 0.0 }
0x1c5b   : > { %5411 = vadd.xlane.f32.xlu0 %v5410_v3 }
0x1c5c   : > { %5506 = vmatpush1.bf16.msra.mxu1 %v8337_v10 }
0x1c5d   : > { %5507 = vmatprep.subr.bf16.mxu1 %v8342_v13 }
0x1c60   : > { %5508 = vmatpush1.bf16.msra.mxu1 %v8340_v14 }
0x1c61   : > { %5509 = vmatprep.subr.bf16.mxu1 %v8345_v15 }
0x1c64   : > { %5510 = vmatpush1.bf16.msra.mxu1 %v8343_v16 }
0x1c65   : > { %5840 = vmatprep.subr.bf16.mxu1 %v8364_v33 }
0x1ce8   : > { %v5412_v4 = vpop.xlane.xlu0 %5411 }
0x1ce9   : > { %v5413_v5 = vmul.f32 0.015625, %v5412_v4 }
0x1ceb   : > { %v5414_v6 = vsub.f32 %v9582_v1, %v5413_v5 }
0x1ced   : > { %v5415_v7 = vmul.f32 %v5414_v6, %v5414_v6 }
0x1cef   : > { %v5416_v8 = vsel %vm1280_vm0, %v5415_v7, 0.0 }
0x1cf0   : > { %5417 = vadd.xlane.f32.xlu1 %v5416_v8 }
0x1d7d   : > { %v5418_v17 = vpop.xlane.xlu1 %5417 }
0x1d7e   : > { %v5419_v18 = vmul.f32 0.015625, %v5418_v17 }
0x1d80   : > { %v5420_v19 = vadd.f32 1e-12, %v5419_v18 }
0x1d82   : > { %8480 = vrsqrt.f32 %v5420_v19 }
0x1d8c   : > { %v8481_v20 = vpop.eup %8480 }
0x1d8d   : > { %v5422_v22 = vmul.f32 %v8481_v20, %v5414_v6 }
0x1d8f   : > { %v5429_v24 = vmul.f32 %v7367_v21, %v5422_v22  ;;  %v7436_v22 = vld [vmem:[%s10623_s14 + $0x2] ss:$0 sm:$0xff] }
0x1d91   : > { %v5436_v55 = vadd.f32 %v7368_v23, %v5429_v24 }
0x1d93   : > { %v5437_v25 = vpack.c.bf16 %v5436_v55, %v5436_v55 }
0x1d95   : > { %7386 = vmatmul.mubr.msk.bf16.vlgmr.msra.gmra.mrb[84].mxu1 %vm1370_vm1, %v5437_v25 }
0x1d96   : > { %5872 = vmatprep.mubr.bf16.mxu1 %v8578_v26 }
0x1e68   : > { %v5537_v54 = vpop.f32.mrb[84].mxu1 }
0x1e69   : > { %v5538_v57 = vadd.f32 %v5537_v54, %v5453_v52  ;;  %v5539_v11 = vpop.f32.mrb[85].mxu1 }
0x1e6a   : > { %v5540_v60 = vadd.f32 %v5539_v11, %v5457_v53  ;;  %v5541_v61 = vpop.f32.mrb[86].mxu1  ;;  %v7440_v53 = vld [vmem:[%s10714_s29 + $0x3] ss:$0 sm:$0xff] }
0x1e6b   : > { %v5544_v56 = vmul.f32 %v5538_v57, %v5538_v57  ;;  %v5542_v62 = vpop.f32.mrb[87].mxu1 }
0x1e6c   : > { %v5545_v63 = vmul.f32 %v5540_v60, %v5540_v60 }
0x1e6d   : > { %v5546_v12 = vmul.f32 %v5544_v56, %v5538_v57 }
0x1e6e   : > { %v5547_v0 = vmul.f32 %v5545_v63, %v5540_v60 }
0x1e6f   : > { %v5548_v58 = vmul.f32 0.044715, %v5546_v12 }
0x1e70   : > { %v5549_v3 = vmul.f32 0.044715, %v5547_v0 }
0x1e71   : > { %v5550_v4 = vadd.f32 %v5548_v58, %v5538_v57 }
0x1e72   : > { %v5551_v5 = vadd.f32 %v5549_v3, %v5540_v60 }
0x1e73   : > { %v5552_v6 = vmul.f32 0.7978846, %v5550_v4 }
0x1e74   : > { %v5553_v7 = vmul.f32 0.7978846, %v5551_v5 }
0x1e75   : > { %8482 = vtanh.f32 %v5552_v6 }
0x1e76   : > { %8484 = vtanh.f32 %v5553_v7 }
0x1e7f   : > { %v8483_v8 = vpop.eup %8482 }
0x1e80   : > { %v8485_v48 = vpop.eup %8484  ;;  %v5556_v2 = vadd.f32 1.0, %v8483_v8 }
0x1e81   : > { %v5557_v9 = vadd.f32 1.0, %v8485_v48 }
0x1e82   : > { %v5558_v10 = vmul.f32 0.5, %v5556_v2 }
0x1e83   : > { %v5559_v13 = vmul.f32 0.5, %v5557_v9 }
0x1e84   : > { %v5560_v14 = vmul.f32 %v5558_v10, %v5538_v57 }
0x1e85   : > { %v5561_v15 = vmul.f32 %v5559_v13, %v5540_v60  ;;  %v7449_v60 = vld [vmem:[%s10716_s2 + $0x6] sm:$0x3] }
0x1e86   : > { %v5562_v17 = vpack.c.bf16 %v5560_v14, %v5560_v14  ;;  %v5790_v61 = vrot.slane %v7449_v60, %v8970_v40  ;;  %v5794_v3 = vrot.slane %v7449_v60, %v8988_v49 }
0x1e87   : > { %v5563_v16 = vpack.c.bf16 %v5561_v15, %v5561_v15 }
0x1e89   : > { %5725 = vmatprep.mubr.bf16.mxu0 %v5563_v16 }
0x1e8a   : > { %5726 = vmatmul.mubr.bf16.vlgmr.msra.gmra.mrb[72].mxu0 %v5562_v17 }
0x1e8b   : > { %8044 = vmatprep.mubr.msk.bf16.mxu0 %vm8580_vm2, %v8579_v39 }
0x1f5d   : > { %v7767_v18 = vpop.f32.mrb[72].mxu0 }
0x1f5e   : > { %v7768_v19 = vpop.f32.mrb[73].mxu0 }
0x1f5f   : > { %v7769_v20 = vadd.f32 %v7768_v19, %v7767_v18  ;;  %v7770_v21 = vpop.f32.mrb[74].mxu0 }
0x1f60   : > { %v7771_v23 = vpop.f32.mrb[75].mxu0 }
0x1f61   : > { %v5733_v24 = vadd.f32 %v7769_v20, %v9582_v1  ;;  %v8362_v1 = vld [vmem:[%s10711_s25 + $0xc0] ss:$8 sps:$4 sm:$0xff]  }
0x1f62   : > { %5841 = vmatpush1.bf16.msra.mxu1 %v8362_v1 }
0x1f63   : > { %v9680_v55 = vadd.f32 %v7436_v22, %v5733_v24  ;;  %5842 = vmatprep.subr.bf16.mxu1 %v8367_v34 }
0x1f65   : > { %v5747_v25 = vsel %vm1280_vm0, %v9680_v55, 0.0 }
0x1f66   : > { %5748 = vadd.xlane.f32.xlu0 %v5747_v25  ;;  %5843 = vmatpush1.bf16.msra.mxu1 %v8365_v36 }
0x1f67   : > { %5844 = vmatprep.subr.bf16.mxu1 %v8370_v41 }
0x1f6a   : > { %5845 = vmatpush1.bf16.msra.mxu1 %v8368_v42 }
0x1f6b   : > { %5846 = vmatprep.subr.bf16.mxu1 %v8373_v43 }
0x1f6e   : > { %5847 = vmatpush1.bf16.msra.mxu1 %v8371_v44 }
0x1f6f   : > { %8030 = vmatprep.subr.bf16.mxu1 %v8579_v39 }
0x1ff3   : > { %v5749_v27 = vpop.xlane.xlu0 %5748 }
0x1ff4   : > { %v5750_v29 = vmul.f32 0.015625, %v5749_v27 }
0x1ff6   : > { %v5751_v30 = vsub.f32 %v9680_v55, %v5750_v29 }
0x1ff8   : > { %v5752_v31 = vmul.f32 %v5751_v30, %v5751_v30 }
0x1ffa   : > { %v5753_v32 = vsel %vm1280_vm0, %v5752_v31, 0.0 }
0x1ffb   : > { %5754 = vadd.xlane.f32.xlu0 %v5753_v32 }
0x2088   : > { %v5755_v45 = vpop.xlane.xlu0 %5754 }
0x2089   : > { %v5756_v46 = vmul.f32 0.015625, %v5755_v45 }
0x208b   : > { %v5757_v47 = vadd.f32 1e-12, %v5756_v46 }
0x208d   : > { %8486 = vrsqrt.f32 %v5757_v47 }
0x2097   : > { %v8487_v50 = vpop.eup %8486 }
0x2098   : > { %v5759_v52 = vmul.f32 %v8487_v50, %v5751_v30 }
0x209a   : > { %v5766_v54 = vmul.f32 %v7439_v51, %v5759_v52 }
0x209c   : > { %v5773_v57 = vadd.f32 %v7440_v53, %v5766_v54 }
0x209e   : > { %v5774_v11 = vpack.c.bf16 %v5773_v57, %v5773_v57 }
0x20a0   : > { %7458 = vmatmul.mubr.msk.bf16.vlgmr.msra.gmra.mrb[88].mxu1 %vm1370_vm1, %v5774_v11 }
0x20a1   : > { %8032 = vmatprep.mubr.msk.bf16.mxu1 %vm8580_vm2, %v8579_v39 }
0x2173   : > { %v5874_v56 = vpop.f32.mrb[88].mxu1 }
0x2174   : > { %v5875_v62 = vadd.f32 %v5874_v56, %v5790_v61  ;;  %v5876_v63 = vpop.f32.mrb[89].mxu1 }
0x2175   : > { %v5878_v12 = vpop.f32.mrb[90].mxu1  ;;  %v5877_v4 = vadd.f32 %v5876_v63, %v5794_v3 }
0x2176   : > { %v5881_v0 = vpack.c.bf16 %v5875_v62, %v5875_v62  ;;  %v5879_v58 = vpop.f32.mrb[91].mxu1 }
0x2177   : > { %v9736_v48 = vpack.c.bf16 %v5877_v4, %v5877_v4 }
0x2178   : > { %5992 = vrot.lane.b32.xlu0 %v5881_v0, %s10719_s0  ;;  %5884 = vrot.lane.b32.xlu1 %v5881_v0, %s10721_s20  ;;  %s10488_s20 = scalar_lea.vmem %s10745_s28, %s7567_s22 }
0x2179   : > { %v5948_v10 = vand.u32 %v9736_v48, %v8996_v59 }
0x217c   : > { %6101 = vrot.lane.b32.xlu0 %v5881_v0, %s10722_s23  ;;  %5990 = vrot.lane.b32.xlu1 %v5881_v0, %s10723_s26 }
0x2180   : > { %6211 = vrot.lane.b32.xlu0 %v5881_v0, %s10724_s6  ;;  %6103 = vrot.lane.b32.xlu1 %v5881_v0, %s10718_s4 }
0x2184   : > { %6213 = vrot.lane.b32.xlu1 %v5881_v0, %s10725_s5 }
0x21ea   : > { %v5993_v5 = vpop.permute.xlu0 %5992  ;;  %v5885_v6 = vpop.permute.xlu1 %5884 }
0x21eb   : > { %v5998_v7 = vsel %vm1420_vm3, %v5993_v5, 0  ;;  %v5890_v8 = vsel %vm1420_vm3, %v5885_v6, 0 }
0x21ec   : > { %8031 = vmatpush3.bf16.xpose.msra.mxu1 %v5890_v8  ;;  %8043 = vmatpush3.bf16.xpose.msra.mxu0 %v5998_v7 }
0x21ed   : > { %8036 = vmatprep.subr.bf16.mxu1 %v8579_v39  ;;  %8054 = vmatprep.subr.bf16.mxu0 %v8579_v39 }
0x21ee   : > { %v5991_v2 = vpop.permute.xlu1 %5990  ;;  %v6102_v15 = vpop.permute.xlu0 %6101 }
0x21f2   : > { %v6104_v9 = vpop.permute.xlu1 %6103  ;;  %v6212_v17 = vpop.permute.xlu0 %6211 }
0x21f3   : > { %v6109_v13 = vsel %vm1420_vm3, %v6104_v9, 0  ;;  %8033 = vmatmul.mubr.msk.bf16.vlgmr.msra.gmra.mrb[92].mxu1 %vm1420_vm3, %v5881_v0  ;;  %8045 = vmatmul.mubr.msk.bf16.vlgmr.msra.gmra.mrb[76].mxu0 %vm1420_vm3, %v5991_v2 }
0x21f4   : > { %8037 = vmatpush3.bf16.msra.mxu1 %v5948_v10  ;;  %8055 = vmatpush3.bf16.xpose.msra.mxu0 %v6109_v13 }
0x21f5   : > { %8056 = vmatprep.mubr.msk.bf16.mxu0 %vm8580_vm2, %v8579_v39  ;;  %8066 = vmatprep.subr.bf16.mxu0 %v8579_v39 }
0x21f6   : > { %8038 = vmatprep.mubr.msk.bf16.mxu1 %vm8580_vm2, %v8579_v39  ;;  %8048 = vmatprep.subr.bf16.mxu1 %v8579_v39  ;;  %v6214_v14 = vpop.permute.xlu1 %6213 }
0x21f7   : > { %v6219_v16 = vsel %vm1420_vm3, %v6214_v14, 0 }
0x21fb   : > { %8057 = vmatmul.mubr.msk.bf16.vlgmr.msra.gmra.mrb[80].mxu0 %vm1420_vm3, %v6102_v15 }
0x21fc   : > { %8067 = vmatpush3.bf16.xpose.msra.mxu0 %v6219_v16  ;;  %8068 = vmatprep.mubr.msk.bf16.mxu0 %vm8580_vm2, %v8579_v39 }
0x21fd   : > { %8078 = vmatprep.subr.bf16.mxu0 %v8579_v39 }
0x2203   : > { %8069 = vmatmul.mubr.msk.bf16.vlgmr.msra.gmra.mrb[84].mxu0 %vm1420_vm3, %v6212_v17 }
0x2204   : > { %8086 = vmatprep.mubr.msk.bf16.mxu0 %vm8580_vm2, %v8579_v39 }
0x22c6   : > { %v5926_v18 = vpop.f32.mrb[92].mxu1  ;;  %v6034_v19 = vpop.f32.mrb[76].mxu0 }
0x22c7   : > { %v8034_v20 = vpop.f32.mrb[93].mxu1  ;;  %v8046_v21 = vpop.f32.mrb[77].mxu0  ;;  %v5932_v22 = vsel %vm1467_vm6, %v5926_v18, -inf  ;;  %v6040_v23 = vsel %vm1467_vm6, %v6034_v19, -inf }
0x22c8   : > { %5933 = vmax.xlane.f32.xlu1 %v5932_v22  ;;  %v5929_v24 = vpop.f32.mrb[94].mxu1  ;;  %6041 = vmax.xlane.f32.xlu0 %v6040_v23  ;;  %v6037_v25 = vpop.f32.mrb[78].mxu0 }
0x22c9   : > { %v8035_v27 = vpop.f32.mrb[95].mxu1  ;;  %v8047_v29 = vpop.f32.mrb[79].mxu0 }
0x22ce   : > { %v6145_v30 = vpop.f32.mrb[80].mxu0 }
0x22cf   : > { %v8058_v31 = vpop.f32.mrb[81].mxu0  ;;  %v6151_v32 = vsel %vm1467_vm6, %v6145_v30, -inf }
0x22d0   : > { %6152 = vmax.xlane.f32.xlu0 %v6151_v32  ;;  %v6148_v33 = vpop.f32.mrb[82].mxu0  ;;  %v8374_v32 = vld [vmem:[%s10717_s30 + $0x60] sm:$0xff]  }
0x22d1   : > { %v8059_v1 = vpop.f32.mrb[83].mxu0  ;;  %8079 = vmatpush3.bf16.msra.mxu0 %v8374_v32 }
0x22d2   : > { %8080 = vmatprep.subr.bf16.mxu0 %v8579_v39 }
0x22d6   : > { %v6255_v34 = vpop.f32.mrb[84].mxu0 }
0x22d7   : > { %v8070_v36 = vpop.f32.mrb[85].mxu0  ;;  %v6261_v41 = vsel %vm1467_vm6, %v6255_v34, -inf }
0x22d8   : > { %6262 = vmax.xlane.f32.xlu1 %v6261_v41  ;;  %v6258_v42 = vpop.f32.mrb[86].mxu0 }
0x22d9   : > { %v8071_v43 = vpop.f32.mrb[87].mxu0 }
0x2355   : > { %v6042_v44 = vpop.xlane.xlu0 %6041  ;;  %v5934_v45 = vpop.xlane.xlu1 %5933 }
0x2356   : > { %v6043_v46 = vsub.f32 %v6034_v19, %v6042_v44  ;;  %v5935_v47 = vsub.f32 %v5926_v18, %v5934_v45  ;;  %v8377_v45 = vld [vmem:[%s10717_s30 + $0x78] sm:$0xff]  }
0x2358   : > { %v6044_v50 = vmul.f32 1.442695, %v6043_v46  ;;  %v5936_v51 = vmul.f32 1.442695, %v5935_v47 }
0x235a   : > { %8488 = vpow2.f32 %v6044_v50 }
0x235b   : > { %8490 = vpow2.f32 %v5936_v51 }
0x235d   : > { %v6153_v52 = vpop.xlane.xlu0 %6152 }
0x235e   : > { %v6154_v53 = vsub.f32 %v6145_v30, %v6153_v52 }
0x2360   : > { %v6155_v54 = vmul.f32 1.442695, %v6154_v53 }
0x2362   : > { %8492 = vpow2.f32 %v6155_v54 }
0x2364   : > { %v8489_v57 = vpop.eup %8488 }
0x2365   : > { %v8491_v11 = vpop.eup %8490  ;;  %v6046_v60 = vsel %vm1467_vm6, %v8489_v57, 0.0  ;;  %v6263_v63 = vpop.xlane.xlu1 %6262 }
0x2366   : > { %6047 = vadd.xlane.f32.xlu1 %v6046_v60  ;;  %v5938_v61 = vsel %vm1467_vm6, %v8491_v11, 0.0  ;;  %v6264_v12 = vsub.f32 %v6255_v34, %v6263_v63  ;;  %v8376_v34 = vld [vmem:[%s10717_s30 + $0x70] sm:$0xff]  }
0x2367   : > { %5939 = vadd.xlane.f32.xlu0 %v5938_v61 }
0x2368   : > { %v6265_v0 = vmul.f32 1.442695, %v6264_v12 }
0x236a   : > { %8494 = vpow2.f32 %v6265_v0 }
0x236c   : > { %v8493_v56 = vpop.eup %8492 }
0x236d   : > { %v6157_v62 = vsel %vm1467_vm6, %v8493_v56, 0.0 }
0x236e   : > { %6158 = vadd.xlane.f32.xlu0 %v6157_v62  ;;  %v7481_v62 = vld [vmem:[%s10720_s3 + $0x3] ss:$0 sm:$0xff] }
0x2374   : > { %v8495_v58 = vpop.eup %8494 }
0x2375   : > { %v6267_v3 = vsel %vm1467_vm6, %v8495_v58, 0.0 }
0x2377   : > { %6163 = vrot.lane.b32.xlu1 %v9736_v48, %s10722_s23  ;;  %s10738_s23 = sld [smem:[#allocation34_spill]] }
0x2384   : > { %6053 = vrot.lane.b32.xlu0 %v9736_v48, %s10723_s26  ;;  %s10730_s26 = sld [smem:[#allocation32_spill]] }
0x239b   : > { %6268 = vadd.xlane.f32.xlu1 %v6267_v3 }
0x23ac   : > { %6273 = vrot.lane.b32.xlu1 %v9736_v48, %s10724_s6  ;;  %s10731_s6 = smov %s10730_s26 }
0x23f3   : > { %v6048_v5 = vpop.xlane.xlu1 %6047 }
0x23f4   : > { %v5940_v4 = vpop.xlane.xlu0 %5939 }
0x23f5   : > { %8496 = vrcp.f32 %v5940_v4 }
0x23f6   : > { %8498 = vrcp.f32 %v6048_v5  ;;  %v9820_v5 = vld [vmem:[%s10625_s16] ss:$0 sm:$0xff] }
0x23f7   : > { %v6164_v14 = vpop.permute.xlu1 %6163 }
0x23f8   : > { %v6169_v17 = vand.u32 %v6164_v14, %v8996_v59 }
0x23fb   : > { %v6159_v6 = vpop.xlane.xlu0 %6158 }
0x23fc   : > { %8500 = vrcp.f32 %v6159_v6  ;;  %v2373_v6 = vadd.f32 %v9820_v5, %v9224_v28 }
0x23ff   : > { %v8497_v7 = vpop.eup %8496  ;;  %v6054_v8 = vpop.permute.xlu0 %6053 }
0x2400   : > { %v5942_v2 = vmul.f32 %v8497_v7, %v8491_v11  ;;  %v6059_v9 = vand.u32 %v6054_v8, %v8996_v59  ;;  %v8499_v13 = vpop.eup %8498  ;;  %v9824_v7 = vmax.f32 %v2373_v6, 0.0 }
0x2401   : > { %v6050_v48 = vmul.f32 %v8499_v13, %v8489_v57  ;;  %v2457_v13 = vsub.s32 4, %v8965_v38 }
0x2402   : > { %v5943_v10 = vpack.c.bf16 %v5942_v2, %v5942_v2  ;;  %v9834_v8 = vrot.slane %v9824_v7, %v8988_v49  ;;  %v2419_v2 = vsub.s32 2, %v8965_v38 }
0x2403   : > { %v6051_v15 = vpack.c.bf16 %v6050_v48, %v6050_v48  ;;  %v9858_v48 = vrot.slane %v9824_v7, %v2457_v13 }
0x2404   : > { %8039 = vmatmul.mubr.msk.bf16.vlgmr.msra.gmra.mrb[96].mxu1 %vm1480_vm7, %v5943_v10  ;;  %v9842_v28 = vrot.slane %v9824_v7, %v2419_v2 }
0x2405   : > { %8049 = vmatpush3.bf16.msra.mxu1 %v6059_v9  ;;  %8050 = vmatprep.mubr.msk.bf16.mxu1 %vm8580_vm2, %v8579_v39  ;;  %v2438_v9 = vsub.s32 3, %v8965_v38 }
0x2406   : > { %8060 = vmatprep.subr.bf16.mxu1 %v8579_v39  ;;  %v8501_v16 = vpop.eup %8500 }
0x2407   : > { %v6161_v18 = vmul.f32 %v8501_v16, %v8493_v56  ;;  %v9850_v10 = vrot.slane %v9824_v7, %v2438_v9 }
0x2409   : > { %v6162_v19 = vpack.c.bf16 %v6161_v18, %v6161_v18 }
0x240c   : > { %8051 = vmatmul.mubr.msk.bf16.vlgmr.msra.gmra.mrb[100].mxu1 %vm1480_vm7, %v6051_v15 }
0x240d   : > { %8061 = vmatpush3.bf16.msra.mxu1 %v6169_v17  ;;  %8062 = vmatprep.mubr.msk.bf16.mxu1 %vm8580_vm2, %v8579_v39 }
0x240e   : > { %8072 = vmatprep.subr.bf16.mxu1 %v8579_v39 }
0x2414   : > { %8063 = vmatmul.mubr.msk.bf16.vlgmr.msra.gmra.mrb[104].mxu1 %vm1480_vm7, %v6162_v19  ;;  %v8380_v19 = vld [vmem:[%s10620_s11 + $0xc4] ss:$8 sps:$4 sm:$0xff]  }
0x2415   : > { %8074 = vmatprep.mubr.msk.bf16.mxu1 %vm8580_vm2, %v8579_v39 }
0x2428   : > { %v6269_v20 = vpop.xlane.xlu1 %6268 }
0x2429   : > { %8502 = vrcp.f32 %v6269_v20  ;;  %v8378_v20 = vld [vmem:[%s10620_s11 + $0xc0] ss:$8 sps:$4 sm:$0xff]  }
0x242c   : > { %v6274_v21 = vpop.permute.xlu1 %6273 }
0x242d   : > { %v6279_v22 = vand.u32 %v6274_v21, %v8996_v59  ;;  %v8375_v59 = vld [vmem:[%s10717_s30 + $0x68] sm:$0xff]   ;;  %v8383_v21 = vld [vmem:[%s10620_s11 + $0xd4] ss:$8 sps:$4 sm:$0xff]  }
0x242e   : > { %8081 = vmatpush3.bf16.msra.mxu0 %v8375_v59 }
0x242f   : > { %8073 = vmatpush3.bf16.msra.mxu1 %v6279_v22  ;;  %8082 = vmatprep.subr.bf16.mxu0 %v8579_v39  ;;  %v8381_v22 = vld [vmem:[%s10620_s11 + $0xd0] ss:$8 sps:$4 sm:$0xff]  }
0x2430   : > { %6520 = vmatprep.subr.bf16.mxu1 %v8380_v19 }
0x2432   : > { %8083 = vmatpush3.bf16.msra.mxu0 %v8376_v34 }
0x2433   : > { %v8503_v23 = vpop.eup %8502  ;;  %8084 = vmatprep.subr.bf16.mxu0 %v8579_v39 }
0x2434   : > { %v6271_v24 = vmul.f32 %v8503_v23, %v8495_v58  ;;  %v8384_v23 = vld [vmem:[%s10620_s11 + $0xe0] ss:$8 sps:$4 sm:$0xff]  }
0x2436   : > { %v6272_v25 = vpack.c.bf16 %v6271_v24, %v6271_v24  ;;  %8085 = vmatpush3.bf16.msra.mxu0 %v8377_v45  ;;  %v8386_v24 = vld [vmem:[%s10620_s11 + $0xe4] ss:$8 sps:$4 sm:$0xff]  }
0x2438   : > { %8075 = vmatmul.mubr.msk.bf16.vlgmr.msra.gmra.mrb[108].mxu1 %vm1480_vm7, %v6272_v25  ;;  %v8389_v25 = vld [vmem:[%s10620_s11 + $0xf4] ss:$8 sps:$4 sm:$0xff]  }
0x2439   : > { %6552 = vmatprep.mubr.bf16.mxu1 %v8578_v26  ;;  %6521 = vmatpush1.bf16.msra.mxu1 %v8378_v20 }
0x243a   : > { %6522 = vmatprep.subr.bf16.mxu1 %v8383_v21 }
0x243d   : > { %6523 = vmatpush1.bf16.msra.mxu1 %v8381_v22 }
0x243e   : > { %6524 = vmatprep.subr.bf16.mxu1 %v8386_v24 }
0x2441   : > { %6525 = vmatpush1.bf16.msra.mxu1 %v8384_v23 }
0x2442   : > { %6526 = vmatprep.subr.bf16.mxu1 %v8389_v25 }
0x24d7   : > { %v5984_v27 = vpop.f32.mrb[96].mxu1 }
0x24d8   : > { %v8040_v29 = vpop.f32.mrb[97].mxu1 }
0x24d9   : > { %v5987_v30 = vpop.f32.mrb[98].mxu1  ;;  %v8589_v29 = vmov 1966171168  }
0x24da   : > { %v8041_v31 = vpop.f32.mrb[99].mxu1  ;;  %v2477_v30 = vunpack.c.l.s4 %v8589_v29 }
0x24dc   : > { %v2478_v32 = vunpack.c.0.s8 %v2477_v30 }
0x24df   : > { %v6095_v33 = vpop.f32.mrb[100].mxu1 }
0x24e0   : > { %6322 = vrot.lane.b32.xlu0 %v6095_v33, %s10725_s5  ;;  %v8052_v1 = vpop.f32.mrb[101].mxu1  ;;  %v9904_v33 = vsub.s32 %v2478_v32, %v8965_v38 }
0x24e1   : > { %v6098_v26 = vpop.f32.mrb[102].mxu1 }
0x24e2   : > { %v8053_v36 = vpop.f32.mrb[103].mxu1  ;;  %v2482_v1 = vrot.slane %v9824_v7, %v9904_v33 }
0x24e4   : > { %v2497_v34 = vrot.slane %v2482_v1, %v9904_v33 }
0x24e7   : > { %v6205_v41 = vpop.f32.mrb[104].mxu1 }
0x24e8   : > { %6326 = vrot.lane.b32.xlu1 %v6205_v41, %s10718_s4  ;;  %v8064_v42 = vpop.f32.mrb[105].mxu1  ;;  %v9910_v41 = vrot.slane %v2497_v34, %v8970_v40  ;;  %s10748_s4 = sld [smem:[#allocation35_spill]] }
0x24e9   : > { %v6208_v43 = vpop.f32.mrb[106].mxu1  ;;  %v2490_v42 = vcombine.high %v2482_v1, %v2482_v1 }
0x24ea   : > { %v8065_v44 = vpop.f32.mrb[107].mxu1 }
0x24eb   : > { %v2511_v43 = vrot.slane %v2490_v42, %v9904_v33 }
0x250b   : > { %v6315_v46 = vpop.f32.mrb[108].mxu1 }
0x250c   : > { %6330 = vrot.lane.b32.xlu0 %v6315_v46, %s10719_s0  ;;  %v8076_v47 = vpop.f32.mrb[109].mxu1  ;;  %v9917_v46 = vrot.slane %v2511_v43, %v8970_v40  ;;  %s7564_s0 = sshll.u32 %s10747_s7, 4  ;;  %s8590_s7 = smov [#allocation2]  }
0x250d   : > { %v6318_v50 = vpop.f32.mrb[110].mxu1  ;;  %s8518_s5 = sshll.u32 %s8590_s7, 4  ;;  %s8519_s5 = int_to_ptr.vmem [resolvable:$false] %s8518_s5 }
0x250e   : > { %v8077_v51 = vpop.f32.mrb[111].mxu1  ;;  %s8520_s17 = scalar_lea.vmem %s8519_s5, 32 }
0x2552   : > { %v6323_v52 = vpop.permute.xlu0 %6322 }
0x2553   : > { %v6333_v54 = vsel %vm1420_vm3, %v5984_v27, %v6323_v52  ;;  %v8387_v27 = vld [vmem:[%s10620_s11 + $0xf0] ss:$8 sps:$4 sm:$0xff]   ;;  %v2512_v52 = vcombine.high %v2497_v34, %v2497_v34 }
0x2554   : > { %6527 = vmatpush1.bf16.msra.mxu1 %v8387_v27 }
0x2555   : > { %8090 = vmatprep.subr.bf16.mxu1 %v8579_v39 }
0x255a   : > { %v6327_v53 = vpop.permute.xlu1 %6326 }
0x255b   : > { %v6334_v57 = vsel %vm1875_vm8, %v6333_v54, %v6327_v53 }
0x257e   : > { %v6331_v11 = vpop.permute.xlu0 %6330 }
0x257f   : > { %v6335_v60 = vsel %vm1877_vm9, %v6334_v57, %v6331_v11  ;;  %v9926_v57 = vrot.slane %v2512_v52, %v8970_v40  ;;  %v7485_v52 = vld [vmem:[%s10619_s10 + $0x3] ss:$0 sm:$0xff] }
0x2580   : > { %v6336_v61 = vpack.c.bf16 %v6335_v60, %v6335_v60 }
0x2582   : > { %8087 = vmatmul.mubr.msk.bf16.vlgmr.msra.gmra.mrb[88].mxu0 %vm1370_vm1, %v6336_v61 }
0x2655   : > { %v6407_v56 = vpop.f32.mrb[88].mxu0 }
0x2656   : > { %v6413_v63 = vadd.f32 %v6407_v56, %v9680_v55  ;;  %v8088_v12 = vpop.f32.mrb[89].mxu0  ;;  %v9828_v55 = vrot.slane %v9824_v7, %v8970_v40  ;;  %v2513_v56 = vcombine.high %v2511_v43, %v2511_v43 }
0x2657   : > { %v6410_v0 = vpop.f32.mrb[90].mxu0 }
0x2658   : > { %v9813_v58 = vadd.f32 %v7481_v62, %v6413_v63  ;;  %v8089_v3 = vpop.f32.mrb[91].mxu0  ;;  %v2475_v62 = vcombine.high %v9824_v7, %v9824_v7 }
0x2659   : > { %v9937_v3 = vrot.slane %v2513_v56, %v8970_v40 }
0x265a   : > { %v6427_v4 = vsel %vm1280_vm0, %v9813_v58, 0.0 }
0x265b   : > { %6428 = vadd.xlane.f32.xlu1 %v6427_v4  ;;  %v2489_v4 = vrot.slane %v2475_v62, %v9904_v33 }
0x265d   : > { %v2504_v7 = vrot.slane %v2489_v4, %v9904_v33 }
0x265f   : > { %v9948_v19 = vrot.slane %v2504_v7, %v8970_v40 }
0x266c   : > { %2388 = vbcast.lane.b32.xlu1 %v9828_v55, 264 }
0x2670   : > { %2392 = vbcast.lane.b32.xlu1 %v9828_v55, 272 }
0x2674   : > { %2403 = vbcast.lane.b32.xlu1 %v9834_v8, 256 }
0x2678   : > { %2411 = vbcast.lane.b32.xlu1 %v9834_v8, 272 }
0x267c   : > { %2422 = vbcast.lane.b32.xlu1 %v9842_v28, 256 }
0x2680   : > { %2430 = vbcast.lane.b32.xlu1 %v9842_v28, 272 }
0x2684   : > { %2441 = vbcast.lane.b32.xlu1 %v9850_v10, 256 }
0x2688   : > { %2449 = vbcast.lane.b32.xlu1 %v9850_v10, 272 }
0x268c   : > { %2460 = vbcast.lane.b32.xlu1 %v9858_v48, 256 }
0x2690   : > { %2468 = vbcast.lane.b32.xlu1 %v9858_v48, 272 }
0x26e8   : > { %v6429_v14 = vpop.xlane.xlu1 %6428 }
0x26e9   : > { %v6430_v15 = vmul.f32 0.015625, %v6429_v14 }
0x26eb   : > { %v9863_v16 = vsub.f32 %v9813_v58, %v6430_v15 }
0x26ec   : > { %v2389_v31 = vpop.permute.xlu1 %2388 }
0x26ed   : > { %v6432_v17 = vmul.f32 %v9863_v16, %v9863_v16  ;;  %vm2540_vm10 = vcmp.lt.f32.partialorder %v2389_v31, %v9910_v41 }
0x26ee   : > { %v7157_v45 = vsel %vm2540_vm10, 1.0, %v8579_v39 }
0x26ef   : > { %v6433_v18 = vsel %vm1280_vm0, %v6432_v17, 0.0  ;;  %v2602_v47 = vsel %vm1875_vm8, %v7157_v45, 0.0 }
0x26f0   : > { %6434 = vadd.xlane.f32.xlu0 %v6433_v18  ;;  %v2393_v59 = vpop.permute.xlu1 %2392 }
0x26f1   : > { %vm2541_vm11 = vcmp.lt.f32.partialorder %v2393_v59, %v9910_v41 }
0x26f2   : > { %v7158_v50 = vsel %vm2541_vm11, 1.0, %v8579_v39 }
0x26f3   : > { %v2605_v53 = vsel %vm1875_vm8, %v7158_v50, 0.0 }
0x26f4   : > { %v2404_v26 = vpop.permute.xlu1 %2403 }
0x26f5   : > { %vm2543_vm12 = vcmp.lt.f32.partialorder %v2404_v26, %v9917_v46 }
0x26f6   : > { %v7160_v54 = vsel %vm2543_vm12, 1.0, %v8579_v39 }
0x26f7   : > { %v2611_v11 = vsel %vm1875_vm8, %v7160_v54, 0.0 }
0x26f8   : > { %v2412_v36 = vpop.permute.xlu1 %2411 }
0x26f9   : > { %vm2545_vm13 = vcmp.lt.f32.partialorder %v2412_v36, %v9917_v46 }
0x26fa   : > { %v7162_v61 = vsel %vm2545_vm13, 1.0, %v8579_v39 }
0x26fb   : > { %v2617_v63 = vsel %vm1875_vm8, %v7162_v61, 0.0 }
0x26fc   : > { %v2423_v44 = vpop.permute.xlu1 %2422 }
0x26fd   : > { %vm2547_vm14 = vcmp.lt.f32.partialorder %v2423_v44, %v9926_v57 }
0x26fe   : > { %v7164_v12 = vsel %vm2547_vm14, 1.0, %v8579_v39 }
0x26ff   : > { %v2623_v6 = vsel %vm1875_vm8, %v7164_v12, 0.0 }
0x2700   : > { %v2431_v51 = vpop.permute.xlu1 %2430 }
0x2701   : > { %vm2549_vm15 = vcmp.lt.f32.partialorder %v2431_v51, %v9926_v57 }
0x2702   : > { %v7166_v14 = vsel %vm2549_vm15, 1.0, %v8579_v39 }
0x2703   : > { %v2629_v15 = vsel %vm1875_vm8, %v7166_v14, 0.0 }
0x2704   : > { %v2442_v60 = vpop.permute.xlu1 %2441 }
0x2705   : > { %vm2551_vm0 = vcmp.lt.f32.partialorder %v2442_v60, %v9937_v3 }
0x2706   : > { %2384 = vbcast.lane.b32.xlu0 %v9828_v55, 256  ;;  %v7168_v18 = vsel %vm2551_vm0, 1.0, %v8579_v39 }
0x2707   : > { %v2635_v20 = vsel %vm1875_vm8, %v7168_v18, 0.0 }
0x2708   : > { %v2450_v0 = vpop.permute.xlu1 %2449 }
0x2709   : > { %vm2553_vm3 = vcmp.lt.f32.partialorder %v2450_v0, %v9937_v3 }
0x270a   : > { %2396 = vbcast.lane.b32.xlu0 %v9828_v55, 280  ;;  %v7170_v21 = vsel %vm2553_vm3, 1.0, %v8579_v39  ;;  %vm6762_vm3 = vcmask 516096  }
0x270b   : > { %v2641_v23 = vsel %vm1875_vm8, %v7170_v21, 0.0 }
0x270c   : > { %v2461_v17 = vpop.permute.xlu1 %2460 }
0x270d   : > { %vm2555_vm4 = vcmp.lt.f32.partialorder %v2461_v17, %v9948_v19 }
0x270e   : > { %2407 = vbcast.lane.b32.xlu0 %v9834_v8, 264  ;;  %v7172_v24 = vsel %vm2555_vm4, 1.0, %v8579_v39 }
0x270f   : > { %v2647_v25 = vsel %vm1875_vm8, %v7172_v24, 0.0  ;;  %v8398_v24 = vld [vmem:[%s10622_s13 + $0x1e0] sm:$0xff]  }
0x2710   : > { %v2469_v22 = vpop.permute.xlu1 %2468 }
0x2711   : > { %vm2557_vm5 = vcmp.lt.f32.partialorder %v2469_v22, %v9948_v19  ;;  %v8396_v22 = vld [vmem:[%s10622_s13 + $0x1d8] sm:$0xff]  }
0x2712   : > { %2415 = vbcast.lane.b32.xlu0 %v9834_v8, 280  ;;  %v7174_v27 = vsel %vm2557_vm5, 1.0, %v8579_v39 }
0x2713   : > { %v2653_v29 = vsel %vm1875_vm8, %v7174_v27, 0.0  ;;  %v8400_v27 = vld [vmem:[%s10622_s13 + $0x1e8] sm:$0xff]  }
0x2716   : > { %2426 = vbcast.lane.b32.xlu0 %v9842_v28, 264 }
0x271a   : > { %2434 = vbcast.lane.b32.xlu0 %v9842_v28, 280 }
0x271e   : > { %2445 = vbcast.lane.b32.xlu0 %v9850_v10, 264 }
0x2722   : > { %2453 = vbcast.lane.b32.xlu0 %v9850_v10, 280 }
0x2726   : > { %2464 = vbcast.lane.b32.xlu0 %v9858_v48, 264 }
0x272a   : > { %2472 = vbcast.lane.b32.xlu0 %v9858_v48, 280 }
0x2749   : > { %2603 = vadd.xlane.f32.xlu0 %v2602_v47 }
0x274d   : > { %2606 = vadd.xlane.f32.xlu0 %v2605_v53 }
0x2751   : > { %2612 = vadd.xlane.f32.xlu0 %v2611_v11 }
0x2755   : > { %2618 = vadd.xlane.f32.xlu0 %v2617_v63 }
0x2759   : > { %2624 = vadd.xlane.f32.xlu0 %v2623_v6 }
0x275d   : > { %2630 = vadd.xlane.f32.xlu0 %v2629_v15 }
0x2761   : > { %2636 = vadd.xlane.f32.xlu0 %v2635_v20 }
0x2765   : > { %2642 = vadd.xlane.f32.xlu0 %v2641_v23  ;;  %v8397_v23 = vld [vmem:[%s10622_s13 + $0x198] sm:$0xff]  }
0x2769   : > { %2648 = vadd.xlane.f32.xlu0 %v2647_v25  ;;  %v8399_v25 = vld [vmem:[%s10622_s13 + $0x1a0] sm:$0xff]  }
0x276d   : > { %2654 = vadd.xlane.f32.xlu0 %v2653_v29  ;;  %v8401_v29 = vld [vmem:[%s10622_s13 + $0x1a8] sm:$0xff]  }
0x277d   : > { %v6435_v30 = vpop.xlane.xlu0 %6434 }
0x277e   : > { %v6436_v31 = vmul.f32 0.015625, %v6435_v30  ;;  %v8402_v30 = vld [vmem:[%s10622_s13 + $0x1f0] sm:$0xff]  }
0x2780   : > { %v6437_v32 = vadd.f32 1e-12, %v6436_v31  ;;  %v8403_v31 = vld [vmem:[%s10622_s13 + $0x1b0] sm:$0xff]  }
0x2781   : > { %v2385_v59 = vpop.permute.xlu0 %2384 }
0x2782   : > { %8504 = vrsqrt.f32 %v6437_v32  ;;  %vm2539_vm6 = vcmp.lt.f32.partialorder %v2385_v59, %v9910_v41  ;;  %v8404_v32 = vld [vmem:[%s10622_s13 + $0x1f8] sm:$0xff]  }
0x2783   : > { %2684 = vbcast.lane.b32.xlu0 %v9828_v55, 256  ;;  %v7156_v1 = vsel %vm2539_vm6, 1.0, %v8579_v39  ;;  %v8405_v59 = vld [vmem:[%s10622_s13 + $0x1b8] sm:$0xff]  }
0x2784   : > { %v2599_v26 = vsel %vm1875_vm8, %v7156_v1, 0.0  ;;  %v7494_v1 = vld [vmem:[%s10621_s12 + $0x6] sm:$0x3] }
0x2785   : > { %2600 = vadd.xlane.f32.xlu1 %v2599_v26  ;;  %v2397_v34 = vpop.permute.xlu0 %2396  ;;  %v6470_v26 = vrot.slane %v7494_v1, %v8970_v40 }
0x2786   : > { %vm2542_vm7 = vcmp.lt.f32.partialorder %v2397_v34, %v9910_v41  ;;  %v7484_v41 = vld [vmem:[%s10618_s9 + $0x3] ss:$0 sm:$0xff]  ;;  %v6474_v34 = vrot.slane %v7494_v1, %v8988_v49 }
0x2787   : > { %2696 = vbcast.lane.b32.xlu0 %v9828_v55, 280  ;;  %v7159_v36 = vsel %vm2542_vm7, 1.0, %v8579_v39 }
0x2788   : > { %v2608_v42 = vsel %vm1875_vm8, %v7159_v36, 0.0 }
0x2789   : > { %2609 = vadd.xlane.f32.xlu1 %v2608_v42  ;;  %v2408_v43 = vpop.permute.xlu0 %2407 }
0x278a   : > { %vm2544_vm9 = vcmp.lt.f32.partialorder %v2408_v43, %v9917_v46 }
0x278b   : > { %2707 = vbcast.lane.b32.xlu0 %v9834_v8, 264  ;;  %v7161_v44 = vsel %vm2544_vm9, 1.0, %v8579_v39 }
0x278c   : > { %v8505_v45 = vpop.eup %8504  ;;  %v2614_v47 = vsel %vm1875_vm8, %v7161_v44, 0.0 }
0x278d   : > { %v6439_v50 = vmul.f32 %v8505_v45, %v9863_v16  ;;  %2615 = vadd.xlane.f32.xlu1 %v2614_v47  ;;  %v2416_v51 = vpop.permute.xlu0 %2415 }
0x278e   : > { %vm2546_vm10 = vcmp.lt.f32.partialorder %v2416_v51, %v9917_v46 }
0x278f   : > { %2715 = vbcast.lane.b32.xlu0 %v9834_v8, 280  ;;  %v7163_v53 = vsel %vm2546_vm10, 1.0, %v8579_v39  ;;  %v6446_v54 = vmul.f32 %v7484_v41, %v6439_v50 }
0x2790   : > { %v2620_v11 = vsel %vm1875_vm8, %v7163_v53, 0.0 }
0x2791   : > { %2621 = vadd.xlane.f32.xlu1 %v2620_v11  ;;  %v2427_v60 = vpop.permute.xlu0 %2426  ;;  %v6453_v61 = vadd.f32 %v7485_v52, %v6446_v54 }
0x2792   : > { %vm2548_vm11 = vcmp.lt.f32.partialorder %v2427_v60, %v9926_v57 }
0x2793   : > { %2726 = vbcast.lane.b32.xlu0 %v9842_v28, 264  ;;  %v6454_v16 = vpack.c.bf16 %v6453_v61, %v6453_v61  ;;  %v7165_v46 = vsel %vm2548_vm11, 1.0, %v8579_v39 }
0x2794   : > { %v2626_v56 = vsel %vm1875_vm8, %v7165_v46, 0.0 }
0x2795   : > { %7503 = vmatmul.mubr.msk.bf16.vlgmr.msra.gmra.mrb[112].mxu1 %vm1370_vm1, %v6454_v16  ;;  %2627 = vadd.xlane.f32.xlu1 %v2626_v56  ;;  %v2435_v62 = vpop.permute.xlu0 %2434 }
0x2796   : > { %vm2550_vm12 = vcmp.lt.f32.partialorder %v2435_v62, %v9926_v57  ;;  %8098 = vmatprep.mubr.msk.bf16.mxu1 %vm8580_vm2, %v8579_v39 }
0x2797   : > { %2734 = vbcast.lane.b32.xlu0 %v9842_v28, 280  ;;  %v7167_v63 = vsel %vm2550_vm12, 1.0, %v8579_v39 }
0x2798   : > { %v2632_v12 = vsel %vm1875_vm8, %v7167_v63, 0.0 }
0x2799   : > { %2633 = vadd.xlane.f32.xlu1 %v2632_v12  ;;  %v2446_v0 = vpop.permute.xlu0 %2445 }
0x279a   : > { %vm2552_vm13 = vcmp.lt.f32.partialorder %v2446_v0, %v9937_v3 }
0x279b   : > { %2745 = vbcast.lane.b32.xlu0 %v9850_v10, 264  ;;  %v7169_v4 = vsel %vm2552_vm13, 1.0, %v8579_v39 }
0x279c   : > { %v2638_v6 = vsel %vm1875_vm8, %v7169_v4, 0.0 }
0x279d   : > { %2639 = vadd.xlane.f32.xlu1 %v2638_v6  ;;  %v2454_v57 = vpop.permute.xlu0 %2453 }
0x279e   : > { %vm2554_vm14 = vcmp.lt.f32.partialorder %v2454_v57, %v9937_v3 }
0x279f   : > { %2753 = vbcast.lane.b32.xlu0 %v9850_v10, 280  ;;  %v7171_v14 = vsel %vm2554_vm14, 1.0, %v8579_v39 }
0x27a0   : > { %v2644_v7 = vsel %vm1875_vm8, %v7171_v14, 0.0 }
0x27a1   : > { %2645 = vadd.xlane.f32.xlu1 %v2644_v7  ;;  %v2465_v15 = vpop.permute.xlu0 %2464 }
0x27a2   : > { %vm2556_vm15 = vcmp.lt.f32.partialorder %v2465_v15, %v9948_v19 }
0x27a3   : > { %2764 = vbcast.lane.b32.xlu0 %v9858_v48, 264  ;;  %v7173_v17 = vsel %vm2556_vm15, 1.0, %v8579_v39 }
0x27a4   : > { %v2650_v18 = vsel %vm1875_vm8, %v7173_v17, 0.0 }
0x27a5   : > { %2651 = vadd.xlane.f32.xlu1 %v2650_v18  ;;  %v2473_v20 = vpop.permute.xlu0 %2472 }
0x27a6   : > { %vm2558_vm0 = vcmp.lt.f32.partialorder %v2473_v20, %v9948_v19  ;;  %v8395_v19 = vld [vmem:[%s10622_s13 + $0x190] sm:$0xff]  }
0x27a7   : > { %2772 = vbcast.lane.b32.xlu0 %v9858_v48, 280  ;;  %v7175_v3 = vsel %vm2558_vm0, 1.0, %v8579_v39 }
0x27a8   : > { %v2656_v21 = vsel %vm1875_vm8, %v7175_v3, 0.0  ;;  %v7553_v3 = vld [vmem:[%s10623_s14 + $0x3] ss:$0 sm:$0xff] }
0x27a9   : > { %2657 = vadd.xlane.f32.xlu1 %v2656_v21 }
0x27ba   : > { %2688 = vbcast.lane.b32.xlu1 %v9828_v55, 264 }
0x27be   : > { %2692 = vbcast.lane.b32.xlu1 %v9828_v55, 272  ;;  %v8390_v55 = vld [vmem:[%s10622_s13 + $0x1c0] sm:$0xff]  }
0x27bf   : > { %7794 = vmatprep.subr.bf16.mxu0 %v8390_v55 }
0x27c2   : > { %2703 = vbcast.lane.b32.xlu1 %v9834_v8, 256 }
0x27c6   : > { %2711 = vbcast.lane.b32.xlu1 %v9834_v8, 272  ;;  %v8391_v8 = vld [vmem:[%s10622_s13 + $0x180] sm:$0xff]  }
0x27c7   : > { %7795 = vmatpush3.bf16.msra.mxu0 %v8391_v8 }
0x27ca   : > { %2722 = vbcast.lane.b32.xlu1 %v9842_v28, 256 }
0x27ce   : > { %2730 = vbcast.lane.b32.xlu1 %v9842_v28, 272  ;;  %v8392_v28 = vld [vmem:[%s10622_s13 + $0x1c8] sm:$0xff]  }
0x27cf   : > { %7796 = vmatprep.subr.bf16.mxu0 %v8392_v28  ;;  %v4103_v28 = vadd.f32 %v9820_v5, %v9478_v35 }
0x27d2   : > { %2741 = vbcast.lane.b32.xlu1 %v9850_v10, 256 }
0x27d6   : > { %2749 = vbcast.lane.b32.xlu1 %v9850_v10, 272  ;;  %v8393_v10 = vld [vmem:[%s10622_s13 + $0x188] sm:$0xff]  }
0x27d7   : > { %7797 = vmatpush3.bf16.msra.mxu0 %v8393_v10  ;;  %v10079_v10 = vmax.f32 %v4103_v28, 0.0 }
0x27d9   : > { %v10102_v5 = vrot.slane %v10079_v10, %v2419_v2  ;;  %v10120_v2 = vrot.slane %v10079_v10, %v2457_v13 }
0x27da   : > { %2760 = vbcast.lane.b32.xlu1 %v9858_v48, 256 }
0x27db   : > { %10726 = vst [vmem:[#allocation16_spill] sm:$0xff] %v10102_v5  ;;  %10728 = vst [vmem:[#allocation18_spill] sm:$0xff] %v10120_v2 }
0x27de   : > { %2768 = vbcast.lane.b32.xlu1 %v9858_v48, 272  ;;  %v8394_v48 = vld [vmem:[%s10622_s13 + $0x1d0] sm:$0xff]  }
0x27df   : > { %7798 = vmatprep.subr.bf16.mxu0 %v8394_v48  ;;  %v10083_v48 = vrot.slane %v10079_v10, %v8970_v40 }
0x27e0   : > { %7799 = vmatpush3.bf16.msra.mxu0 %v8395_v19  ;;  %v10086_v19 = vpop.xlane.xlu0 %2603 }
0x27e1   : > { %7800 = vmatprep.subr.bf16.mxu0 %v8396_v22 }
0x27e4   : > { %7801 = vmatpush3.bf16.msra.mxu0 %v8397_v23  ;;  %v10093_v22 = vpop.xlane.xlu0 %2606 }
0x27e5   : > { %7802 = vmatprep.subr.bf16.mxu0 %v8398_v24 }
0x27e8   : > { %7803 = vmatpush3.bf16.msra.mxu0 %v8399_v25  ;;  %v10097_v35 = vpop.xlane.xlu0 %2612 }
0x27e9   : > { %7804 = vmatprep.subr.bf16.mxu0 %v8400_v27 }
0x27ec   : > { %7805 = vmatpush3.bf16.msra.mxu0 %v8401_v29  ;;  %v10105_v23 = vpop.xlane.xlu0 %2618 }
0x27ed   : > { %7806 = vmatprep.subr.bf16.mxu0 %v8402_v30 }
0x27f0   : > { %7807 = vmatpush3.bf16.msra.mxu0 %v8403_v31  ;;  %v10114_v24 = vpop.xlane.xlu0 %2624 }
0x27f1   : > { %7808 = vmatprep.subr.bf16.mxu0 %v8404_v32 }
0x27f4   : > { %7809 = vmatpush3.bf16.msra.mxu0 %v8405_v59  ;;  %v10122_v25 = vpop.xlane.xlu0 %2630 }
0x27f8   : > { %v10126_v27 = vpop.xlane.xlu0 %2636 }
0x2868   : > { %v6554_v36 = vpop.f32.mrb[112].mxu1 }
0x2869   : > { %v6555_v42 = vadd.f32 %v6554_v36, %v6470_v26  ;;  %v6556_v43 = vpop.f32.mrb[113].mxu1 }
0x286a   : > { %v6557_v44 = vadd.f32 %v6556_v43, %v6474_v34  ;;  %v6558_v45 = vpop.f32.mrb[114].mxu1  ;;  %v10154_v43 = vrot.slane %v10079_v10, %v9904_v33 }
0x286b   : > { %v6561_v47 = vmul.f32 %v6555_v42, %v6555_v42  ;;  %v6559_v41 = vpop.f32.mrb[115].mxu1 }
0x286c   : > { %v6562_v50 = vmul.f32 %v6557_v44, %v6557_v44  ;;  %v10160_v45 = vrot.slane %v10154_v43, %v9904_v33 }
0x286d   : > { %v6563_v51 = vmul.f32 %v6561_v47, %v6555_v42 }
0x286e   : > { %v6564_v52 = vmul.f32 %v6562_v50, %v6557_v44 }
0x286f   : > { %v6565_v53 = vmul.f32 0.044715, %v6563_v51  ;;  %v10166_v51 = vrot.slane %v10160_v45, %v8970_v40 }
0x2870   : > { %v6566_v54 = vmul.f32 0.044715, %v6564_v52 }
0x2871   : > { %v6567_v11 = vadd.f32 %v6565_v53, %v6555_v42 }
0x2872   : > { %v6568_v60 = vadd.f32 %v6566_v54, %v6557_v44 }
0x2873   : > { %v6569_v61 = vmul.f32 0.7978846, %v6567_v11 }
0x2874   : > { %v6570_v16 = vmul.f32 0.7978846, %v6568_v60 }
0x2875   : > { %8506 = vtanh.f32 %v6569_v61 }
0x2876   : > { %8508 = vtanh.f32 %v6570_v16 }
0x287f   : > { %v8507_v46 = vpop.eup %8506 }
0x2880   : > { %v8509_v56 = vpop.eup %8508  ;;  %v6573_v62 = vadd.f32 1.0, %v8507_v46 }
0x2881   : > { %v6574_v63 = vadd.f32 1.0, %v8509_v56  ;;  %v8406_v56 = vld [vmem:[%s10730_s26] sm:$0xff]   ;;  %s10746_s26 = sld [smem:[#allocation6_spill]] }
0x2882   : > { %v6575_v12 = vmul.f32 0.5, %v6573_v62  ;;  %v10182_v62 = vpop.xlane.xlu1 %2600  ;;  %8091 = vmatpush3.bf16.msra.mxu1 %v8406_v56 }
0x2883   : > { %v6576_v0 = vmul.f32 0.5, %v6574_v63  ;;  %8092 = vmatprep.subr.bf16.mxu1 %v8579_v39  ;;  %v8407_v63 = vld [vmem:[%s10731_s6 + $0x8] sm:$0xff]  }
0x2884   : > { %v6577_v4 = vmul.f32 %v6575_v12, %v6555_v42 }
0x2885   : > { %v6578_v6 = vmul.f32 %v6576_v0, %v6557_v44  ;;  %v8408_v0 = vld [vmem:[%s10731_s6 + $0x10] sm:$0xff]  }
0x2886   : > { %v6579_v14 = vpack.c.bf16 %v6577_v4, %v6577_v4  ;;  %8093 = vmatpush3.bf16.msra.mxu1 %v8407_v63  ;;  %v10189_v12 = vpop.xlane.xlu1 %2609  ;;  %v8409_v4 = vld [vmem:[%s10731_s6 + $0x18] sm:$0xff]  }
0x2887   : > { %v6580_v57 = vpack.c.bf16 %v6578_v6, %v6578_v6  ;;  %8094 = vmatprep.subr.bf16.mxu1 %v8579_v39  ;;  %s736_s27 = sand.u32 1, %s10746_s26  }
0x2888   : > { %s737_s19 = scalar_lea.vmem [#allocation2], %s736_s27 }
0x2889   : > { %6742 = vmatprep.mubr.bf16.mxu0 %v6580_v57 }
0x288a   : > { %6743 = vmatmul.mubr.bf16.vlgmr.msra.gmra.mrb[92].mxu0 %v6579_v14  ;;  %8095 = vmatpush3.bf16.msra.mxu1 %v8408_v0  ;;  %v10201_v6 = vpop.xlane.xlu1 %2615 }
0x288b   : > { %8096 = vmatprep.subr.bf16.mxu1 %v8579_v39 }
0x288e   : > { %8097 = vmatpush3.bf16.msra.mxu1 %v8409_v4  ;;  %v10205_v57 = vpop.xlane.xlu1 %2621 }
0x288f   : > { %8102 = vmatprep.subr.bf16.mxu1 %v8579_v39 }
0x2892   : > { %v10209_v14 = vpop.xlane.xlu1 %2627 }
0x295d   : > { %v7810_v7 = vpop.f32.mrb[92].mxu0 }
0x295e   : > { %v7811_v15 = vpop.f32.mrb[93].mxu0 }
0x295f   : > { %v7812_v17 = vadd.f32 %v7811_v15, %v7810_v7  ;;  %v7813_v18 = vpop.f32.mrb[94].mxu0  ;;  %v10212_v7 = vpop.xlane.xlu1 %2633 }
0x2960   : > { %v7814_v20 = vpop.f32.mrb[95].mxu0 }
0x2961   : > { %v6750_v21 = vadd.f32 %v7812_v17, %v9813_v58  ;;  %v10091_v58 = vrot.slane %v10079_v10, %v8988_v49  ;;  %v10111_v49 = vrot.slane %v10079_v10, %v2438_v9  ;;  %v10128_v9 = vpop.xlane.xlu0 %2642 }
0x2963   : > { %v6759_v55 = vadd.f32 %v7553_v3, %v6750_v21  ;;  %10727 = vst [vmem:[#allocation17_spill] sm:$0xff] %v10111_v49  ;;  %v10215_v15 = vpop.xlane.xlu1 %2639 }
0x2965   : > { %v6763_v8 = vsel %vm6762_vm3, %v6759_v55, 0.0  ;;  %v10130_v29 = vpop.xlane.xlu0 %2648 }
0x2966   : > { %6764 = vadd.xlane.f32.xlu0 %v6763_v8 }
0x2967   : > { %v10217_v17 = vpop.xlane.xlu1 %2645 }
0x2968   : > { %10732 = vst [vmem:[#allocation20_spill] sm:$0xff] %v10217_v17 }
0x2969   : > { %v10132_v30 = vpop.xlane.xlu0 %2654 }
0x296b   : > { %v10219_v18 = vpop.xlane.xlu1 %2651 }
0x296d   : > { %v10134_v31 = vpop.permute.xlu0 %2684 }
0x296f   : > { %v10221_v20 = vpop.xlane.xlu1 %2657 }
0x2971   : > { %v10136_v32 = vpop.permute.xlu0 %2696 }
0x2973   : > { %v10223_v3 = vpop.permute.xlu1 %2688 }
0x2975   : > { %v10138_v13 = vpop.permute.xlu0 %2707 }
0x2977   : > { %v10225_v21 = vpop.permute.xlu1 %2692 }
0x2979   : > { %v10140_v59 = vpop.permute.xlu0 %2715 }
0x297c   : > { %4114 = vbcast.lane.b32.xlu0 %v10083_v48, 256 }
0x297d   : > { %v10142_v1 = vpop.permute.xlu0 %2726 }
0x2980   : > { %4122 = vbcast.lane.b32.xlu0 %v10083_v48, 272 }
0x2981   : > { %v10144_v26 = vpop.permute.xlu0 %2734 }
0x2984   : > { %4133 = vbcast.lane.b32.xlu0 %v10091_v58, 256 }
0x2985   : > { %v10146_v34 = vpop.permute.xlu0 %2745 }
0x2988   : > { %4141 = vbcast.lane.b32.xlu0 %v10091_v58, 272 }
0x2989   : > { %v10148_v36 = vpop.permute.xlu0 %2753 }
0x298a   : > { %10729 = vst [vmem:[#allocation19_spill] sm:$0xff] %v10148_v36 }
0x298c   : > { %4152 = vbcast.lane.b32.xlu0 %v10102_v5, 256 }
0x298d   : > { %v10150_v42 = vpop.permute.xlu0 %2764 }
0x2990   : > { %4160 = vbcast.lane.b32.xlu0 %v10102_v5, 272 }
0x2991   : > { %v10156_v44 = vpop.permute.xlu0 %2772 }
0x2994   : > { %4171 = vbcast.lane.b32.xlu0 %v10111_v49, 256 }
0x2998   : > { %4179 = vbcast.lane.b32.xlu0 %v10111_v49, 272 }
0x299c   : > { %4190 = vbcast.lane.b32.xlu0 %v10120_v2, 256 }
0x29a0   : > { %4198 = vbcast.lane.b32.xlu0 %v10120_v2, 272 }
0x29f3   : > { %v6765_v47 = vpop.xlane.xlu0 %6764 }
0x29f4   : > { %v6766_v41 = vmul.f32 0.015625, %v6765_v47 }
0x29f6   : > { %v10162_v50 = vsub.f32 %v6759_v55, %v6766_v41  ;;  %v10227_v55 = vpop.permute.xlu1 %2703 }
0x29f7   : > { %v4115_v52 = vpop.permute.xlu0 %4114 }
0x29f8   : > { %vm4269_vm4 = vcmp.lt.f32.partialorder %v4115_v52, %v10166_v51  ;;  %v6768_v53 = vmul.f32 %v10162_v50, %v10162_v50 }
0x29f9   : > { %v7299_v54 = vsel %vm4269_vm4, 1.0, %v8579_v39 }
0x29fa   : > { %v6769_v11 = vsel %vm6762_vm3, %v6768_v53, 0.0  ;;  %v4329_v60 = vsel %vm1875_vm8, %v7299_v54, 0.0  ;;  %v10229_v8 = vpop.permute.xlu1 %2711 }
0x29fb   : > { %6770 = vadd.xlane.f32.xlu1 %v6769_v11  ;;  %4330 = vadd.xlane.f32.xlu0 %v4329_v60  ;;  %v4123_v61 = vpop.permute.xlu0 %4122  ;;  %v4220_v11 = vcombine.high %v10154_v43, %v10154_v43  ;;  %v4242_v43 = vcombine.high %v10160_v45, %v10160_v45 }
0x29fc   : > { %vm4271_vm5 = vcmp.lt.f32.partialorder %v4123_v61, %v10166_v51 }
0x29fd   : > { %v7301_v16 = vsel %vm4271_vm5, 1.0, %v8579_v39 }
0x29fe   : > { %v4335_v46 = vsel %vm1875_vm8, %v7301_v16, 0.0  ;;  %v10231_v28 = vpop.permute.xlu1 %2722  ;;  %v4241_v16 = vrot.slane %v4220_v11, %v9904_v33 }
0x29ff   : > { %4336 = vadd.xlane.f32.xlu0 %v4335_v46  ;;  %v4134_v53 = vpop.permute.xlu0 %4133 }
0x2a00   : > { %v4251_v0 = vrot.slane %v4241_v16, %v8970_v40 }
0x2a02   : > { %v10233_v47 = vpop.permute.xlu1 %2730  ;;  %vm4273_vm6 = vcmp.lt.f32.partialorder %v4134_v53, %v4251_v0 }
0x2a03   : > { %v4142_v60 = vpop.permute.xlu0 %4141  ;;  %v7303_v11 = vsel %vm4273_vm6, 1.0, %v8579_v39 }
0x2a04   : > { %vm4275_vm9 = vcmp.lt.f32.partialorder %v4142_v60, %v4251_v0 }
0x2a05   : > { %v7305_v45 = vsel %vm4275_vm9, 1.0, %v8579_v39 }
0x2a06   : > { %v10235_v41 = vpop.permute.xlu1 %2741 }
0x2a07   : > { %v4153_v56 = vpop.permute.xlu0 %4152 }
0x2a0a   : > { %v10237_v52 = vpop.permute.xlu1 %2749 }
0x2a0c   : > { %4118 = vbcast.lane.b32.xlu1 %v10083_v48, 264 }
0x2a0e   : > { %v10239_v54 = vpop.permute.xlu1 %2760 }
0x2a10   : > { %4126 = vbcast.lane.b32.xlu1 %v10083_v48, 280 }
0x2a12   : > { %v10243_v61 = vpop.permute.xlu1 %2768 }
0x2a14   : > { %4137 = vbcast.lane.b32.xlu1 %v10091_v58, 264 }
0x2a18   : > { %4145 = vbcast.lane.b32.xlu1 %v10091_v58, 280 }
0x2a1c   : > { %4156 = vbcast.lane.b32.xlu1 %v10102_v5, 264 }
0x2a20   : > { %4164 = vbcast.lane.b32.xlu1 %v10102_v5, 280 }
0x2a24   : > { %4175 = vbcast.lane.b32.xlu1 %v10111_v49, 264 }
0x2a28   : > { %4183 = vbcast.lane.b32.xlu1 %v10111_v49, 280 }
0x2a2c   : > { %4194 = vbcast.lane.b32.xlu1 %v10120_v2, 264 }
0x2a30   : > { %4202 = vbcast.lane.b32.xlu1 %v10120_v2, 280  ;;  %v4161_v2 = vpop.permute.xlu0 %4160 }
0x2a88   : > { %v6771_v46 = vpop.xlane.xlu1 %6770 }
0x2a89   : > { %v6772_v63 = vmul.f32 0.015625, %v6771_v46 }
0x2a8b   : > { %v6773_v4 = vadd.f32 1e-12, %v6772_v63  ;;  %v4255_v63 = vrot.slane %v4242_v43, %v8970_v40  ;;  %v6760_v43 = vld [vmem:[%s10733_s21] sm:$0x1]  ;;  %s10744_s21 = sld [smem:[#allocation33_spill]] }
0x2a8c   : > { %v4119_v37 = vpop.permute.xlu1 %4118 }
0x2a8d   : > { %8510 = vrsqrt.f32 %v6773_v4  ;;  %vm4270_vm7 = vcmp.lt.f32.partialorder %v4119_v37, %v10166_v51  ;;  %v4341_v4 = vsel %vm1875_vm8, %v7303_v11, 0.0  ;;  %vm4277_vm11 = vcmp.lt.f32.partialorder %v4153_v56, %v4255_v63 }
0x2a8e   : > { %v7300_v38 = vsel %vm4270_vm7, 1.0, %v8579_v39  ;;  %v7307_v11 = vsel %vm4277_vm11, 1.0, %v8579_v39  ;;  %vm4279_vm14 = vcmp.lt.f32.partialorder %v4161_v2, %v4255_v63  ;;  %vm2659_vm11 = vcmp.lt.f32.partialorder %v10182_v62, 8.0 }
0x2a8f   : > { %v4332_v49 = vsel %vm1875_vm8, %v7300_v38, 0.0  ;;  %v4172_v38 = vpop.permute.xlu0 %4171  ;;  %v4353_v17 = vsel %vm1875_vm8, %v7307_v11, 0.0 }
0x2a90   : > { %4333 = vadd.xlane.f32.xlu1 %v4332_v49  ;;  %v4127_v46 = vpop.permute.xlu1 %4126 }
0x2a91   : > { %vm4272_vm10 = vcmp.lt.f32.partialorder %v4127_v46, %v10166_v51  ;;  %v4347_v46 = vsel %vm1875_vm8, %v7305_v45, 0.0 }
0x2a92   : > { %v7302_v53 = vsel %vm4272_vm10, 1.0, %v8579_v39 }
0x2a93   : > { %v4338_v37 = vsel %vm1875_vm8, %v7302_v53, 0.0  ;;  %v4243_v53 = vcombine.high %v4241_v16, %v4241_v16  ;;  %v4180_v36 = vpop.permute.xlu0 %4179 }
0x2a94   : > { %v4138_v5 = vpop.permute.xlu1 %4137  ;;  %4339 = vadd.xlane.f32.xlu0 %v4338_v37  ;;  %4342 = vadd.xlane.f32.xlu1 %v4341_v4  ;;  %v4205_v37 = vcombine.high %v10079_v10, %v10079_v10  ;;  %v6761_v4 = vld [vmem:[%s10734_s8] sm:$0x1]  ;;  %s10750_s8 = sld [smem:[#allocation37_spill]] }
0x2a95   : > { %vm4274_vm12 = vcmp.lt.f32.partialorder %v4138_v5, %v4251_v0  ;;  %v4259_v10 = vrot.slane %v4243_v53, %v8970_v40 }
0x2a96   : > { %v7304_v49 = vsel %vm4274_vm12, 1.0, %v8579_v39  ;;  %vm2660_vm12 = vcmp.lt.f32.partialorder %v10086_v19, 8.0 }
0x2a97   : > { %v8511_v60 = vpop.eup %8510  ;;  %v4344_v51 = vsel %vm1875_vm8, %v7304_v49, 0.0  ;;  %vm4281_vm0 = vcmp.lt.f32.partialorder %v4172_v38, %v4259_v10  ;;  %vm4283_vm4 = vcmp.lt.f32.partialorder %v4180_v36, %v4259_v10 }
0x2a98   : > { %v6775_v56 = vmul.f32 %v8511_v60, %v10162_v50  ;;  %v4146_v5 = vpop.permute.xlu1 %4145  ;;  %4345 = vadd.xlane.f32.xlu0 %v4344_v51  ;;  %4348 = vadd.xlane.f32.xlu1 %v4347_v46  ;;  %v4219_v50 = vrot.slane %v4205_v37, %v9904_v33  ;;  %v7309_v51 = vsel %vm4279_vm14, 1.0, %v8579_v39  ;;  %v4191_v37 = vpop.permute.xlu0 %4190  ;;  %vm2661_vm14 = vcmp.lt.f32.partialorder %v10093_v22, 8.0 }
0x2a99   : > { %vm4276_vm13 = vcmp.lt.f32.partialorder %v4146_v5, %v4251_v0  ;;  %v4359_v53 = vsel %vm1875_vm8, %v7309_v51, 0.0 }
0x2a9a   : > { %v7306_v45 = vsel %vm4276_vm13, 1.0, %v8579_v39  ;;  %v6776_v49 = vmul.f32 %v6775_v56, %v6760_v43  ;;  %v4234_v56 = vrot.slane %v4219_v50, %v9904_v33  ;;  %vm2668_vm13 = vcmp.lt.f32.partialorder %v10209_v14, 8.0  ;;  %v8413_v14 = vld [vmem:[%s10738_s23 + $0x18] sm:$0xff]   ;;  %s10567_s28 = scalar_lea.hbm %s10750_s8, %s7564_s0 }
0x2a9b   : > { %v4350_v16 = vsel %vm1875_vm8, %v7306_v45, 0.0 }
0x2a9c   : > { %v4157_v60 = vpop.permute.xlu1 %4156  ;;  %4351 = vadd.xlane.f32.xlu0 %v4350_v16  ;;  %4354 = vadd.xlane.f32.xlu1 %v4353_v17  ;;  %v6777_v0 = vadd.f32 %v6776_v49, %v6761_v4  ;;  %v7311_v17 = vsel %vm4281_vm0, 1.0, %v8579_v39  ;;  %v4263_v33 = vrot.slane %v4234_v56, %v8970_v40  ;;  %v7313_v49 = vsel %vm4283_vm4, 1.0, %v8579_v39  ;;  %v4199_v16 = vpop.permute.xlu0 %4198 }
0x2a9d   : > { %vm4278_vm15 = vcmp.lt.f32.partialorder %v4157_v60, %v4255_v63  ;;  %v4365_v45 = vsel %vm1875_vm8, %v7311_v17, 0.0  ;;  %v4371_v60 = vsel %vm1875_vm8, %v7313_v49, 0.0  ;;  %vm2663_vm0 = vcmp.lt.f32.partialorder %v10097_v35, 8.0 }
0x2a9e   : > { %v7308_v2 = vsel %vm4278_vm15, 1.0, %v8579_v39  ;;  %v6778_v46 = vpack.c.bf16 %v6777_v0, %v6777_v0  ;;  %vm4285_vm6 = vcmp.lt.f32.partialorder %v4191_v37, %v4263_v33  ;;  %vm4287_vm7 = vcmp.lt.f32.partialorder %v4199_v16, %v4263_v33 }
0x2a9f   : > { %v4356_v43 = vsel %vm1875_vm8, %v7308_v2, 0.0  ;;  %v7315_v40 = vsel %vm4285_vm6, 1.0, %v8579_v39  ;;  %vm2672_vm15 = vcmp.lt.f32.partialorder %v10215_v15, 8.0  ;;  %v2798_v22 = vsel %vm2663_vm0, %v10227_v55, 0.0 }
0x2aa0   : > { %8099 = vmatmul.mubr.msk.bf16.vlgmr.msra.gmra.mrb[116].mxu1 %vm1370_vm1, %v6778_v46  ;;  %v4165_v11 = vpop.permute.xlu1 %4164  ;;  %4357 = vadd.xlane.f32.xlu0 %v4356_v43  ;;  %v4377_v46 = vsel %vm1875_vm8, %v7315_v40, 0.0  ;;  %v7317_v43 = vsel %vm4287_vm7, 1.0, %v8579_v39  ;;  %v2807_v19 = vsel %vm2672_vm15, %v10146_v34, 0.0  ;;  %vm2664_vm4 = vcmp.lt.f32.partialorder %v10201_v6, 8.0  ;;  %v10739_v6 = vld [vmem:[#allocation17_spill] sm:$0xff] }
0x2aa1   : > { %vm4280_vm3 = vcmp.lt.f32.partialorder %v4165_v11, %v4255_v63  ;;  %4360 = vadd.xlane.f32.xlu1 %v4359_v53  ;;  %8110 = vmatprep.mubr.msk.bf16.mxu1 %vm8580_vm2, %v8579_v39  ;;  %vm2676_vm6 = vcmp.lt.f32.partialorder %v10219_v18, 8.0  ;;  %vm2666_vm7 = vcmp.lt.f32.partialorder %v10205_v57, 8.0  ;;  %v8412_v57 = vld [vmem:[%s10738_s23 + $0x10] sm:$0xff]   ;;  %vm2905_vm0 = vcmask 130112  }
0x2aa2   : > { %v7310_v38 = vsel %vm4280_vm3, 1.0, %v8579_v39  ;;  %vm2673_vm3 = vcmp.lt.f32.partialorder %v10128_v9, 8.0  ;;  %v2811_v35 = vsel %vm2676_vm6, %v10150_v42, 0.0  ;;  %vm2999_vm6 = vcmask 1042434  }
0x2aa3   : > { %v4362_v5 = vsel %vm1875_vm8, %v7310_v38, 0.0  ;;  %v2794_v38 = vsel %vm2659_vm11, %v10134_v31, 0.0  ;;  %vm2667_vm11 = vcmp.lt.f32.partialorder %v10114_v24, 8.0 }
0x2aa4   : > { %v4176_v4 = vpop.permute.xlu1 %4175  ;;  %4363 = vadd.xlane.f32.xlu0 %v4362_v5  ;;  %v2795_v5 = vsel %vm2660_vm12, %v10223_v3, 0.0  ;;  %v2802_v42 = vsel %vm2667_vm11, %v10231_v28, 0.0  ;;  %vm2669_vm12 = vcmp.lt.f32.partialorder %v10122_v25, 8.0  ;;  %v10736_v25 = vld [vmem:[#allocation19_spill] sm:$0xff] }
0x2aa5   : > { %vm4282_vm5 = vcmp.lt.f32.partialorder %v4176_v4, %v4259_v10  ;;  %4366 = vadd.xlane.f32.xlu1 %v4365_v45  ;;  %v2796_v4 = vsel %vm2661_vm14, %v10225_v21, 0.0  ;;  %vm2671_vm14 = vcmp.lt.f32.partialorder %v10126_v27, 8.0  ;;  %v8411_v27 = vld [vmem:[%s10738_s23 + $0x8] sm:$0xff]  }
0x2aa6   : > { %v7312_v63 = vsel %vm4282_vm5, 1.0, %v8579_v39  ;;  %vm2675_vm5 = vcmp.lt.f32.partialorder %v10130_v29, 8.0  ;;  %v2801_v29 = vsel %vm2666_vm7, %v10140_v59, 0.0  ;;  %v2806_v24 = vsel %vm2671_vm14, %v10235_v41, 0.0 }
0x2aa7   : > { %v4368_v36 = vsel %vm1875_vm8, %v7312_v63, 0.0  ;;  %v2810_v34 = vsel %vm2675_vm5, %v10239_v54, 0.0  ;;  %vm2997_vm5 = vcmask 1041409   ;;  %vm3003_vm7 = vcmask 1044484  }
0x2aa8   : > { %v4184_v50 = vpop.permute.xlu1 %4183  ;;  %4369 = vadd.xlane.f32.xlu0 %v4368_v36 }
0x2aa9   : > { %vm4284_vm2 = vcmp.lt.f32.partialorder %v4184_v50, %v4259_v10  ;;  %4372 = vadd.xlane.f32.xlu1 %v4371_v60  ;;  %v4383_v10 = vsel %vm1875_vm8, %v7317_v43, 0.0 }
0x2aaa   : > { %v7314_v0 = vsel %vm4284_vm2, 1.0, %v8579_v39  ;;  %vm2665_vm2 = vcmp.lt.f32.partialorder %v10105_v23, 8.0 }
0x2aab   : > { %v4374_v51 = vsel %vm1875_vm8, %v7314_v0, 0.0  ;;  %v2800_v9 = vsel %vm2665_vm2, %v10229_v8, 0.0  ;;  %vm3001_vm2 = vcmask 1043459  }
0x2aac   : > { %v4195_v2 = vpop.permute.xlu1 %4194  ;;  %4375 = vadd.xlane.f32.xlu0 %v4374_v51 }
0x2aad   : > { %vm4286_vm9 = vcmp.lt.f32.partialorder %v4195_v2, %v4263_v33  ;;  %4378 = vadd.xlane.f32.xlu1 %v4377_v46 }
0x2aae   : > { %v7316_v56 = vsel %vm4286_vm9, 1.0, %v8579_v39  ;;  %vm2677_vm9 = vcmp.lt.f32.partialorder %v10132_v30, 8.0  ;;  %v2804_v30 = vsel %vm2669_vm12, %v10233_v47, 0.0 }
0x2aaf   : > { %v4380_v11 = vsel %vm1875_vm8, %v7316_v56, 0.0 }
0x2ab0   : > { %v4203_v53 = vpop.permute.xlu1 %4202  ;;  %4381 = vadd.xlane.f32.xlu0 %v4380_v11 }
0x2ab1   : > { %vm4288_vm10 = vcmp.lt.f32.partialorder %v4203_v53, %v4263_v33  ;;  %4384 = vadd.xlane.f32.xlu1 %v4383_v10  ;;  %v2803_v33 = vsel %vm2668_vm13, %v10142_v1, 0.0  ;;  %v2808_v1 = vsel %vm2673_vm3, %v10237_v52, 0.0  ;;  %vm2670_vm13 = vcmp.lt.f32.partialorder %v10212_v7, 8.0  ;;  %v10740_v7 = vld [vmem:[#allocation18_spill] sm:$0xff] }
0x2ab2   : > { %v7318_v17 = vsel %vm4288_vm10, 1.0, %v8579_v39  ;;  %vm2678_vm10 = vcmp.lt.f32.partialorder %v10221_v20, 8.0  ;;  %v2805_v59 = vsel %vm2670_vm13, %v10144_v26, 0.0  ;;  %v8410_v26 = vld [vmem:[%s10738_s23] sm:$0xff]   ;;  %vm2912_vm3 = vcmask 195712  }
0x2ab3   : > { %v4386_v37 = vsel %vm1875_vm8, %v7318_v17, 0.0  ;;  %vm2662_vm8 = vcmp.lt.f32.partialorder %v10189_v12, 8.0  ;;  %v2813_v23 = vsel %vm2678_vm10, %v10156_v44, 0.0  ;;  %v10735_v44 = vld [vmem:[#allocation20_spill] sm:$0xff]  ;;  %8103 = vmatpush3.bf16.msra.mxu1 %v8410_v26 }
0x2ab4   : > { %4387 = vadd.xlane.f32.xlu0 %v4386_v37  ;;  %v2797_v31 = vsel %vm2662_vm8, %v10136_v32, 0.0  ;;  %v2799_v32 = vsel %vm2664_vm4, %v10138_v13, 0.0  ;;  %v2812_v13 = vsel %vm2677_vm9, %v10243_v61, 0.0  ;;  %vm2674_vm8 = vcmp.lt.f32.partialorder %v10735_v44, 8.0  ;;  %v10737_v12 = vld [vmem:[#allocation16_spill] sm:$0xff]  ;;  %8104 = vmatprep.subr.bf16.mxu1 %v8579_v39 }
0x2ab5   : > { %v2809_v62 = vsel %vm2674_vm8, %v10736_v25, 0.0  ;;  %v10741_v37 = vlaneseq  ;;  %vm2919_vm4 = vcmask 261312   ;;  %vm3006_vm9 = vcmask 258048  }
0x2ab7   : > { %8105 = vmatpush3.bf16.msra.mxu1 %v8411_v27 }
0x2ab8   : > { %8106 = vmatprep.subr.bf16.mxu1 %v8579_v39 }
0x2abb   : > { %8107 = vmatpush3.bf16.msra.mxu1 %v8412_v57 }
0x2abc   : > { %8108 = vmatprep.subr.bf16.mxu1 %v8579_v39  ;;  %v10377_v39 = vpop.xlane.xlu0 %4330 }
0x2abd   : > { %vm4389_vm10 = vcmp.lt.f32.partialorder %v10377_v39, 8.0 }
0x2abf   : > { %8109 = vmatpush3.bf16.msra.mxu1 %v8413_v14 }
0x2ac2   : > { %2835 = vperm.xlu1 %8166, %v2794_v38   ;;  %v2895_v38 = vand.u32 127, %v10741_v37 }
0x2ac6   : > { %2838 = vperm.xlu1 %8166, %v2795_v5  }
0x2aca   : > { %2841 = vperm.xlu1 %8166, %v2796_v4   ;;  %2862 = vperm.xlu0 %8167, %v2803_v33   ;;  %v2900_v33 = vadd.s32 4294967288, %v2895_v38 }
0x2ace   : > { %2844 = vperm.xlu1 %8166, %v2797_v31   ;;  %2874 = vperm.xlu0 %8167, %v2807_v19   ;;  %v2907_v31 = vadd.s32 4294967280, %v2895_v38 }
0x2ad2   : > { %2847 = vperm.xlu1 %8166, %v2798_v22   ;;  %2877 = vperm.xlu0 %8167, %v2808_v1   ;;  %v10742_v22 = vld [vmem:[#allocation15_spill] sm:$0xff] }
0x2ad3   : > { %v10431_v1 = vsub.s32 %v2900_v33, %v10742_v22 }
0x2ad6   : > { %2850 = vperm.xlu1 %8166, %v2799_v32   ;;  %2883 = vperm.xlu0 %8167, %v2810_v34  }
0x2ada   : > { %2853 = vperm.xlu1 %8166, %v2800_v9   ;;  %2886 = vperm.xlu0 %8167, %v2811_v35   ;;  %v2914_v35 = vadd.s32 4294967272, %v2895_v38  ;;  %v10434_v9 = vsub.s32 %v2895_v38, %v10742_v22  ;;  %v6787_v38 = vld [vmem:[%s10744_s21] sm:$0x1]  ;;  %s6956_s21 = sshll.u32 %s737_s19, 4  ;;  %s10569_s21 = int_to_ptr.vmem [resolvable:$true] %s6956_s21 }
0x2adb   : > { %s8514_s26 = scalar_lea.vmem %s10569_s21, 16  ;;  %p8521_p0 = scmp.lt.s32.totalorder %s10569_s21, %s8519_s5 }
0x2adc   : > { %p8515_p11 = scmp.ne.s32.totalorder %s10569_s21, %s8514_s26  ;;  %p8522_p1 = scmp.lt.s32.totalorder %s8520_s17, %s8514_s26 }
0x2ade   : > { %2856 = vperm.xlu1 %8166, %v2801_v29   ;;  %2889 = vperm.xlu0 %8167, %v2812_v13   ;;  %v10437_v29 = vsub.s32 %v2907_v31, %v10742_v22  ;;  %p8516_p12 = pnand %p8515_p11, %p8754_p5  ;;  %p8523_p2 = por %p8522_p1, %p8521_p0 }
0x2ae0   : > { %p8517_p13 = pneg %p8516_p12 }
0x2ae2   : > { %2859 = vperm.xlu1 %8166, %v2802_v42   ;;  %2892 = vperm.xlu0 %8167, %v2813_v23   ;;  %v10441_v42 = vsub.s32 %v2914_v35, %v10742_v22  ;;  %p8524_p3 = pnand %p8523_p2, %p8517_p13 }
0x2ae6   : > { %2865 = vperm.xlu1 %8166, %v2804_v30   ;;  %4418 = vbcast.lane.b32.xlu0 %v10083_v48, 264 }
0x2aea   : > { %2868 = vperm.xlu1 %8166, %v2805_v59   ;;  %4433 = vbcast.lane.b32.xlu0 %v10091_v58, 256 }
0x2aee   : > { %2871 = vperm.xlu1 %8166, %v2806_v24   ;;  %4441 = vbcast.lane.b32.xlu0 %v10091_v58, 272 }
0x2af2   : > { %2880 = vperm.xlu1 %8166, %v2809_v62   ;;  %4452 = vbcast.lane.b32.xlu0 %v10737_v12, 256 }
0x2af6   : > { %4414 = vbcast.lane.b32.xlu1 %v10083_v48, 256  ;;  %4460 = vbcast.lane.b32.xlu0 %v10737_v12, 272 }
0x2afa   : > { %4422 = vbcast.lane.b32.xlu1 %v10083_v48, 272  ;;  %4471 = vbcast.lane.b32.xlu0 %v10739_v6, 256 }
0x2afe   : > { %4426 = vbcast.lane.b32.xlu1 %v10083_v48, 280  ;;  %4479 = vbcast.lane.b32.xlu0 %v10739_v6, 272  ;;  %v10380_v48 = vpop.xlane.xlu0 %4336 }
0x2aff   : > { %vm4391_vm11 = vcmp.lt.f32.partialorder %v10380_v48, 8.0 }
0x2b02   : > { %4437 = vbcast.lane.b32.xlu1 %v10091_v58, 264  ;;  %4490 = vbcast.lane.b32.xlu0 %v10740_v7, 256 }
0x2b06   : > { %4445 = vbcast.lane.b32.xlu1 %v10091_v58, 280  ;;  %4498 = vbcast.lane.b32.xlu0 %v10740_v7, 272 }
0x2b0a   : > { %4456 = vbcast.lane.b32.xlu1 %v10737_v12, 264 }
0x2b0e   : > { %4464 = vbcast.lane.b32.xlu1 %v10737_v12, 280 }
0x2b12   : > { %4475 = vbcast.lane.b32.xlu1 %v10739_v6, 264 }
0x2b16   : > { %4483 = vbcast.lane.b32.xlu1 %v10739_v6, 280 }
0x2b1a   : > { %4494 = vbcast.lane.b32.xlu1 %v10740_v7, 264 }
0x2b1d   : > { %v4334_v15 = vpop.xlane.xlu1 %4333 }
0x2b1e   : > { %4502 = vbcast.lane.b32.xlu1 %v10740_v7, 280  ;;  %vm4390_vm15 = vcmp.lt.f32.partialorder %v4334_v15, 8.0 }
0x2b21   : > { %v10383_v58 = vpop.xlane.xlu1 %4342  ;;  %v10385_v18 = vpop.xlane.xlu0 %4339 }
0x2b22   : > { %vm4393_vm12 = vcmp.lt.f32.partialorder %v10383_v58, 8.0  ;;  %vm4392_vm13 = vcmp.lt.f32.partialorder %v10385_v18, 8.0 }
0x2b25   : > { %v10387_v20 = vpop.xlane.xlu1 %4348  ;;  %v10389_v3 = vpop.xlane.xlu0 %4345 }
0x2b26   : > { %vm4395_vm14 = vcmp.lt.f32.partialorder %v10387_v20, 8.0  ;;  %vm4394_vm8 = vcmp.lt.f32.partialorder %v10389_v3, 8.0 }
0x2b29   : > { %v10391_v21 = vpop.xlane.xlu1 %4354  ;;  %v10393_v55 = vpop.xlane.xlu0 %4351 }
0x2b2d   : > { %v10395_v8 = vpop.xlane.xlu0 %4357 }
0x2b2e   : > { %v10397_v28 = vpop.xlane.xlu1 %4360 }
0x2b31   : > { %v10399_v47 = vpop.xlane.xlu0 %4363 }
0x2b32   : > { %v10401_v41 = vpop.xlane.xlu1 %4366 }
0x2b35   : > { %v10403_v52 = vpop.xlane.xlu0 %4369 }
0x2b36   : > { %v10405_v54 = vpop.xlane.xlu1 %4372 }
0x2b39   : > { %v10407_v61 = vpop.xlane.xlu0 %4375 }
0x2b3a   : > { %v10409_v45 = vpop.xlane.xlu1 %4378 }
0x2b3d   : > { %v10413_v63 = vpop.xlane.xlu0 %4381 }
0x2b3e   : > { %v10411_v49 = vpop.xlane.xlu1 %4384 }
0x2b41   : > { %v10415_v36 = vpop.xlane.xlu0 %4387 }
0x2b42   : > { %v2836_v16 = vpop.permute.xlu1 %2835 }
0x2b43   : > { %v2899_v59 = vrot.slane %v2836_v16, %v10434_v9 }
0x2b46   : > { %v2839_v50 = vpop.permute.xlu1 %2838 }
0x2b47   : > { %v2904_v13 = vrot.slane %v2839_v50, %v10431_v1 }
0x2b49   : > { %v2863_v60 = vpop.permute.xlu0 %2862  ;;  %v2906_v27 = vsel %vm2905_vm0, %v2904_v13, %v2899_v59 }
0x2b4a   : > { %v2842_v40 = vpop.permute.xlu1 %2841  ;;  %v2947_v6 = vrot.slane %v2863_v60, %v10431_v1 }
0x2b4b   : > { %v2911_v24 = vrot.slane %v2842_v40, %v10437_v29 }
0x2b4d   : > { %v2875_v0 = vpop.permute.xlu0 %2874 }
0x2b4e   : > { %v10417_v51 = vpop.permute.xlu1 %2844  ;;  %v2966_v16 = vrot.slane %v2875_v0, %v10431_v1 }
0x2b4f   : > { %v2918_v15 = vrot.slane %v10417_v51, %v10441_v42 }
0x2b51   : > { %v10419_v2 = vpop.permute.xlu0 %2877 }
0x2b52   : > { %v2848_v46 = vpop.permute.xlu1 %2847  ;;  %v2971_v33 = vrot.slane %v10419_v2, %v10437_v29 }
0x2b53   : > { %v2924_v62 = vrot.slane %v2848_v46, %v10434_v9  ;;  %v2913_v46 = vsel %vm2912_vm3, %v2911_v24, %v2906_v27 }
0x2b55   : > { %v10421_v43 = vpop.permute.xlu0 %2883 }
0x2b56   : > { %v2851_v56 = vpop.permute.xlu1 %2850 }
0x2b57   : > { %v2928_v30 = vrot.slane %v2851_v56, %v10431_v1 }
0x2b59   : > { %v10423_v11 = vpop.permute.xlu0 %2886  ;;  %v2929_v50 = vsel %vm2905_vm0, %v2928_v30, %v2924_v62 }
0x2b5a   : > { %v2854_v53 = vpop.permute.xlu1 %2853  ;;  %v2985_v60 = vrot.slane %v10423_v11, %v10431_v1  ;;  %v2981_v11 = vrot.slane %v10421_v43, %v10434_v9 }
0x2b5b   : > { %v2933_v44 = vrot.slane %v2854_v53, %v10437_v29 }
0x2b5d   : > { %v10425_v10 = vpop.permute.xlu0 %2889  ;;  %v2934_v56 = vsel %vm2912_vm3, %v2933_v44, %v2929_v50 }
0x2b5e   : > { %v2857_v17 = vpop.permute.xlu1 %2856  ;;  %v2990_v51 = vrot.slane %v10425_v10, %v10437_v29 }
0x2b5f   : > { %v2938_v12 = vrot.slane %v2857_v17, %v10441_v42 }
0x2b61   : > { %v10428_v5 = vpop.permute.xlu0 %2892  ;;  %v2939_v17 = vsel %vm2919_vm4, %v2938_v12, %v2934_v56 }
0x2b62   : > { %v2860_v4 = vpop.permute.xlu1 %2859 }
0x2b63   : > { %v2943_v25 = vrot.slane %v2860_v4, %v10434_v9  ;;  %v2995_v4 = vrot.slane %v10428_v5, %v10441_v42 }
0x2b65   : > { %v4419_v19 = vpop.permute.xlu0 %4418  ;;  %v2948_v53 = vsel %vm2905_vm0, %v2947_v6, %v2943_v25 }
0x2b66   : > { %v2866_v32 = vpop.permute.xlu1 %2865  ;;  %v4525_v34 = vsel %vm4390_vm15, %v4419_v19, 0.0  ;;  %v2920_v19 = vsel %vm2919_vm4, %v2918_v15, %v2913_v46  ;;  %vm4397_vm15 = vcmp.lt.f32.partialorder %v10391_v21, 8.0 }
0x2b67   : > { %4568 = vperm.xlu1 %8166, %v4525_v34   ;;  %v2952_v26 = vrot.slane %v2866_v32, %v10437_v29  ;;  %v2986_v34 = vsel %vm2905_vm0, %v2985_v60, %v2981_v11  ;;  %v2998_v2 = vsel %vm2997_vm5, %v2939_v17, %v2920_v19 }
0x2b68   : > { %v2991_v5 = vsel %vm2912_vm3, %v2990_v51, %v2986_v34 }
0x2b69   : > { %v4434_v14 = vpop.permute.xlu0 %4433  ;;  %v2953_v0 = vsel %vm2912_vm3, %v2952_v26, %v2948_v53  ;;  %v2996_v44 = vsel %vm2919_vm4, %v2995_v4, %v2991_v5 }
0x2b6a   : > { %v2869_v23 = vpop.permute.xlu1 %2868  ;;  %v4528_v15 = vsel %vm4393_vm12, %v4434_v14, 0.0  ;;  %vm4398_vm12 = vcmp.lt.f32.partialorder %v10395_v8, 8.0 }
0x2b6b   : > { %v2957_v57 = vrot.slane %v2869_v23, %v10441_v42 }
0x2b6d   : > { %v2958_v10 = vsel %vm2919_vm4, %v2957_v57, %v2953_v0  ;;  %v4442_v35 = vpop.permute.xlu0 %4441 }
0x2b6e   : > { %v2872_v7 = vpop.permute.xlu1 %2871  ;;  %v3000_v30 = vsel %vm2999_vm6, %v2958_v10, %v2998_v2  ;;  %v4530_v56 = vsel %vm4395_vm14, %v4442_v35, 0.0  ;;  %vm4403_vm14 = vcmp.lt.f32.partialorder %v10405_v54, 8.0 }
0x2b6f   : > { %v2962_v40 = vrot.slane %v2872_v7, %v10434_v9 }
0x2b71   : > { %v2967_v37 = vsel %vm2905_vm0, %v2966_v16, %v2962_v40  ;;  %v4453_v6 = vpop.permute.xlu0 %4452 }
0x2b72   : > { %v2881_v31 = vpop.permute.xlu1 %2880  ;;  %v2972_v43 = vsel %vm2912_vm3, %v2971_v33, %v2967_v37  ;;  %v4532_v14 = vsel %vm4397_vm15, %v4453_v6, 0.0  ;;  %vm4405_vm15 = vcmp.lt.f32.partialorder %v10409_v45, 8.0 }
0x2b73   : > { %v2976_v22 = vrot.slane %v2881_v31, %v10441_v42  ;;  %v6849_v32 = vpop.f32.mrb[116].mxu1 }
0x2b74   : > { %v6850_v13 = vadd.f32 %v6849_v32, %v6787_v38  ;;  %v8100_v23 = vpop.f32.mrb[117].mxu1 }
0x2b75   : > { %v2977_v59 = vsel %vm2919_vm4, %v2976_v22, %v2972_v43  ;;  %v6852_v24 = vpop.f32.mrb[118].mxu1  ;;  %v4461_v40 = vpop.permute.xlu0 %4460 }
0x2b76   : > { %v3002_v25 = vsel %vm3001_vm2, %v2977_v59, %v3000_v30  ;;  %8512 = vtanh.f32 %v6850_v13  ;;  %v4415_v62 = vpop.permute.xlu1 %4414  ;;  %v8101_v12 = vpop.f32.mrb[119].mxu1 }
0x2b77   : > { %v3004_v26 = vsel %vm3003_vm7, %v2996_v44, %v3002_v25  ;;  %v4524_v27 = vsel %vm4389_vm10, %v4415_v62, 0.0  ;;  %vm4396_vm10 = vcmp.lt.f32.partialorder %v10393_v55, 8.0 }
0x2b78   : > { %3007 = vst.msk [vmem:[%s10488_s20] sm:$0x1f] %vm3006_vm9, %v3004_v26  ;;  %4565 = vperm.xlu0 %8167, %v4524_v27  }
0x2b79   : > { %v4472_v58 = vpop.permute.xlu0 %4471 }
0x2b7a   : > { %v4423_v57 = vpop.permute.xlu1 %4422 }
0x2b7b   : > { %v4526_v7 = vsel %vm4391_vm11, %v4423_v57, 0.0  ;;  %vm4399_vm11 = vcmp.lt.f32.partialorder %v10397_v28, 8.0 }
0x2b7c   : > { %4571 = vperm.xlu0 %8167, %v4526_v7   ;;  %v4534_v3 = vsel %vm4399_vm11, %v4461_v40, 0.0  ;;  %vm4407_vm11 = vcmp.lt.f32.partialorder %v10411_v49, 8.0 }
0x2b7d   : > { %v4480_v51 = vpop.permute.xlu0 %4479 }
0x2b7e   : > { %v4427_v39 = vpop.permute.xlu1 %4426  ;;  %v4538_v37 = vsel %vm4403_vm14, %v4480_v51, 0.0 }
0x2b7f   : > { %v4527_v16 = vsel %vm4392_vm13, %v4427_v39, 0.0  ;;  %vm4400_vm13 = vcmp.lt.f32.partialorder %v10399_v47, 8.0 }
0x2b80   : > { %v8513_v50 = vpop.eup %8512  ;;  %4574 = vperm.xlu1 %8166, %v4527_v16   ;;  %4577 = vperm.xlu0 %8167, %v4528_v15  }
0x2b81   : > { %v6856_v46 = vpack.c.bf16 %v8513_v50, %v8513_v50  ;;  %v4491_v8 = vpop.permute.xlu0 %4490 }
0x2b82   : > { %v4438_v48 = vpop.permute.xlu1 %4437 }
0x2b83   : > { %v4529_v60 = vsel %vm4394_vm8, %v4438_v48, 0.0  ;;  %8111 = vmatmul.mubr.msk.bf16.vlgmr.msra.gmra.mrb[120].mxu1 %vm1370_vm1, %v6856_v46  ;;  %vm4401_vm1 = vcmp.lt.f32.partialorder %v10401_v41, 8.0  ;;  %vm4402_vm8 = vcmp.lt.f32.partialorder %v10403_v52, 8.0  ;;  %v4540_v41 = vsel %vm4405_vm15, %v4491_v8, 0.0 }
0x2b84   : > { %4580 = vperm.xlu1 %8166, %v4529_v60   ;;  %4583 = vperm.xlu0 %8167, %v4530_v56   ;;  %v4536_v55 = vsel %vm4401_vm1, %v4472_v58, 0.0  ;;  %vm4408_vm1 = vcmp.lt.f32.partialorder %v10415_v36, 8.0 }
0x2b85   : > { %v4499_v11 = vpop.permute.xlu0 %4498 }
0x2b86   : > { %v4446_v18 = vpop.permute.xlu1 %4445  ;;  %v4542_v54 = vsel %vm4407_vm11, %v4499_v11, 0.0 }
0x2b87   : > { %v4531_v53 = vsel %vm4396_vm10, %v4446_v18, 0.0  ;;  %vm4404_vm10 = vcmp.lt.f32.partialorder %v10407_v61, 8.0 }
0x2b88   : > { %4586 = vperm.xlu1 %8166, %v4531_v53   ;;  %4589 = vperm.xlu0 %8167, %v4532_v14  }
0x2b8a   : > { %v4457_v20 = vpop.permute.xlu1 %4456 }
0x2b8b   : > { %v4533_v17 = vsel %vm4398_vm12, %v4457_v20, 0.0  ;;  %vm4406_vm12 = vcmp.lt.f32.partialorder %v10413_v63, 8.0 }
0x2b8c   : > { %4592 = vperm.xlu1 %8166, %v4533_v17   ;;  %4595 = vperm.xlu0 %8167, %v4534_v3  }
0x2b8e   : > { %v4465_v21 = vpop.permute.xlu1 %4464 }
0x2b8f   : > { %v4535_v0 = vsel %vm4400_vm13, %v4465_v21, 0.0 }
0x2b90   : > { %4598 = vperm.xlu1 %8166, %v4535_v0   ;;  %4601 = vperm.xlu0 %8167, %v4536_v55  }
0x2b92   : > { %v4476_v28 = vpop.permute.xlu1 %4475 }
0x2b93   : > { %v4537_v38 = vsel %vm4402_vm8, %v4476_v28, 0.0 }
0x2b94   : > { %4604 = vperm.xlu1 %8166, %v4537_v38   ;;  %4607 = vperm.xlu0 %8167, %v4538_v37  }
0x2b96   : > { %v4484_v47 = vpop.permute.xlu1 %4483 }
0x2b97   : > { %v4539_v33 = vsel %vm4404_vm10, %v4484_v47, 0.0 }
0x2b98   : > { %4610 = vperm.xlu1 %8166, %v4539_v33   ;;  %4613 = vperm.xlu0 %8167, %v4540_v41  }
0x2b9a   : > { %v4495_v52 = vpop.permute.xlu1 %4494 }
0x2b9b   : > { %v4541_v4 = vsel %vm4406_vm12, %v4495_v52, 0.0 }
0x2b9c   : > { %4616 = vperm.xlu1 %8166, %v4541_v4   ;;  %4619 = vperm.xlu0 %8167, %v4542_v54   ;;  %v6865_v54 = vld [vmem:[%s10748_s4] sm:$0x1] }
0x2b9e   : > { %v4503_v45 = vpop.permute.xlu1 %4502 }
0x2b9f   : > { %v4543_v10 = vsel %vm4408_vm1, %v4503_v45, 0.0 }
0x2ba0   : > { %4622 = vperm.xlu1 %8166, %v4543_v10  }
0x2be6   : > { %v4569_v31 = vpop.permute.xlu1 %4568 }
0x2be7   : > { %v4631_v46 = vrot.slane %v4569_v31, %v10431_v1 }
0x2bf7   : > { %v4566_v61 = vpop.permute.xlu0 %4565 }
0x2bf8   : > { %v4627_v12 = vrot.slane %v4566_v61, %v10434_v9 }
0x2bfa   : > { %v4632_v3 = vsel %vm2905_vm0, %v4631_v46, %v4627_v12 }
0x2bfb   : > { %v4572_v19 = vpop.permute.xlu0 %4571 }
0x2bfc   : > { %v4636_v15 = vrot.slane %v4572_v19, %v10437_v29 }
0x2bfe   : > { %v4637_v55 = vsel %vm2912_vm3, %v4636_v15, %v4632_v3 }
0x2bff   : > { %v4575_v22 = vpop.permute.xlu1 %4574  ;;  %v4578_v32 = vpop.permute.xlu0 %4577 }
0x2c00   : > { %v4646_v24 = vrot.slane %v4578_v32, %v10434_v9  ;;  %v4641_v48 = vrot.slane %v4575_v22, %v10441_v42 }
0x2c03   : > { %v4581_v34 = vpop.permute.xlu1 %4580  ;;  %v4584_v2 = vpop.permute.xlu0 %4583 }
0x2c04   : > { %v4650_v36 = vrot.slane %v4581_v34, %v10431_v1  ;;  %v4655_v26 = vrot.slane %v4584_v2, %v10437_v29 }
0x2c06   : > { %v4651_v6 = vsel %vm2905_vm0, %v4650_v36, %v4646_v24 }
0x2c07   : > { %v4587_v49 = vpop.permute.xlu1 %4586  ;;  %v4590_v35 = vpop.permute.xlu0 %4589  ;;  %v4656_v14 = vsel %vm2912_vm3, %v4655_v26, %v4651_v6 }
0x2c08   : > { %v4665_v27 = vrot.slane %v4590_v35, %v10434_v9  ;;  %v4660_v57 = vrot.slane %v4587_v49, %v10441_v42 }
0x2c0a   : > { %v4661_v17 = vsel %vm2919_vm4, %v4660_v57, %v4656_v14 }
0x2c0b   : > { %v4593_v63 = vpop.permute.xlu1 %4592  ;;  %v4596_v43 = vpop.permute.xlu0 %4595 }
0x2c0c   : > { %v4669_v59 = vrot.slane %v4593_v63, %v10431_v1  ;;  %v4674_v7 = vrot.slane %v4596_v43, %v10437_v29 }
0x2c0e   : > { %v4670_v16 = vsel %vm2905_vm0, %v4669_v59, %v4665_v27 }
0x2c0f   : > { %v4599_v13 = vpop.permute.xlu1 %4598  ;;  %v4602_v23 = vpop.permute.xlu0 %4601  ;;  %v4675_v51 = vsel %vm2912_vm3, %v4674_v7, %v4670_v16 }
0x2c10   : > { %v4684_v39 = vrot.slane %v4602_v23, %v10434_v9  ;;  %v4679_v50 = vrot.slane %v4599_v13, %v10441_v42 }
0x2c12   : > { %v4680_v0 = vsel %vm2919_vm4, %v4679_v50, %v4675_v51 }
0x2c13   : > { %v4605_v5 = vpop.permute.xlu1 %4604  ;;  %v4608_v30 = vpop.permute.xlu0 %4607 }
0x2c14   : > { %v4688_v44 = vrot.slane %v4605_v5, %v10431_v1  ;;  %v4693_v40 = vrot.slane %v4608_v30, %v10437_v29 }
0x2c16   : > { %v4689_v56 = vsel %vm2905_vm0, %v4688_v44, %v4684_v39 }
0x2c17   : > { %v4611_v25 = vpop.permute.xlu1 %4610  ;;  %v4614_v62 = vpop.permute.xlu0 %4613  ;;  %v4694_v8 = vsel %vm2912_vm3, %v4693_v40, %v4689_v56 }
0x2c18   : > { %v4698_v60 = vrot.slane %v4611_v25, %v10441_v42  ;;  %v4703_v53 = vrot.slane %v4614_v62, %v10434_v9 }
0x2c1a   : > { %v4699_v28 = vsel %vm2919_vm4, %v4698_v60, %v4694_v8 }
0x2c1b   : > { %v4617_v58 = vpop.permute.xlu1 %4616  ;;  %v4620_v18 = vpop.permute.xlu0 %4619 }
0x2c1c   : > { %v4707_v20 = vrot.slane %v4617_v58, %v10431_v1  ;;  %v4712_v21 = vrot.slane %v4620_v18, %v10437_v29  ;;  %v4642_v1 = vsel %vm2919_vm4, %v4641_v48, %v4637_v55 }
0x2c1d   : > { %v4719_v38 = vsel %vm2997_vm5, %v4661_v17, %v4642_v1 }
0x2c1e   : > { %v4708_v9 = vsel %vm2905_vm0, %v4707_v20, %v4703_v53  ;;  %v4720_v29 = vsel %vm2999_vm6, %v4680_v0, %v4719_v38  ;;  %vm6933_vm0 = vcmask 73728  }
0x2c1f   : > { %v4623_v37 = vpop.permute.xlu1 %4622  ;;  %v4713_v41 = vsel %vm2912_vm3, %v4712_v21, %v4708_v9  ;;  %v4721_v33 = vsel %vm3001_vm2, %v4699_v28, %v4720_v29 }
0x2c20   : > { %v4717_v47 = vrot.slane %v4623_v37, %v10441_v42 }
0x2c22   : > { %v4718_v11 = vsel %vm2919_vm4, %v4717_v47, %v4713_v41 }
0x2c23   : > { %v4722_v52 = vsel %vm3003_vm7, %v4718_v11, %v4721_v33 }
0x2c24   : > { %7319 = vst.msk [vmem:[%s10488_s20 + $0x8] sm:$0x1f] %vm3006_vm9, %v4722_v52  ;;  %s6941_s20 = scalar_lea.sflag [#allocation3], %s736_s27 }
0x2c56   : > { %v6927_v42 = vpop.f32.mrb[120].mxu1 }
0x2c57   : > { %v6928_v4 = vadd.f32 %v6927_v42, %v6865_v54  ;;  %v8112_v45 = vpop.f32.mrb[121].mxu1 }
0x2c58   : > { %v6930_v10 = vpop.f32.mrb[122].mxu1 }
0x2c59   : > { %v8113_v61 = vpop.f32.mrb[123].mxu1  ;;  %6934 = vst.msk [vmem:[%s737_s19] sm:$0x1] %vm6933_vm0, %v6928_v4 }
0x2c5a   : > { %8527 = shalt.err (!%p8524_p3)
}
0x2c5b   : > { %s8528_s27 = scalar_lea.hbm %s10567_s28, 16  ;;  %s8532_s19 = scalar_lea.hbm %s10750_s8, 32 }
0x2c5c   : > { %p8529_p4 = scmp.ne.s32.totalorder %s10567_s28, %s8528_s27  ;;  %p8533_p9 = scmp.lt.u32.totalorder %s10567_s28, %s10750_s8 }
0x2c5d   : > { %p8534_p10 = scmp.lt.u32.totalorder %s8532_s19, %s8528_s27  ;;  %p8536_p12 = scmp.lt.u32.totalorder %s8528_s27, %s10567_s28 }
0x2c5e   : > { %p8530_p7 = pnand %p8529_p4, %p8754_p5 }
0x2c5f   : > { %p8535_p11 = por %p8534_p10, %p8533_p9 }
0x2c60   : > { %p8531_p8 = pneg %p8530_p7 }
0x2c61   : > { %p8537_p13 = por %p8536_p12, %p8535_p11 }
0x2c63   : > { %p8538_p0 = pnand %p8537_p13, %p8531_p8 }
0x2c65   : > { %8541 = shalt.err (!%p8538_p0)
}
0x2c66   : > { %8115 = dma.vmem_to_hbm [thread:$0]  (%p8754_p5), %s10569_s21, 16, %s10567_s28, %s6941_s20  }
0x2c67 PF: > { %s10751_s26 = sld [smem:[#allocation8_spill]]  ;;  %s10752_s7 = sld [smem:[#allocation5_spill]] }
0x2c6d   : > { %p8121_p1 = scmp.ge.s32.totalorder %s10751_s26, 2  ;;  %s6976_s17 = sand.u32 1, %s10752_s7  }
0x2c6e   : > { %s6977_s4 = scalar_lea.sflag [#allocation3], %s6976_s17 }
0x2c6f   : > { %p8118_p2 = pnand %p8121_p1, %p8758_p6 }
0x2c71   : > { %8559 = dma.done.wait (!%p8118_p2), %s6977_s4, 16  }
0x2c72   : > { %8561 = vsyncadd (!%p8118_p2), %s6977_s4, 4294967280  ;;  %s10754_s28 = sld [smem:[#allocation10_spill]]  ;;  %s10755_s5 = sld [smem:[#allocation6_spill]] }
0x2c73   : > { %s10756_s26 = sld [smem:[#allocation7_spill]]  ;;  %s10757_s27 = sld [smem:[#allocation11_spill]] }
0x2c78   : > { %p35_p3 = scmp.ge.s32.totalorder %s10754_s28, 4  }
0x2c7a   :  { %37 = sbr.rel (!%p35_p3) target bundleno = 21 (0x15), region = 196 }
0x2c81   :  { %6981 = vsyncpa [#allocation3], 1 }
0x2c82   :  { %6983 = vsyncpa [#allocation3 + $0x1], 1 }

</bundles_post_ra>
